<compile_context>
chip_gen: v5e
topology: v5e:2x2
jax: 0.10.0
libtpu: 0.0.40
codegen_flags: <defaults>
</compile_context>

<pallas_src>
import functools

import jax
import jax.numpy as jnp
from jax import lax
from jax.experimental import pallas as pl
from jax.experimental.pallas import tpu as pltpu

LANE = 128  # TPU lane width; all intermediate channel dims are padded to this.


# ----------------------------- Pallas kernels ------------------------------

def _conv_relu_pool_kernel(x_ref, w_ref, b_ref, o_ref, scr_ref, *, ho, wo, hp, wp):
    """Fused 3x3 valid conv + bias + ReLU + 2x2/stride-2 max pool for one image.

    x_ref  : (1, H, W, Cin)      input activations (f32 or bf16)
    w_ref  : (3, 3, Cin, 128)    weights, bf16, out-channels lane-padded with zeros
    b_ref  : (1, 128)            bias, f32 (zero-padded)
    o_ref  : (1, hp, wp, 128)    pooled output, bf16
    scr_ref: (ho*wo, 128) f32    conv+ReLU rows, flattened row-major (scratch)
    """
    cp = b_ref.shape[-1]

    def conv_row(r, carry):
        acc = jnp.zeros((wo, cp), jnp.float32)
        for dy in range(3):
            for dx in range(3):
                lhs = x_ref[0, r + dy, pl.ds(dx, wo), :].astype(jnp.bfloat16)
                acc += jnp.dot(lhs, w_ref[dy, dx],
                               preferred_element_type=jnp.float32)
        acc = jnp.maximum(acc + b_ref[...], 0.0)
        scr_ref[pl.ds(r * wo, wo), :] = acc
        return carry

    lax.fori_loop(0, ho, conv_row, 0)

    # 2x2 max pool (floor mode) via strided reads of the flattened scratch.
    for i in range(hp):
        base = 2 * i * wo
        p00 = scr_ref[pl.ds(base, wp, stride=2), :]           # row 2i,   even cols
        p01 = scr_ref[pl.ds(base + 1, wp, stride=2), :]       # row 2i,   odd cols
        p10 = scr_ref[pl.ds(base + wo, wp, stride=2), :]      # row 2i+1, even cols
        p11 = scr_ref[pl.ds(base + wo + 1, wp, stride=2), :]  # row 2i+1, odd cols
        o_ref[0, i] = jnp.maximum(jnp.maximum(p00, p01),
                                  jnp.maximum(p10, p11)).astype(o_ref.dtype)


def _conv_head_kernel(x_ref, w_ref, b_ref, wfc_ref, bfc_ref, o_ref, *,
                      ho, wo, n_classes, log_softmax):
    """Fused conv3 + ReLU + global avg pool + FC + (masked) log_softmax."""
    cp = b_ref.shape[-1]
    ssum = jnp.zeros((1, cp), jnp.float32)
    for r in range(ho):                       # ho == 4: fully unrolled
        acc = jnp.zeros((wo, cp), jnp.float32)
        for dy in range(3):
            for dx in range(3):
                lhs = x_ref[0, r + dy, pl.ds(dx, wo), :].astype(jnp.bfloat16)
                acc += jnp.dot(lhs, w_ref[dy, dx],
                               preferred_element_type=jnp.float32)
        acc = jnp.maximum(acc + b_ref[...], 0.0)
        ssum = ssum + jnp.sum(acc, axis=0, keepdims=True)

    pooled = ssum * (1.0 / (ho * wo))                                   # (1, 128)
    logits = jnp.dot(pooled, wfc_ref[...],
                     preferred_element_type=jnp.float32) + bfc_ref[...]  # (1, 128)

    if log_softmax:
        col = lax.broadcasted_iota(jnp.int32, logits.shape, 1)
        valid = col < n_classes
        z = jnp.where(valid, logits, -1e30)
        m = jnp.max(z, axis=-1, keepdims=True)
        e = jnp.where(valid, jnp.exp(z - m), 0.0)
        out = z - m - jnp.log(jnp.sum(e, axis=-1, keepdims=True))
    else:
        out = logits
    o_ref[0] = out.astype(o_ref.dtype)


# ------------------------------- wrappers -----------------------------------

_COMPILER_PARAMS = pltpu.CompilerParams(
    dimension_semantics=("parallel",),        # batch grid -> both TCs on v7x
    vmem_limit_bytes=32 * 1024 * 1024,
)


def _conv_stage(x, w, b, *, out_dtype=jnp.bfloat16):
    """x: (N,H,W,Cin), w: (3,3,Cin,128) bf16, b: (1,128) f32 -> (N,hp,wp,128) bf16."""
    n, h, wd, cin = x.shape
    cp = w.shape[-1]
    ho, wo = h - 2, wd - 2
    hp, wp = ho // 2, wo // 2
    kern = functools.partial(_conv_relu_pool_kernel, ho=ho, wo=wo, hp=hp, wp=wp)
    flops = 2 * n * ho * wo * 9 * cin * cp
    bytes_accessed = (n * h * wd * cin * x.dtype.itemsize
                      + w.size * 2 + b.size * 4 + n * hp * wp * cp * 2)
    return pl.pallas_call(
        kern,
        out_shape=jax.ShapeDtypeStruct((n, hp, wp, cp), out_dtype),
        grid=(n,),
        in_specs=[
            pl.BlockSpec((1, h, wd, cin), lambda i: (i, 0, 0, 0)),
            pl.BlockSpec(w.shape, lambda i: (0, 0, 0, 0)),
            pl.BlockSpec(b.shape, lambda i: (0, 0)),
        ],
        out_specs=pl.BlockSpec((1, hp, wp, cp), lambda i: (i, 0, 0, 0)),
        scratch_shapes=[pltpu.VMEM((ho * wo, cp), jnp.float32)],
        compiler_params=_COMPILER_PARAMS,
        cost_estimate=pl.CostEstimate(flops=flops, transcendentals=0,
                                      bytes_accessed=bytes_accessed),
    )(x, w, b)


def _head_stage(x, w, b, wfc, bfc, *, n_classes=10, log_softmax=True):
    """x: (N,6,6,128) bf16 -> (N, n_classes) f32 (log-probs or logits)."""
    n, h, wd, cin = x.shape
    cp = b.shape[-1]
    ho, wo = h - 2, wd - 2
    kern = functools.partial(_conv_head_kernel, ho=ho, wo=wo,
                             n_classes=n_classes, log_softmax=log_softmax)
    flops = 2 * n * ho * wo * 9 * cin * cp + 2 * n * cp * cp
    bytes_accessed = (n * h * wd * cin * 2 + w.size * 2 + wfc.size * 4
                      + n * cp * 4)
    out = pl.pallas_call(
        kern,
        out_shape=jax.ShapeDtypeStruct((n, 1, cp), jnp.float32),
        grid=(n,),
        in_specs=[
            pl.BlockSpec((1, h, wd, cin), lambda i: (i, 0, 0, 0)),
            pl.BlockSpec(w.shape, lambda i: (0, 0, 0, 0)),
            pl.BlockSpec(b.shape, lambda i: (0, 0)),
            pl.BlockSpec(wfc.shape, lambda i: (0, 0)),
            pl.BlockSpec(bfc.shape, lambda i: (0, 0)),
        ],
        out_specs=pl.BlockSpec((1, 1, cp), lambda i: (i, 0, 0)),
        compiler_params=_COMPILER_PARAMS,
        cost_estimate=pl.CostEstimate(flops=flops, transcendentals=n * cp,
                                      bytes_accessed=bytes_accessed),
    )(x, w, b, wfc, bfc)
    return out[:, 0, :n_classes]


def small_convnet_forward(x_nchw, params, last="logsoftmax"):
    if last not in ("logsoftmax", "logits"):
        raise ValueError("Unknown last operation")

    x = jnp.transpose(x_nchw, (0, 2, 3, 1)).astype(jnp.float32)   # NCHW -> NHWC
    # Pad input channels 3 -> 8 with zeros (clean MXU K dim; padded weights are 0).
    x = jnp.pad(x, ((0, 0), (0, 0), (0, 0), (0, 8 - x.shape[-1])))

    def pad_w(w, cin_p, cout_p):
        _, _, ci, co = w.shape
        return jnp.pad(w, ((0, 0), (0, 0), (0, cin_p - ci),
                           (0, cout_p - co))).astype(jnp.bfloat16)

    def pad_b(b, cout_p):
        return jnp.pad(b, (0, cout_p - b.shape[0])).reshape(1, cout_p).astype(jnp.float32)

    w1 = pad_w(params["w1"], 8, LANE);    b1 = pad_b(params["b1"], LANE)
    w2 = pad_w(params["w2"], LANE, LANE); b2 = pad_b(params["b2"], LANE)
    w3 = pad_w(params["w3"], LANE, LANE); b3 = pad_b(params["b3"], LANE)
    wfc = jnp.pad(params["w_fc"],
                  ((0, LANE - params["w_fc"].shape[0]),
                   (0, LANE - params["w_fc"].shape[1]))).astype(jnp.float32)
    bfc = pad_b(params["b_fc"], LANE)

    a1 = _conv_stage(x, w1, b1)      # (N, 15, 15, 128) bf16  (real channels 0..31)
    a2 = _conv_stage(a1, w2, b2)     # (N,  6,  6, 128) bf16  (real channels 0..63)
    return _head_stage(a2, w3, b3, wfc, bfc, n_classes=10,
                       log_softmax=(last == "logsoftmax"))          # (N, 10) f32


# ------------------------- deterministic parameters --------------------------

def init_params(key):
    ks = jax.random.split(key, 8)

    def uni(k, shape, fan_in):
        bound = 1.0 / (fan_in ** 0.5)
        return jax.random.uniform(k, shape, jnp.float32, -bound, bound)

    return {
        "w1": uni(ks[0], (3, 3, 3, 32), 3 * 3 * 3),
        "b1": uni(ks[1], (32,), 3 * 3 * 3),
        "w2": uni(ks[2], (3, 3, 32, 64), 3 * 3 * 32),
        "b2": uni(ks[3], (64,), 3 * 3 * 32),
        "w3": uni(ks[4], (3, 3, 64, 128), 3 * 3 * 64),
        "b3": uni(ks[5], (128,), 3 * 3 * 64),
        "w_fc": uni(ks[6], (128, 10), 128),
        "b_fc": uni(ks[7], (10,), 128),
    }


# ------------------------------ pure-JAX reference ---------------------------

def reference_forward(x_nchw, params, last="logsoftmax"):
    x = jnp.transpose(x_nchw, (0, 2, 3, 1))
    dn = ("NHWC", "HWIO", "NHWC")

    def conv(x, w, b):
        y = lax.conv_general_dilated(x, w, (1, 1), "VALID", dimension_numbers=dn)
        return jax.nn.relu(y + b)

    def pool(x):
        return lax.reduce_window(x, -jnp.inf, lax.max,
                                 (1, 2, 2, 1), (1, 2, 2, 1), "VALID")

    x = conv(x, params["w1"], params["b1"]); x = pool(x)
    x = conv(x, params["w2"], params["b2"]); x = pool(x)
    x = conv(x, params["w3"], params["b3"])
    x = jnp.mean(x, axis=(1, 2))
    logits = x @ params["w_fc"] + params["b_fc"]
    if last == "logsoftmax":
        return jax.nn.log_softmax(logits, axis=1)
    return logits


# ----------------------------------- main ------------------------------------

if __name__ == "__main__":
    key = jax.random.PRNGKey(0)
    kx, kp = jax.random.split(key)
    # CIFAR10-sized input, small batch: (N, C, H, W) = (2, 3, 32, 32)
    x = jax.random.normal(kx, (2, 3, 32, 32), jnp.float32)
    params = init_params(kp)

    fwd = jax.jit(functools.partial(small_convnet_forward, last="logsoftmax"))
    out = jax.block_until_ready(fwd(x, params))

    assert out.shape == (2, 10), out.shape
    ref = reference_forward(x, params)
    if not jnp.allclose(out, ref, atol=5e-2, rtol=5e-2):
        err = float(jnp.max(jnp.abs(out - ref)))
        raise AssertionError(
            f"Pallas result mismatches pure-JAX reference (max abs err {err})")

    print("KERNEL_OK")
</pallas_src>

<mosaic_0001>
module attributes {stable_mosaic.version = 11 : i64} {
  func.func @_conv_relu_pool_kernel(%arg0: i32, %arg1: memref<1x32x32x8xf32, #tpu.memory_space<vmem>>, %arg2: memref<3x3x8x128xbf16, #tpu.memory_space<vmem>>, %arg3: memref<1x128xf32, #tpu.memory_space<vmem>>, %arg4: memref<1x15x15x128xbf16, #tpu.memory_space<vmem>>, %arg5: memref<900x128xf32, #tpu.memory_space<vmem>>) attributes {dimension_semantics = [#tpu.dimension_semantics<parallel>], iteration_bounds = array<i64: 2>, scalar_prefetch = 0 : i64, scratch_operands = 1 : i64, tpu.core_type = #tpu.core_type<tc>, window_params = [{transform_indices = @transform_0, window_bounds = array<i64: 1, 32, 32, 8>}, {pipeline_mode = #tpu.pipeline_mode<synchronous>, transform_indices = @transform_1, window_bounds = array<i64: 3, 3, 8, 128>}, {pipeline_mode = #tpu.pipeline_mode<synchronous>, transform_indices = @transform_2, window_bounds = array<i64: 1, 128>}, {transform_indices = @transform_3, window_bounds = array<i64: 1, 15, 15, 128>}]} {
    %c0_i32 = arith.constant 0 : i32
    %c30_i32 = arith.constant 30 : i32
    %0 = arith.addi %c0_i32, %c30_i32 : i32
    %c1_i32 = arith.constant 1 : i32
    scf.for %arg6 = %c0_i32 to %0 step %c1_i32  : i32 {
      %cst = arith.constant 0.000000e+00 : f32
      %166 = vector.broadcast %cst : f32 to vector<30x128xf32>
      %c0_i32_108 = arith.constant 0 : i32
      %167 = arith.addi %arg6, %c0_i32_108 : i32
      %c0_109 = arith.constant 0 : index
      %168 = arith.index_cast %167 : i32 to index
      %c0_110 = arith.constant 0 : index
      %c0_111 = arith.constant 0 : index
      %169 = vector.load %arg1[%c0_109, %168, %c0_110, %c0_111] : memref<1x32x32x8xf32, #tpu.memory_space<vmem>>, vector<1x1x30x8xf32>
      %170 = vector.shape_cast %169 : vector<1x1x30x8xf32> to vector<30x8xf32>
      %171 = arith.truncf %170 : vector<30x8xf32> to vector<30x8xbf16>
      %c0_112 = arith.constant 0 : index
      %c0_113 = arith.constant 0 : index
      %c0_114 = arith.constant 0 : index
      %c0_115 = arith.constant 0 : index
      %172 = vector.load %arg2[%c0_112, %c0_113, %c0_114, %c0_115] : memref<3x3x8x128xbf16, #tpu.memory_space<vmem>>, vector<1x1x8x128xbf16>
      %173 = vector.shape_cast %172 : vector<1x1x8x128xbf16> to vector<8x128xbf16>
      %cst_116 = arith.constant dense<0.000000e+00> : vector<30x128xf32>
      %174 = tpu.matmul %171, %173, %cst_116 {dimension_numbers = #tpu.dot_dimension_numbers<[1], [0], [0], [1], [0, 0, 1, 1], [], []>} : vector<30x8xbf16>, vector<8x128xbf16>, vector<30x128xf32> -> vector<30x128xf32>
      %175 = arith.addf %166, %174 : vector<30x128xf32>
      %c0_i32_117 = arith.constant 0 : i32
      %176 = arith.addi %arg6, %c0_i32_117 : i32
      %c0_118 = arith.constant 0 : index
      %177 = arith.index_cast %176 : i32 to index
      %c1_119 = arith.constant 1 : index
      %c0_120 = arith.constant 0 : index
      %178 = vector.load %arg1[%c0_118, %177, %c1_119, %c0_120] : memref<1x32x32x8xf32, #tpu.memory_space<vmem>>, vector<1x1x30x8xf32>
      %179 = vector.shape_cast %178 : vector<1x1x30x8xf32> to vector<30x8xf32>
      %180 = arith.truncf %179 : vector<30x8xf32> to vector<30x8xbf16>
      %c0_121 = arith.constant 0 : index
      %c1_122 = arith.constant 1 : index
      %c0_123 = arith.constant 0 : index
      %c0_124 = arith.constant 0 : index
      %181 = vector.load %arg2[%c0_121, %c1_122, %c0_123, %c0_124] : memref<3x3x8x128xbf16, #tpu.memory_space<vmem>>, vector<1x1x8x128xbf16>
      %182 = vector.shape_cast %181 : vector<1x1x8x128xbf16> to vector<8x128xbf16>
      %cst_125 = arith.constant dense<0.000000e+00> : vector<30x128xf32>
      %183 = tpu.matmul %180, %182, %cst_125 {dimension_numbers = #tpu.dot_dimension_numbers<[1], [0], [0], [1], [0, 0, 1, 1], [], []>} : vector<30x8xbf16>, vector<8x128xbf16>, vector<30x128xf32> -> vector<30x128xf32>
      %184 = arith.addf %175, %183 : vector<30x128xf32>
      %c0_i32_126 = arith.constant 0 : i32
      %185 = arith.addi %arg6, %c0_i32_126 : i32
      %c0_127 = arith.constant 0 : index
      %186 = arith.index_cast %185 : i32 to index
      %c2_128 = arith.constant 2 : index
      %c0_129 = arith.constant 0 : index
      %187 = vector.load %arg1[%c0_127, %186, %c2_128, %c0_129] : memref<1x32x32x8xf32, #tpu.memory_space<vmem>>, vector<1x1x30x8xf32>
      %188 = vector.shape_cast %187 : vector<1x1x30x8xf32> to vector<30x8xf32>
      %189 = arith.truncf %188 : vector<30x8xf32> to vector<30x8xbf16>
      %c0_130 = arith.constant 0 : index
      %c2_131 = arith.constant 2 : index
      %c0_132 = arith.constant 0 : index
      %c0_133 = arith.constant 0 : index
      %190 = vector.load %arg2[%c0_130, %c2_131, %c0_132, %c0_133] : memref<3x3x8x128xbf16, #tpu.memory_space<vmem>>, vector<1x1x8x128xbf16>
      %191 = vector.shape_cast %190 : vector<1x1x8x128xbf16> to vector<8x128xbf16>
      %cst_134 = arith.constant dense<0.000000e+00> : vector<30x128xf32>
      %192 = tpu.matmul %189, %191, %cst_134 {dimension_numbers = #tpu.dot_dimension_numbers<[1], [0], [0], [1], [0, 0, 1, 1], [], []>} : vector<30x8xbf16>, vector<8x128xbf16>, vector<30x128xf32> -> vector<30x128xf32>
      %193 = arith.addf %184, %192 : vector<30x128xf32>
      %c1_i32_135 = arith.constant 1 : i32
      %194 = arith.addi %arg6, %c1_i32_135 : i32
      %c0_136 = arith.constant 0 : index
      %195 = arith.index_cast %194 : i32 to index
      %c0_137 = arith.constant 0 : index
      %c0_138 = arith.constant 0 : index
      %196 = vector.load %arg1[%c0_136, %195, %c0_137, %c0_138] : memref<1x32x32x8xf32, #tpu.memory_space<vmem>>, vector<1x1x30x8xf32>
      %197 = vector.shape_cast %196 : vector<1x1x30x8xf32> to vector<30x8xf32>
      %198 = arith.truncf %197 : vector<30x8xf32> to vector<30x8xbf16>
      %c1_139 = arith.constant 1 : index
      %c0_140 = arith.constant 0 : index
      %c0_141 = arith.constant 0 : index
      %c0_142 = arith.constant 0 : index
      %199 = vector.load %arg2[%c1_139, %c0_140, %c0_141, %c0_142] : memref<3x3x8x128xbf16, #tpu.memory_space<vmem>>, vector<1x1x8x128xbf16>
      %200 = vector.shape_cast %199 : vector<1x1x8x128xbf16> to vector<8x128xbf16>
      %cst_143 = arith.constant dense<0.000000e+00> : vector<30x128xf32>
      %201 = tpu.matmul %198, %200, %cst_143 {dimension_numbers = #tpu.dot_dimension_numbers<[1], [0], [0], [1], [0, 0, 1, 1], [], []>} : vector<30x8xbf16>, vector<8x128xbf16>, vector<30x128xf32> -> vector<30x128xf32>
      %202 = arith.addf %193, %201 : vector<30x128xf32>
      %c1_i32_144 = arith.constant 1 : i32
      %203 = arith.addi %arg6, %c1_i32_144 : i32
      %c0_145 = arith.constant 0 : index
      %204 = arith.index_cast %203 : i32 to index
      %c1_146 = arith.constant 1 : index
      %c0_147 = arith.constant 0 : index
      %205 = vector.load %arg1[%c0_145, %204, %c1_146, %c0_147] : memref<1x32x32x8xf32, #tpu.memory_space<vmem>>, vector<1x1x30x8xf32>
      %206 = vector.shape_cast %205 : vector<1x1x30x8xf32> to vector<30x8xf32>
      %207 = arith.truncf %206 : vector<30x8xf32> to vector<30x8xbf16>
      %c1_148 = arith.constant 1 : index
      %c1_149 = arith.constant 1 : index
      %c0_150 = arith.constant 0 : index
      %c0_151 = arith.constant 0 : index
      %208 = vector.load %arg2[%c1_148, %c1_149, %c0_150, %c0_151] : memref<3x3x8x128xbf16, #tpu.memory_space<vmem>>, vector<1x1x8x128xbf16>
      %209 = vector.shape_cast %208 : vector<1x1x8x128xbf16> to vector<8x128xbf16>
      %cst_152 = arith.constant dense<0.000000e+00> : vector<30x128xf32>
      %210 = tpu.matmul %207, %209, %cst_152 {dimension_numbers = #tpu.dot_dimension_numbers<[1], [0], [0], [1], [0, 0, 1, 1], [], []>} : vector<30x8xbf16>, vector<8x128xbf16>, vector<30x128xf32> -> vector<30x128xf32>
      %211 = arith.addf %202, %210 : vector<30x128xf32>
      %c1_i32_153 = arith.constant 1 : i32
      %212 = arith.addi %arg6, %c1_i32_153 : i32
      %c0_154 = arith.constant 0 : index
      %213 = arith.index_cast %212 : i32 to index
      %c2_155 = arith.constant 2 : index
      %c0_156 = arith.constant 0 : index
      %214 = vector.load %arg1[%c0_154, %213, %c2_155, %c0_156] : memref<1x32x32x8xf32, #tpu.memory_space<vmem>>, vector<1x1x30x8xf32>
      %215 = vector.shape_cast %214 : vector<1x1x30x8xf32> to vector<30x8xf32>
      %216 = arith.truncf %215 : vector<30x8xf32> to vector<30x8xbf16>
      %c1_157 = arith.constant 1 : index
      %c2_158 = arith.constant 2 : index
      %c0_159 = arith.constant 0 : index
      %c0_160 = arith.constant 0 : index
      %217 = vector.load %arg2[%c1_157, %c2_158, %c0_159, %c0_160] : memref<3x3x8x128xbf16, #tpu.memory_space<vmem>>, vector<1x1x8x128xbf16>
      %218 = vector.shape_cast %217 : vector<1x1x8x128xbf16> to vector<8x128xbf16>
      %cst_161 = arith.constant dense<0.000000e+00> : vector<30x128xf32>
      %219 = tpu.matmul %216, %218, %cst_161 {dimension_numbers = #tpu.dot_dimension_numbers<[1], [0], [0], [1], [0, 0, 1, 1], [], []>} : vector<30x8xbf16>, vector<8x128xbf16>, vector<30x128xf32> -> vector<30x128xf32>
      %220 = arith.addf %211, %219 : vector<30x128xf32>
      %c2_i32 = arith.constant 2 : i32
      %221 = arith.addi %arg6, %c2_i32 : i32
      %c0_162 = arith.constant 0 : index
      %222 = arith.index_cast %221 : i32 to index
      %c0_163 = arith.constant 0 : index
      %c0_164 = arith.constant 0 : index
      %223 = vector.load %arg1[%c0_162, %222, %c0_163, %c0_164] : memref<1x32x32x8xf32, #tpu.memory_space<vmem>>, vector<1x1x30x8xf32>
      %224 = vector.shape_cast %223 : vector<1x1x30x8xf32> to vector<30x8xf32>
      %225 = arith.truncf %224 : vector<30x8xf32> to vector<30x8xbf16>
      %c2_165 = arith.constant 2 : index
      %c0_166 = arith.constant 0 : index
      %c0_167 = arith.constant 0 : index
      %c0_168 = arith.constant 0 : index
      %226 = vector.load %arg2[%c2_165, %c0_166, %c0_167, %c0_168] : memref<3x3x8x128xbf16, #tpu.memory_space<vmem>>, vector<1x1x8x128xbf16>
      %227 = vector.shape_cast %226 : vector<1x1x8x128xbf16> to vector<8x128xbf16>
      %cst_169 = arith.constant dense<0.000000e+00> : vector<30x128xf32>
      %228 = tpu.matmul %225, %227, %cst_169 {dimension_numbers = #tpu.dot_dimension_numbers<[1], [0], [0], [1], [0, 0, 1, 1], [], []>} : vector<30x8xbf16>, vector<8x128xbf16>, vector<30x128xf32> -> vector<30x128xf32>
      %229 = arith.addf %220, %228 : vector<30x128xf32>
      %c2_i32_170 = arith.constant 2 : i32
      %230 = arith.addi %arg6, %c2_i32_170 : i32
      %c0_171 = arith.constant 0 : index
      %231 = arith.index_cast %230 : i32 to index
      %c1_172 = arith.constant 1 : index
      %c0_173 = arith.constant 0 : index
      %232 = vector.load %arg1[%c0_171, %231, %c1_172, %c0_173] : memref<1x32x32x8xf32, #tpu.memory_space<vmem>>, vector<1x1x30x8xf32>
      %233 = vector.shape_cast %232 : vector<1x1x30x8xf32> to vector<30x8xf32>
      %234 = arith.truncf %233 : vector<30x8xf32> to vector<30x8xbf16>
      %c2_174 = arith.constant 2 : index
      %c1_175 = arith.constant 1 : index
      %c0_176 = arith.constant 0 : index
      %c0_177 = arith.constant 0 : index
      %235 = vector.load %arg2[%c2_174, %c1_175, %c0_176, %c0_177] : memref<3x3x8x128xbf16, #tpu.memory_space<vmem>>, vector<1x1x8x128xbf16>
      %236 = vector.shape_cast %235 : vector<1x1x8x128xbf16> to vector<8x128xbf16>
      %cst_178 = arith.constant dense<0.000000e+00> : vector<30x128xf32>
      %237 = tpu.matmul %234, %236, %cst_178 {dimension_numbers = #tpu.dot_dimension_numbers<[1], [0], [0], [1], [0, 0, 1, 1], [], []>} : vector<30x8xbf16>, vector<8x128xbf16>, vector<30x128xf32> -> vector<30x128xf32>
      %238 = arith.addf %229, %237 : vector<30x128xf32>
      %c2_i32_179 = arith.constant 2 : i32
      %239 = arith.addi %arg6, %c2_i32_179 : i32
      %c0_180 = arith.constant 0 : index
      %240 = arith.index_cast %239 : i32 to index
      %c2_181 = arith.constant 2 : index
      %c0_182 = arith.constant 0 : index
      %241 = vector.load %arg1[%c0_180, %240, %c2_181, %c0_182] : memref<1x32x32x8xf32, #tpu.memory_space<vmem>>, vector<1x1x30x8xf32>
      %242 = vector.shape_cast %241 : vector<1x1x30x8xf32> to vector<30x8xf32>
      %243 = arith.truncf %242 : vector<30x8xf32> to vector<30x8xbf16>
      %c2_183 = arith.constant 2 : index
      %c2_184 = arith.constant 2 : index
      %c0_185 = arith.constant 0 : index
      %c0_186 = arith.constant 0 : index
      %244 = vector.load %arg2[%c2_183, %c2_184, %c0_185, %c0_186] : memref<3x3x8x128xbf16, #tpu.memory_space<vmem>>, vector<1x1x8x128xbf16>
      %245 = vector.shape_cast %244 : vector<1x1x8x128xbf16> to vector<8x128xbf16>
      %cst_187 = arith.constant dense<0.000000e+00> : vector<30x128xf32>
      %246 = tpu.matmul %243, %245, %cst_187 {dimension_numbers = #tpu.dot_dimension_numbers<[1], [0], [0], [1], [0, 0, 1, 1], [], []>} : vector<30x8xbf16>, vector<8x128xbf16>, vector<30x128xf32> -> vector<30x128xf32>
      %247 = arith.addf %238, %246 : vector<30x128xf32>
      %c0_188 = arith.constant 0 : index
      %c0_189 = arith.constant 0 : index
      %248 = vector.load %arg3[%c0_188, %c0_189] : memref<1x128xf32, #tpu.memory_space<vmem>>, vector<1x128xf32>
      %249 = vector.broadcast %248 : vector<1x128xf32> to vector<30x128xf32>
      %250 = arith.addf %247, %249 : vector<30x128xf32>
      %cst_190 = arith.constant 0.000000e+00 : f32
      %251 = vector.broadcast %cst_190 : f32 to vector<30x128xf32>
      %252 = arith.maximumf %250, %251 : vector<30x128xf32>
      %c30_i32_191 = arith.constant 30 : i32
      %253 = arith.muli %arg6, %c30_i32_191 : i32
      %254 = arith.index_cast %253 : i32 to index
      %c0_192 = arith.constant 0 : index
      %255 = vector.load %arg5[%254, %c0_192] : memref<900x128xf32, #tpu.memory_space<vmem>>, vector<30x128xf32>
      tpu.vector_store %arg5[%254, %c0_192], %252 {strides = array<i32>} : memref<900x128xf32, #tpu.memory_space<vmem>>, vector<30x128xf32>,
    }
    %c30_i32_0 = arith.constant 30 : i32
    %c0 = arith.constant 0 : index
    %c0_1 = arith.constant 0 : index
    %1 = tpu.strided_load %arg5[%c0, %c0_1] {strides = array<i32: 2, 1>} : memref<900x128xf32, #tpu.memory_space<vmem>>, vector<15x128xf32>
    %c1 = arith.constant 1 : index
    %c0_2 = arith.constant 0 : index
    %2 = tpu.strided_load %arg5[%c1, %c0_2] {strides = array<i32: 2, 1>} : memref<900x128xf32, #tpu.memory_space<vmem>>, vector<15x128xf32>
    %c30 = arith.constant 30 : index
    %c0_3 = arith.constant 0 : index
    %3 = tpu.strided_load %arg5[%c30, %c0_3] {strides = array<i32: 2, 1>} : memref<900x128xf32, #tpu.memory_space<vmem>>, vector<15x128xf32>
    %c31 = arith.constant 31 : index
    %c0_4 = arith.constant 0 : index
    %4 = tpu.strided_load %arg5[%c31, %c0_4] {strides = array<i32: 2, 1>} : memref<900x128xf32, #tpu.memory_space<vmem>>, vector<15x128xf32>
    %5 = arith.maximumf %1, %2 : vector<15x128xf32>
    %6 = arith.maximumf %3, %4 : vector<15x128xf32>
    %7 = arith.maximumf %5, %6 : vector<15x128xf32>
    %8 = arith.truncf %7 : vector<15x128xf32> to vector<15x128xbf16>
    %c0_5 = arith.constant 0 : index
    %c0_6 = arith.constant 0 : index
    %c0_7 = arith.constant 0 : index
    %c0_8 = arith.constant 0 : index
    %9 = vector.load %arg4[%c0_5, %c0_6, %c0_7, %c0_8] : memref<1x15x15x128xbf16, #tpu.memory_space<vmem>>, vector<1x1x15x128xbf16>
    %10 = vector.shape_cast %9 : vector<1x1x15x128xbf16> to vector<15x128xbf16>
    %11 = vector.shape_cast %8 : vector<15x128xbf16> to vector<1x1x15x128xbf16>
    tpu.vector_store %arg4[%c0_5, %c0_6, %c0_7, %c0_8], %11 {strides = array<i32>} : memref<1x15x15x128xbf16, #tpu.memory_space<vmem>>, vector<1x1x15x128xbf16>,
    %c60 = arith.constant 60 : index
    %c0_9 = arith.constant 0 : index
    %12 = tpu.strided_load %arg5[%c60, %c0_9] {strides = array<i32: 2, 1>} : memref<900x128xf32, #tpu.memory_space<vmem>>, vector<15x128xf32>
    %c61 = arith.constant 61 : index
    %c0_10 = arith.constant 0 : index
    %13 = tpu.strided_load %arg5[%c61, %c0_10] {strides = array<i32: 2, 1>} : memref<900x128xf32, #tpu.memory_space<vmem>>, vector<15x128xf32>
    %c90 = arith.constant 90 : index
    %c0_11 = arith.constant 0 : index
    %14 = tpu.strided_load %arg5[%c90, %c0_11] {strides = array<i32: 2, 1>} : memref<900x128xf32, #tpu.memory_space<vmem>>, vector<15x128xf32>
    %c91 = arith.constant 91 : index
    %c0_12 = arith.constant 0 : index
    %15 = tpu.strided_load %arg5[%c91, %c0_12] {strides = array<i32: 2, 1>} : memref<900x128xf32, #tpu.memory_space<vmem>>, vector<15x128xf32>
    %16 = arith.maximumf %12, %13 : vector<15x128xf32>
    %17 = arith.maximumf %14, %15 : vector<15x128xf32>
    %18 = arith.maximumf %16, %17 : vector<15x128xf32>
    %19 = arith.truncf %18 : vector<15x128xf32> to vector<15x128xbf16>
    %c0_13 = arith.constant 0 : index
    %c1_14 = arith.constant 1 : index
    %c0_15 = arith.constant 0 : index
    %c0_16 = arith.constant 0 : index
    %20 = vector.load %arg4[%c0_13, %c1_14, %c0_15, %c0_16] : memref<1x15x15x128xbf16, #tpu.memory_space<vmem>>, vector<1x1x15x128xbf16>
    %21 = vector.shape_cast %20 : vector<1x1x15x128xbf16> to vector<15x128xbf16>
    %22 = vector.shape_cast %19 : vector<15x128xbf16> to vector<1x1x15x128xbf16>
    tpu.vector_store %arg4[%c0_13, %c1_14, %c0_15, %c0_16], %22 {strides = array<i32>} : memref<1x15x15x128xbf16, #tpu.memory_space<vmem>>, vector<1x1x15x128xbf16>,
    %c120 = arith.constant 120 : index
    %c0_17 = arith.constant 0 : index
    %23 = tpu.strided_load %arg5[%c120, %c0_17] {strides = array<i32: 2, 1>} : memref<900x128xf32, #tpu.memory_space<vmem>>, vector<15x128xf32>
    %c121 = arith.constant 121 : index
    %c0_18 = arith.constant 0 : index
    %24 = tpu.strided_load %arg5[%c121, %c0_18] {strides = array<i32: 2, 1>} : memref<900x128xf32, #tpu.memory_space<vmem>>, vector<15x128xf32>
    %c150 = arith.constant 150 : index
    %c0_19 = arith.constant 0 : index
    %25 = tpu.strided_load %arg5[%c150, %c0_19] {strides = array<i32: 2, 1>} : memref<900x128xf32, #tpu.memory_space<vmem>>, vector<15x128xf32>
    %c151 = arith.constant 151 : index
    %c0_20 = arith.constant 0 : index
    %26 = tpu.strided_load %arg5[%c151, %c0_20] {strides = array<i32: 2, 1>} : memref<900x128xf32, #tpu.memory_space<vmem>>, vector<15x128xf32>
    %27 = arith.maximumf %23, %24 : vector<15x128xf32>
    %28 = arith.maximumf %25, %26 : vector<15x128xf32>
    %29 = arith.maximumf %27, %28 : vector<15x128xf32>
    %30 = arith.truncf %29 : vector<15x128xf32> to vector<15x128xbf16>
    %c0_21 = arith.constant 0 : index
    %c2 = arith.constant 2 : index
    %c0_22 = arith.constant 0 : index
    %c0_23 = arith.constant 0 : index
    %31 = vector.load %arg4[%c0_21, %c2, %c0_22, %c0_23] : memref<1x15x15x128xbf16, #tpu.memory_space<vmem>>, vector<1x1x15x128xbf16>
    %32 = vector.shape_cast %31 : vector<1x1x15x128xbf16> to vector<15x128xbf16>
    %33 = vector.shape_cast %30 : vector<15x128xbf16> to vector<1x1x15x128xbf16>
    tpu.vector_store %arg4[%c0_21, %c2, %c0_22, %c0_23], %33 {strides = array<i32>} : memref<1x15x15x128xbf16, #tpu.memory_space<vmem>>, vector<1x1x15x128xbf16>,
    %c180 = arith.constant 180 : index
    %c0_24 = arith.constant 0 : index
    %34 = tpu.strided_load %arg5[%c180, %c0_24] {strides = array<i32: 2, 1>} : memref<900x128xf32, #tpu.memory_space<vmem>>, vector<15x128xf32>
    %c181 = arith.constant 181 : index
    %c0_25 = arith.constant 0 : index
    %35 = tpu.strided_load %arg5[%c181, %c0_25] {strides = array<i32: 2, 1>} : memref<900x128xf32, #tpu.memory_space<vmem>>, vector<15x128xf32>
    %c210 = arith.constant 210 : index
    %c0_26 = arith.constant 0 : index
    %36 = tpu.strided_load %arg5[%c210, %c0_26] {strides = array<i32: 2, 1>} : memref<900x128xf32, #tpu.memory_space<vmem>>, vector<15x128xf32>
    %c211 = arith.constant 211 : index
    %c0_27 = arith.constant 0 : index
    %37 = tpu.strided_load %arg5[%c211, %c0_27] {strides = array<i32: 2, 1>} : memref<900x128xf32, #tpu.memory_space<vmem>>, vector<15x128xf32>
    %38 = arith.maximumf %34, %35 : vector<15x128xf32>
    %39 = arith.maximumf %36, %37 : vector<15x128xf32>
    %40 = arith.maximumf %38, %39 : vector<15x128xf32>
    %41 = arith.truncf %40 : vector<15x128xf32> to vector<15x128xbf16>
    %c0_28 = arith.constant 0 : index
    %c3 = arith.constant 3 : index
    %c0_29 = arith.constant 0 : index
    %c0_30 = arith.constant 0 : index
    %42 = vector.load %arg4[%c0_28, %c3, %c0_29, %c0_30] : memref<1x15x15x128xbf16, #tpu.memory_space<vmem>>, vector<1x1x15x128xbf16>
    %43 = vector.shape_cast %42 : vector<1x1x15x128xbf16> to vector<15x128xbf16>
    %44 = vector.shape_cast %41 : vector<15x128xbf16> to vector<1x1x15x128xbf16>
    tpu.vector_store %arg4[%c0_28, %c3, %c0_29, %c0_30], %44 {strides = array<i32>} : memref<1x15x15x128xbf16, #tpu.memory_space<vmem>>, vector<1x1x15x128xbf16>,
    %c240 = arith.constant 240 : index
    %c0_31 = arith.constant 0 : index
    %45 = tpu.strided_load %arg5[%c240, %c0_31] {strides = array<i32: 2, 1>} : memref<900x128xf32, #tpu.memory_space<vmem>>, vector<15x128xf32>
    %c241 = arith.constant 241 : index
    %c0_32 = arith.constant 0 : index
    %46 = tpu.strided_load %arg5[%c241, %c0_32] {strides = array<i32: 2, 1>} : memref<900x128xf32, #tpu.memory_space<vmem>>, vector<15x128xf32>
    %c270 = arith.constant 270 : index
    %c0_33 = arith.constant 0 : index
    %47 = tpu.strided_load %arg5[%c270, %c0_33] {strides = array<i32: 2, 1>} : memref<900x128xf32, #tpu.memory_space<vmem>>, vector<15x128xf32>
    %c271 = arith.constant 271 : index
    %c0_34 = arith.constant 0 : index
    %48 = tpu.strided_load %arg5[%c271, %c0_34] {strides = array<i32: 2, 1>} : memref<900x128xf32, #tpu.memory_space<vmem>>, vector<15x128xf32>
    %49 = arith.maximumf %45, %46 : vector<15x128xf32>
    %50 = arith.maximumf %47, %48 : vector<15x128xf32>
    %51 = arith.maximumf %49, %50 : vector<15x128xf32>
    %52 = arith.truncf %51 : vector<15x128xf32> to vector<15x128xbf16>
    %c0_35 = arith.constant 0 : index
    %c4 = arith.constant 4 : index
    %c0_36 = arith.constant 0 : index
    %c0_37 = arith.constant 0 : index
    %53 = vector.load %arg4[%c0_35, %c4, %c0_36, %c0_37] : memref<1x15x15x128xbf16, #tpu.memory_space<vmem>>, vector<1x1x15x128xbf16>
    %54 = vector.shape_cast %53 : vector<1x1x15x128xbf16> to vector<15x128xbf16>
    %55 = vector.shape_cast %52 : vector<15x128xbf16> to vector<1x1x15x128xbf16>
    tpu.vector_store %arg4[%c0_35, %c4, %c0_36, %c0_37], %55 {strides = array<i32>} : memref<1x15x15x128xbf16, #tpu.memory_space<vmem>>, vector<1x1x15x128xbf16>,
    %c300 = arith.constant 300 : index
    %c0_38 = arith.constant 0 : index
    %56 = tpu.strided_load %arg5[%c300, %c0_38] {strides = array<i32: 2, 1>} : memref<900x128xf32, #tpu.memory_space<vmem>>, vector<15x128xf32>
    %c301 = arith.constant 301 : index
    %c0_39 = arith.constant 0 : index
    %57 = tpu.strided_load %arg5[%c301, %c0_39] {strides = array<i32: 2, 1>} : memref<900x128xf32, #tpu.memory_space<vmem>>, vector<15x128xf32>
    %c330 = arith.constant 330 : index
    %c0_40 = arith.constant 0 : index
    %58 = tpu.strided_load %arg5[%c330, %c0_40] {strides = array<i32: 2, 1>} : memref<900x128xf32, #tpu.memory_space<vmem>>, vector<15x128xf32>
    %c331 = arith.constant 331 : index
    %c0_41 = arith.constant 0 : index
    %59 = tpu.strided_load %arg5[%c331, %c0_41] {strides = array<i32: 2, 1>} : memref<900x128xf32, #tpu.memory_space<vmem>>, vector<15x128xf32>
    %60 = arith.maximumf %56, %57 : vector<15x128xf32>
    %61 = arith.maximumf %58, %59 : vector<15x128xf32>
    %62 = arith.maximumf %60, %61 : vector<15x128xf32>
    %63 = arith.truncf %62 : vector<15x128xf32> to vector<15x128xbf16>
    %c0_42 = arith.constant 0 : index
    %c5 = arith.constant 5 : index
    %c0_43 = arith.constant 0 : index
    %c0_44 = arith.constant 0 : index
    %64 = vector.load %arg4[%c0_42, %c5, %c0_43, %c0_44] : memref<1x15x15x128xbf16, #tpu.memory_space<vmem>>, vector<1x1x15x128xbf16>
    %65 = vector.shape_cast %64 : vector<1x1x15x128xbf16> to vector<15x128xbf16>
    %66 = vector.shape_cast %63 : vector<15x128xbf16> to vector<1x1x15x128xbf16>
    tpu.vector_store %arg4[%c0_42, %c5, %c0_43, %c0_44], %66 {strides = array<i32>} : memref<1x15x15x128xbf16, #tpu.memory_space<vmem>>, vector<1x1x15x128xbf16>,
    %c360 = arith.constant 360 : index
    %c0_45 = arith.constant 0 : index
    %67 = tpu.strided_load %arg5[%c360, %c0_45] {strides = array<i32: 2, 1>} : memref<900x128xf32, #tpu.memory_space<vmem>>, vector<15x128xf32>
    %c361 = arith.constant 361 : index
    %c0_46 = arith.constant 0 : index
    %68 = tpu.strided_load %arg5[%c361, %c0_46] {strides = array<i32: 2, 1>} : memref<900x128xf32, #tpu.memory_space<vmem>>, vector<15x128xf32>
    %c390 = arith.constant 390 : index
    %c0_47 = arith.constant 0 : index
    %69 = tpu.strided_load %arg5[%c390, %c0_47] {strides = array<i32: 2, 1>} : memref<900x128xf32, #tpu.memory_space<vmem>>, vector<15x128xf32>
    %c391 = arith.constant 391 : index
    %c0_48 = arith.constant 0 : index
    %70 = tpu.strided_load %arg5[%c391, %c0_48] {strides = array<i32: 2, 1>} : memref<900x128xf32, #tpu.memory_space<vmem>>, vector<15x128xf32>
    %71 = arith.maximumf %67, %68 : vector<15x128xf32>
    %72 = arith.maximumf %69, %70 : vector<15x128xf32>
    %73 = arith.maximumf %71, %72 : vector<15x128xf32>
    %74 = arith.truncf %73 : vector<15x128xf32> to vector<15x128xbf16>
    %c0_49 = arith.constant 0 : index
    %c6 = arith.constant 6 : index
    %c0_50 = arith.constant 0 : index
    %c0_51 = arith.constant 0 : index
    %75 = vector.load %arg4[%c0_49, %c6, %c0_50, %c0_51] : memref<1x15x15x128xbf16, #tpu.memory_space<vmem>>, vector<1x1x15x128xbf16>
    %76 = vector.shape_cast %75 : vector<1x1x15x128xbf16> to vector<15x128xbf16>
    %77 = vector.shape_cast %74 : vector<15x128xbf16> to vector<1x1x15x128xbf16>
    tpu.vector_store %arg4[%c0_49, %c6, %c0_50, %c0_51], %77 {strides = array<i32>} : memref<1x15x15x128xbf16, #tpu.memory_space<vmem>>, vector<1x1x15x128xbf16>,
    %c420 = arith.constant 420 : index
    %c0_52 = arith.constant 0 : index
    %78 = tpu.strided_load %arg5[%c420, %c0_52] {strides = array<i32: 2, 1>} : memref<900x128xf32, #tpu.memory_space<vmem>>, vector<15x128xf32>
    %c421 = arith.constant 421 : index
    %c0_53 = arith.constant 0 : index
    %79 = tpu.strided_load %arg5[%c421, %c0_53] {strides = array<i32: 2, 1>} : memref<900x128xf32, #tpu.memory_space<vmem>>, vector<15x128xf32>
    %c450 = arith.constant 450 : index
    %c0_54 = arith.constant 0 : index
    %80 = tpu.strided_load %arg5[%c450, %c0_54] {strides = array<i32: 2, 1>} : memref<900x128xf32, #tpu.memory_space<vmem>>, vector<15x128xf32>
    %c451 = arith.constant 451 : index
    %c0_55 = arith.constant 0 : index
    %81 = tpu.strided_load %arg5[%c451, %c0_55] {strides = array<i32: 2, 1>} : memref<900x128xf32, #tpu.memory_space<vmem>>, vector<15x128xf32>
    %82 = arith.maximumf %78, %79 : vector<15x128xf32>
    %83 = arith.maximumf %80, %81 : vector<15x128xf32>
    %84 = arith.maximumf %82, %83 : vector<15x128xf32>
    %85 = arith.truncf %84 : vector<15x128xf32> to vector<15x128xbf16>
    %c0_56 = arith.constant 0 : index
    %c7 = arith.constant 7 : index
    %c0_57 = arith.constant 0 : index
    %c0_58 = arith.constant 0 : index
    %86 = vector.load %arg4[%c0_56, %c7, %c0_57, %c0_58] : memref<1x15x15x128xbf16, #tpu.memory_space<vmem>>, vector<1x1x15x128xbf16>
    %87 = vector.shape_cast %86 : vector<1x1x15x128xbf16> to vector<15x128xbf16>
    %88 = vector.shape_cast %85 : vector<15x128xbf16> to vector<1x1x15x128xbf16>
    tpu.vector_store %arg4[%c0_56, %c7, %c0_57, %c0_58], %88 {strides = array<i32>} : memref<1x15x15x128xbf16, #tpu.memory_space<vmem>>, vector<1x1x15x128xbf16>,
    %c480 = arith.constant 480 : index
    %c0_59 = arith.constant 0 : index
    %89 = tpu.strided_load %arg5[%c480, %c0_59] {strides = array<i32: 2, 1>} : memref<900x128xf32, #tpu.memory_space<vmem>>, vector<15x128xf32>
    %c481 = arith.constant 481 : index
    %c0_60 = arith.constant 0 : index
    %90 = tpu.strided_load %arg5[%c481, %c0_60] {strides = array<i32: 2, 1>} : memref<900x128xf32, #tpu.memory_space<vmem>>, vector<15x128xf32>
    %c510 = arith.constant 510 : index
    %c0_61 = arith.constant 0 : index
    %91 = tpu.strided_load %arg5[%c510, %c0_61] {strides = array<i32: 2, 1>} : memref<900x128xf32, #tpu.memory_space<vmem>>, vector<15x128xf32>
    %c511 = arith.constant 511 : index
    %c0_62 = arith.constant 0 : index
    %92 = tpu.strided_load %arg5[%c511, %c0_62] {strides = array<i32: 2, 1>} : memref<900x128xf32, #tpu.memory_space<vmem>>, vector<15x128xf32>
    %93 = arith.maximumf %89, %90 : vector<15x128xf32>
    %94 = arith.maximumf %91, %92 : vector<15x128xf32>
    %95 = arith.maximumf %93, %94 : vector<15x128xf32>
    %96 = arith.truncf %95 : vector<15x128xf32> to vector<15x128xbf16>
    %c0_63 = arith.constant 0 : index
    %c8 = arith.constant 8 : index
    %c0_64 = arith.constant 0 : index
    %c0_65 = arith.constant 0 : index
    %97 = vector.load %arg4[%c0_63, %c8, %c0_64, %c0_65] : memref<1x15x15x128xbf16, #tpu.memory_space<vmem>>, vector<1x1x15x128xbf16>
    %98 = vector.shape_cast %97 : vector<1x1x15x128xbf16> to vector<15x128xbf16>
    %99 = vector.shape_cast %96 : vector<15x128xbf16> to vector<1x1x15x128xbf16>
    tpu.vector_store %arg4[%c0_63, %c8, %c0_64, %c0_65], %99 {strides = array<i32>} : memref<1x15x15x128xbf16, #tpu.memory_space<vmem>>, vector<1x1x15x128xbf16>,
    %c540 = arith.constant 540 : index
    %c0_66 = arith.constant 0 : index
    %100 = tpu.strided_load %arg5[%c540, %c0_66] {strides = array<i32: 2, 1>} : memref<900x128xf32, #tpu.memory_space<vmem>>, vector<15x128xf32>
    %c541 = arith.constant 541 : index
    %c0_67 = arith.constant 0 : index
    %101 = tpu.strided_load %arg5[%c541, %c0_67] {strides = array<i32: 2, 1>} : memref<900x128xf32, #tpu.memory_space<vmem>>, vector<15x128xf32>
    %c570 = arith.constant 570 : index
    %c0_68 = arith.constant 0 : index
    %102 = tpu.strided_load %arg5[%c570, %c0_68] {strides = array<i32: 2, 1>} : memref<900x128xf32, #tpu.memory_space<vmem>>, vector<15x128xf32>
    %c571 = arith.constant 571 : index
    %c0_69 = arith.constant 0 : index
    %103 = tpu.strided_load %arg5[%c571, %c0_69] {strides = array<i32: 2, 1>} : memref<900x128xf32, #tpu.memory_space<vmem>>, vector<15x128xf32>
    %104 = arith.maximumf %100, %101 : vector<15x128xf32>
    %105 = arith.maximumf %102, %103 : vector<15x128xf32>
    %106 = arith.maximumf %104, %105 : vector<15x128xf32>
    %107 = arith.truncf %106 : vector<15x128xf32> to vector<15x128xbf16>
    %c0_70 = arith.constant 0 : index
    %c9 = arith.constant 9 : index
    %c0_71 = arith.constant 0 : index
    %c0_72 = arith.constant 0 : index
    %108 = vector.load %arg4[%c0_70, %c9, %c0_71, %c0_72] : memref<1x15x15x128xbf16, #tpu.memory_space<vmem>>, vector<1x1x15x128xbf16>
    %109 = vector.shape_cast %108 : vector<1x1x15x128xbf16> to vector<15x128xbf16>
    %110 = vector.shape_cast %107 : vector<15x128xbf16> to vector<1x1x15x128xbf16>
    tpu.vector_store %arg4[%c0_70, %c9, %c0_71, %c0_72], %110 {strides = array<i32>} : memref<1x15x15x128xbf16, #tpu.memory_space<vmem>>, vector<1x1x15x128xbf16>,
    %c600 = arith.constant 600 : index
    %c0_73 = arith.constant 0 : index
    %111 = tpu.strided_load %arg5[%c600, %c0_73] {strides = array<i32: 2, 1>} : memref<900x128xf32, #tpu.memory_space<vmem>>, vector<15x128xf32>
    %c601 = arith.constant 601 : index
    %c0_74 = arith.constant 0 : index
    %112 = tpu.strided_load %arg5[%c601, %c0_74] {strides = array<i32: 2, 1>} : memref<900x128xf32, #tpu.memory_space<vmem>>, vector<15x128xf32>
    %c630 = arith.constant 630 : index
    %c0_75 = arith.constant 0 : index
    %113 = tpu.strided_load %arg5[%c630, %c0_75] {strides = array<i32: 2, 1>} : memref<900x128xf32, #tpu.memory_space<vmem>>, vector<15x128xf32>
    %c631 = arith.constant 631 : index
    %c0_76 = arith.constant 0 : index
    %114 = tpu.strided_load %arg5[%c631, %c0_76] {strides = array<i32: 2, 1>} : memref<900x128xf32, #tpu.memory_space<vmem>>, vector<15x128xf32>
    %115 = arith.maximumf %111, %112 : vector<15x128xf32>
    %116 = arith.maximumf %113, %114 : vector<15x128xf32>
    %117 = arith.maximumf %115, %116 : vector<15x128xf32>
    %118 = arith.truncf %117 : vector<15x128xf32> to vector<15x128xbf16>
    %c0_77 = arith.constant 0 : index
    %c10 = arith.constant 10 : index
    %c0_78 = arith.constant 0 : index
    %c0_79 = arith.constant 0 : index
    %119 = vector.load %arg4[%c0_77, %c10, %c0_78, %c0_79] : memref<1x15x15x128xbf16, #tpu.memory_space<vmem>>, vector<1x1x15x128xbf16>
    %120 = vector.shape_cast %119 : vector<1x1x15x128xbf16> to vector<15x128xbf16>
    %121 = vector.shape_cast %118 : vector<15x128xbf16> to vector<1x1x15x128xbf16>
    tpu.vector_store %arg4[%c0_77, %c10, %c0_78, %c0_79], %121 {strides = array<i32>} : memref<1x15x15x128xbf16, #tpu.memory_space<vmem>>, vector<1x1x15x128xbf16>,
    %c660 = arith.constant 660 : index
    %c0_80 = arith.constant 0 : index
    %122 = tpu.strided_load %arg5[%c660, %c0_80] {strides = array<i32: 2, 1>} : memref<900x128xf32, #tpu.memory_space<vmem>>, vector<15x128xf32>
    %c661 = arith.constant 661 : index
    %c0_81 = arith.constant 0 : index
    %123 = tpu.strided_load %arg5[%c661, %c0_81] {strides = array<i32: 2, 1>} : memref<900x128xf32, #tpu.memory_space<vmem>>, vector<15x128xf32>
    %c690 = arith.constant 690 : index
    %c0_82 = arith.constant 0 : index
    %124 = tpu.strided_load %arg5[%c690, %c0_82] {strides = array<i32: 2, 1>} : memref<900x128xf32, #tpu.memory_space<vmem>>, vector<15x128xf32>
    %c691 = arith.constant 691 : index
    %c0_83 = arith.constant 0 : index
    %125 = tpu.strided_load %arg5[%c691, %c0_83] {strides = array<i32: 2, 1>} : memref<900x128xf32, #tpu.memory_space<vmem>>, vector<15x128xf32>
    %126 = arith.maximumf %122, %123 : vector<15x128xf32>
    %127 = arith.maximumf %124, %125 : vector<15x128xf32>
    %128 = arith.maximumf %126, %127 : vector<15x128xf32>
    %129 = arith.truncf %128 : vector<15x128xf32> to vector<15x128xbf16>
    %c0_84 = arith.constant 0 : index
    %c11 = arith.constant 11 : index
    %c0_85 = arith.constant 0 : index
    %c0_86 = arith.constant 0 : index
    %130 = vector.load %arg4[%c0_84, %c11, %c0_85, %c0_86] : memref<1x15x15x128xbf16, #tpu.memory_space<vmem>>, vector<1x1x15x128xbf16>
    %131 = vector.shape_cast %130 : vector<1x1x15x128xbf16> to vector<15x128xbf16>
    %132 = vector.shape_cast %129 : vector<15x128xbf16> to vector<1x1x15x128xbf16>
    tpu.vector_store %arg4[%c0_84, %c11, %c0_85, %c0_86], %132 {strides = array<i32>} : memref<1x15x15x128xbf16, #tpu.memory_space<vmem>>, vector<1x1x15x128xbf16>,
    %c720 = arith.constant 720 : index
    %c0_87 = arith.constant 0 : index
    %133 = tpu.strided_load %arg5[%c720, %c0_87] {strides = array<i32: 2, 1>} : memref<900x128xf32, #tpu.memory_space<vmem>>, vector<15x128xf32>
    %c721 = arith.constant 721 : index
    %c0_88 = arith.constant 0 : index
    %134 = tpu.strided_load %arg5[%c721, %c0_88] {strides = array<i32: 2, 1>} : memref<900x128xf32, #tpu.memory_space<vmem>>, vector<15x128xf32>
    %c750 = arith.constant 750 : index
    %c0_89 = arith.constant 0 : index
    %135 = tpu.strided_load %arg5[%c750, %c0_89] {strides = array<i32: 2, 1>} : memref<900x128xf32, #tpu.memory_space<vmem>>, vector<15x128xf32>
    %c751 = arith.constant 751 : index
    %c0_90 = arith.constant 0 : index
    %136 = tpu.strided_load %arg5[%c751, %c0_90] {strides = array<i32: 2, 1>} : memref<900x128xf32, #tpu.memory_space<vmem>>, vector<15x128xf32>
    %137 = arith.maximumf %133, %134 : vector<15x128xf32>
    %138 = arith.maximumf %135, %136 : vector<15x128xf32>
    %139 = arith.maximumf %137, %138 : vector<15x128xf32>
    %140 = arith.truncf %139 : vector<15x128xf32> to vector<15x128xbf16>
    %c0_91 = arith.constant 0 : index
    %c12 = arith.constant 12 : index
    %c0_92 = arith.constant 0 : index
    %c0_93 = arith.constant 0 : index
    %141 = vector.load %arg4[%c0_91, %c12, %c0_92, %c0_93] : memref<1x15x15x128xbf16, #tpu.memory_space<vmem>>, vector<1x1x15x128xbf16>
    %142 = vector.shape_cast %141 : vector<1x1x15x128xbf16> to vector<15x128xbf16>
    %143 = vector.shape_cast %140 : vector<15x128xbf16> to vector<1x1x15x128xbf16>
    tpu.vector_store %arg4[%c0_91, %c12, %c0_92, %c0_93], %143 {strides = array<i32>} : memref<1x15x15x128xbf16, #tpu.memory_space<vmem>>, vector<1x1x15x128xbf16>,
    %c780 = arith.constant 780 : index
    %c0_94 = arith.constant 0 : index
    %144 = tpu.strided_load %arg5[%c780, %c0_94] {strides = array<i32: 2, 1>} : memref<900x128xf32, #tpu.memory_space<vmem>>, vector<15x128xf32>
    %c781 = arith.constant 781 : index
    %c0_95 = arith.constant 0 : index
    %145 = tpu.strided_load %arg5[%c781, %c0_95] {strides = array<i32: 2, 1>} : memref<900x128xf32, #tpu.memory_space<vmem>>, vector<15x128xf32>
    %c810 = arith.constant 810 : index
    %c0_96 = arith.constant 0 : index
    %146 = tpu.strided_load %arg5[%c810, %c0_96] {strides = array<i32: 2, 1>} : memref<900x128xf32, #tpu.memory_space<vmem>>, vector<15x128xf32>
    %c811 = arith.constant 811 : index
    %c0_97 = arith.constant 0 : index
    %147 = tpu.strided_load %arg5[%c811, %c0_97] {strides = array<i32: 2, 1>} : memref<900x128xf32, #tpu.memory_space<vmem>>, vector<15x128xf32>
    %148 = arith.maximumf %144, %145 : vector<15x128xf32>
    %149 = arith.maximumf %146, %147 : vector<15x128xf32>
    %150 = arith.maximumf %148, %149 : vector<15x128xf32>
    %151 = arith.truncf %150 : vector<15x128xf32> to vector<15x128xbf16>
    %c0_98 = arith.constant 0 : index
    %c13 = arith.constant 13 : index
    %c0_99 = arith.constant 0 : index
    %c0_100 = arith.constant 0 : index
    %152 = vector.load %arg4[%c0_98, %c13, %c0_99, %c0_100] : memref<1x15x15x128xbf16, #tpu.memory_space<vmem>>, vector<1x1x15x128xbf16>
    %153 = vector.shape_cast %152 : vector<1x1x15x128xbf16> to vector<15x128xbf16>
    %154 = vector.shape_cast %151 : vector<15x128xbf16> to vector<1x1x15x128xbf16>
    tpu.vector_store %arg4[%c0_98, %c13, %c0_99, %c0_100], %154 {strides = array<i32>} : memref<1x15x15x128xbf16, #tpu.memory_space<vmem>>, vector<1x1x15x128xbf16>,
    %c840 = arith.constant 840 : index
    %c0_101 = arith.constant 0 : index
    %155 = tpu.strided_load %arg5[%c840, %c0_101] {strides = array<i32: 2, 1>} : memref<900x128xf32, #tpu.memory_space<vmem>>, vector<15x128xf32>
    %c841 = arith.constant 841 : index
    %c0_102 = arith.constant 0 : index
    %156 = tpu.strided_load %arg5[%c841, %c0_102] {strides = array<i32: 2, 1>} : memref<900x128xf32, #tpu.memory_space<vmem>>, vector<15x128xf32>
    %c870 = arith.constant 870 : index
    %c0_103 = arith.constant 0 : index
    %157 = tpu.strided_load %arg5[%c870, %c0_103] {strides = array<i32: 2, 1>} : memref<900x128xf32, #tpu.memory_space<vmem>>, vector<15x128xf32>
    %c871 = arith.constant 871 : index
    %c0_104 = arith.constant 0 : index
    %158 = tpu.strided_load %arg5[%c871, %c0_104] {strides = array<i32: 2, 1>} : memref<900x128xf32, #tpu.memory_space<vmem>>, vector<15x128xf32>
    %159 = arith.maximumf %155, %156 : vector<15x128xf32>
    %160 = arith.maximumf %157, %158 : vector<15x128xf32>
    %161 = arith.maximumf %159, %160 : vector<15x128xf32>
    %162 = arith.truncf %161 : vector<15x128xf32> to vector<15x128xbf16>
    %c0_105 = arith.constant 0 : index
    %c14 = arith.constant 14 : index
    %c0_106 = arith.constant 0 : index
    %c0_107 = arith.constant 0 : index
    %163 = vector.load %arg4[%c0_105, %c14, %c0_106, %c0_107] : memref<1x15x15x128xbf16, #tpu.memory_space<vmem>>, vector<1x1x15x128xbf16>
    %164 = vector.shape_cast %163 : vector<1x1x15x128xbf16> to vector<15x128xbf16>
    %165 = vector.shape_cast %162 : vector<15x128xbf16> to vector<1x1x15x128xbf16>
    tpu.vector_store %arg4[%c0_105, %c14, %c0_106, %c0_107], %165 {strides = array<i32>} : memref<1x15x15x128xbf16, #tpu.memory_space<vmem>>, vector<1x1x15x128xbf16>,
    return
  }
  func.func @transform_0(%arg0: i32) -> (i32, i32, i32, i32) {
    %c0_i32 = arith.constant 0 : i32
    %c0_i32_0 = arith.constant 0 : i32
    %c0_i32_1 = arith.constant 0 : i32
    %c0_i32_2 = arith.constant 0 : i32
    return %arg0, %c0_i32, %c0_i32_0, %c0_i32_1 : i32, i32, i32, i32
  }
  func.func @transform_1(%arg0: i32) -> (i32, i32, i32, i32) {
    %c0_i32 = arith.constant 0 : i32
    %c0_i32_0 = arith.constant 0 : i32
    %c0_i32_1 = arith.constant 0 : i32
    %c0_i32_2 = arith.constant 0 : i32
    %c0_i32_3 = arith.constant 0 : i32
    return %c0_i32, %c0_i32_0, %c0_i32_1, %c0_i32_2 : i32, i32, i32, i32
  }
  func.func @transform_2(%arg0: i32) -> (i32, i32) {
    %c0_i32 = arith.constant 0 : i32
    %c0_i32_0 = arith.constant 0 : i32
    %c0_i32_1 = arith.constant 0 : i32
    return %c0_i32, %c0_i32_0 : i32, i32
  }
  func.func @transform_3(%arg0: i32) -> (i32, i32, i32, i32) {
    %c0_i32 = arith.constant 0 : i32
    %c0_i32_0 = arith.constant 0 : i32
    %c0_i32_1 = arith.constant 0 : i32
    %c0_i32_2 = arith.constant 0 : i32
    return %arg0, %c0_i32, %c0_i32_0, %c0_i32_1 : i32, i32, i32, i32
  }
}

module attributes {stable_mosaic.version = 11 : i64} {
  func.func @_conv_relu_pool_kernel(%arg0: i32, %arg1: memref<1x15x15x128xbf16, #tpu.memory_space<vmem>>, %arg2: memref<3x3x128x128xbf16, #tpu.memory_space<vmem>>, %arg3: memref<1x128xf32, #tpu.memory_space<vmem>>, %arg4: memref<1x6x6x128xbf16, #tpu.memory_space<vmem>>, %arg5: memref<169x128xf32, #tpu.memory_space<vmem>>) attributes {dimension_semantics = [#tpu.dimension_semantics<parallel>], iteration_bounds = array<i64: 2>, scalar_prefetch = 0 : i64, scratch_operands = 1 : i64, tpu.core_type = #tpu.core_type<tc>, window_params = [{transform_indices = @transform_0, window_bounds = array<i64: 1, 15, 15, 128>}, {pipeline_mode = #tpu.pipeline_mode<synchronous>, transform_indices = @transform_1, window_bounds = array<i64: 3, 3, 128, 128>}, {pipeline_mode = #tpu.pipeline_mode<synchronous>, transform_indices = @transform_2, window_bounds = array<i64: 1, 128>}, {transform_indices = @transform_3, window_bounds = array<i64: 1, 6, 6, 128>}]} {
    %c0_i32 = arith.constant 0 : i32
    %c13_i32 = arith.constant 13 : i32
    %0 = arith.addi %c0_i32, %c13_i32 : i32
    %c1_i32 = arith.constant 1 : i32
    scf.for %arg6 = %c0_i32 to %0 step %c1_i32  : i32 {
      %cst = arith.constant 0.000000e+00 : f32
      %67 = vector.broadcast %cst : f32 to vector<13x128xf32>
      %c0_i32_45 = arith.constant 0 : i32
      %68 = arith.addi %arg6, %c0_i32_45 : i32
      %c0_46 = arith.constant 0 : index
      %69 = arith.index_cast %68 : i32 to index
      %c0_47 = arith.constant 0 : index
      %c0_48 = arith.constant 0 : index
      %70 = vector.load %arg1[%c0_46, %69, %c0_47, %c0_48] : memref<1x15x15x128xbf16, #tpu.memory_space<vmem>>, vector<1x1x13x128xbf16>
      %71 = vector.shape_cast %70 : vector<1x1x13x128xbf16> to vector<13x128xbf16>
      %c0_49 = arith.constant 0 : index
      %c0_50 = arith.constant 0 : index
      %c0_51 = arith.constant 0 : index
      %c0_52 = arith.constant 0 : index
      %72 = vector.load %arg2[%c0_49, %c0_50, %c0_51, %c0_52] : memref<3x3x128x128xbf16, #tpu.memory_space<vmem>>, vector<1x1x128x128xbf16>
      %73 = vector.shape_cast %72 : vector<1x1x128x128xbf16> to vector<128x128xbf16>
      %cst_53 = arith.constant dense<0.000000e+00> : vector<13x128xf32>
      %74 = tpu.matmul %71, %73, %cst_53 {dimension_numbers = #tpu.dot_dimension_numbers<[1], [0], [0], [1], [0, 0, 1, 1], [], []>} : vector<13x128xbf16>, vector<128x128xbf16>, vector<13x128xf32> -> vector<13x128xf32>
      %75 = arith.addf %67, %74 : vector<13x128xf32>
      %c0_i32_54 = arith.constant 0 : i32
      %76 = arith.addi %arg6, %c0_i32_54 : i32
      %c0_55 = arith.constant 0 : index
      %77 = arith.index_cast %76 : i32 to index
      %c1_56 = arith.constant 1 : index
      %c0_57 = arith.constant 0 : index
      %78 = vector.load %arg1[%c0_55, %77, %c1_56, %c0_57] : memref<1x15x15x128xbf16, #tpu.memory_space<vmem>>, vector<1x1x13x128xbf16>
      %79 = vector.shape_cast %78 : vector<1x1x13x128xbf16> to vector<13x128xbf16>
      %c0_58 = arith.constant 0 : index
      %c1_59 = arith.constant 1 : index
      %c0_60 = arith.constant 0 : index
      %c0_61 = arith.constant 0 : index
      %80 = vector.load %arg2[%c0_58, %c1_59, %c0_60, %c0_61] : memref<3x3x128x128xbf16, #tpu.memory_space<vmem>>, vector<1x1x128x128xbf16>
      %81 = vector.shape_cast %80 : vector<1x1x128x128xbf16> to vector<128x128xbf16>
      %cst_62 = arith.constant dense<0.000000e+00> : vector<13x128xf32>
      %82 = tpu.matmul %79, %81, %cst_62 {dimension_numbers = #tpu.dot_dimension_numbers<[1], [0], [0], [1], [0, 0, 1, 1], [], []>} : vector<13x128xbf16>, vector<128x128xbf16>, vector<13x128xf32> -> vector<13x128xf32>
      %83 = arith.addf %75, %82 : vector<13x128xf32>
      %c0_i32_63 = arith.constant 0 : i32
      %84 = arith.addi %arg6, %c0_i32_63 : i32
      %c0_64 = arith.constant 0 : index
      %85 = arith.index_cast %84 : i32 to index
      %c2_65 = arith.constant 2 : index
      %c0_66 = arith.constant 0 : index
      %86 = vector.load %arg1[%c0_64, %85, %c2_65, %c0_66] : memref<1x15x15x128xbf16, #tpu.memory_space<vmem>>, vector<1x1x13x128xbf16>
      %87 = vector.shape_cast %86 : vector<1x1x13x128xbf16> to vector<13x128xbf16>
      %c0_67 = arith.constant 0 : index
      %c2_68 = arith.constant 2 : index
      %c0_69 = arith.constant 0 : index
      %c0_70 = arith.constant 0 : index
      %88 = vector.load %arg2[%c0_67, %c2_68, %c0_69, %c0_70] : memref<3x3x128x128xbf16, #tpu.memory_space<vmem>>, vector<1x1x128x128xbf16>
      %89 = vector.shape_cast %88 : vector<1x1x128x128xbf16> to vector<128x128xbf16>
      %cst_71 = arith.constant dense<0.000000e+00> : vector<13x128xf32>
      %90 = tpu.matmul %87, %89, %cst_71 {dimension_numbers = #tpu.dot_dimension_numbers<[1], [0], [0], [1], [0, 0, 1, 1], [], []>} : vector<13x128xbf16>, vector<128x128xbf16>, vector<13x128xf32> -> vector<13x128xf32>
      %91 = arith.addf %83, %90 : vector<13x128xf32>
      %c1_i32_72 = arith.constant 1 : i32
      %92 = arith.addi %arg6, %c1_i32_72 : i32
      %c0_73 = arith.constant 0 : index
      %93 = arith.index_cast %92 : i32 to index
      %c0_74 = arith.constant 0 : index
      %c0_75 = arith.constant 0 : index
      %94 = vector.load %arg1[%c0_73, %93, %c0_74, %c0_75] : memref<1x15x15x128xbf16, #tpu.memory_space<vmem>>, vector<1x1x13x128xbf16>
      %95 = vector.shape_cast %94 : vector<1x1x13x128xbf16> to vector<13x128xbf16>
      %c1_76 = arith.constant 1 : index
      %c0_77 = arith.constant 0 : index
      %c0_78 = arith.constant 0 : index
      %c0_79 = arith.constant 0 : index
      %96 = vector.load %arg2[%c1_76, %c0_77, %c0_78, %c0_79] : memref<3x3x128x128xbf16, #tpu.memory_space<vmem>>, vector<1x1x128x128xbf16>
      %97 = vector.shape_cast %96 : vector<1x1x128x128xbf16> to vector<128x128xbf16>
      %cst_80 = arith.constant dense<0.000000e+00> : vector<13x128xf32>
      %98 = tpu.matmul %95, %97, %cst_80 {dimension_numbers = #tpu.dot_dimension_numbers<[1], [0], [0], [1], [0, 0, 1, 1], [], []>} : vector<13x128xbf16>, vector<128x128xbf16>, vector<13x128xf32> -> vector<13x128xf32>
      %99 = arith.addf %91, %98 : vector<13x128xf32>
      %c1_i32_81 = arith.constant 1 : i32
      %100 = arith.addi %arg6, %c1_i32_81 : i32
      %c0_82 = arith.constant 0 : index
      %101 = arith.index_cast %100 : i32 to index
      %c1_83 = arith.constant 1 : index
      %c0_84 = arith.constant 0 : index
      %102 = vector.load %arg1[%c0_82, %101, %c1_83, %c0_84] : memref<1x15x15x128xbf16, #tpu.memory_space<vmem>>, vector<1x1x13x128xbf16>
      %103 = vector.shape_cast %102 : vector<1x1x13x128xbf16> to vector<13x128xbf16>
      %c1_85 = arith.constant 1 : index
      %c1_86 = arith.constant 1 : index
      %c0_87 = arith.constant 0 : index
      %c0_88 = arith.constant 0 : index
      %104 = vector.load %arg2[%c1_85, %c1_86, %c0_87, %c0_88] : memref<3x3x128x128xbf16, #tpu.memory_space<vmem>>, vector<1x1x128x128xbf16>
      %105 = vector.shape_cast %104 : vector<1x1x128x128xbf16> to vector<128x128xbf16>
      %cst_89 = arith.constant dense<0.000000e+00> : vector<13x128xf32>
      %106 = tpu.matmul %103, %105, %cst_89 {dimension_numbers = #tpu.dot_dimension_numbers<[1], [0], [0], [1], [0, 0, 1, 1], [], []>} : vector<13x128xbf16>, vector<128x128xbf16>, vector<13x128xf32> -> vector<13x128xf32>
      %107 = arith.addf %99, %106 : vector<13x128xf32>
      %c1_i32_90 = arith.constant 1 : i32
      %108 = arith.addi %arg6, %c1_i32_90 : i32
      %c0_91 = arith.constant 0 : index
      %109 = arith.index_cast %108 : i32 to index
      %c2_92 = arith.constant 2 : index
      %c0_93 = arith.constant 0 : index
      %110 = vector.load %arg1[%c0_91, %109, %c2_92, %c0_93] : memref<1x15x15x128xbf16, #tpu.memory_space<vmem>>, vector<1x1x13x128xbf16>
      %111 = vector.shape_cast %110 : vector<1x1x13x128xbf16> to vector<13x128xbf16>
      %c1_94 = arith.constant 1 : index
      %c2_95 = arith.constant 2 : index
      %c0_96 = arith.constant 0 : index
      %c0_97 = arith.constant 0 : index
      %112 = vector.load %arg2[%c1_94, %c2_95, %c0_96, %c0_97] : memref<3x3x128x128xbf16, #tpu.memory_space<vmem>>, vector<1x1x128x128xbf16>
      %113 = vector.shape_cast %112 : vector<1x1x128x128xbf16> to vector<128x128xbf16>
      %cst_98 = arith.constant dense<0.000000e+00> : vector<13x128xf32>
      %114 = tpu.matmul %111, %113, %cst_98 {dimension_numbers = #tpu.dot_dimension_numbers<[1], [0], [0], [1], [0, 0, 1, 1], [], []>} : vector<13x128xbf16>, vector<128x128xbf16>, vector<13x128xf32> -> vector<13x128xf32>
      %115 = arith.addf %107, %114 : vector<13x128xf32>
      %c2_i32 = arith.constant 2 : i32
      %116 = arith.addi %arg6, %c2_i32 : i32
      %c0_99 = arith.constant 0 : index
      %117 = arith.index_cast %116 : i32 to index
      %c0_100 = arith.constant 0 : index
      %c0_101 = arith.constant 0 : index
      %118 = vector.load %arg1[%c0_99, %117, %c0_100, %c0_101] : memref<1x15x15x128xbf16, #tpu.memory_space<vmem>>, vector<1x1x13x128xbf16>
      %119 = vector.shape_cast %118 : vector<1x1x13x128xbf16> to vector<13x128xbf16>
      %c2_102 = arith.constant 2 : index
      %c0_103 = arith.constant 0 : index
      %c0_104 = arith.constant 0 : index
      %c0_105 = arith.constant 0 : index
      %120 = vector.load %arg2[%c2_102, %c0_103, %c0_104, %c0_105] : memref<3x3x128x128xbf16, #tpu.memory_space<vmem>>, vector<1x1x128x128xbf16>
      %121 = vector.shape_cast %120 : vector<1x1x128x128xbf16> to vector<128x128xbf16>
      %cst_106 = arith.constant dense<0.000000e+00> : vector<13x128xf32>
      %122 = tpu.matmul %119, %121, %cst_106 {dimension_numbers = #tpu.dot_dimension_numbers<[1], [0], [0], [1], [0, 0, 1, 1], [], []>} : vector<13x128xbf16>, vector<128x128xbf16>, vector<13x128xf32> -> vector<13x128xf32>
      %123 = arith.addf %115, %122 : vector<13x128xf32>
      %c2_i32_107 = arith.constant 2 : i32
      %124 = arith.addi %arg6, %c2_i32_107 : i32
      %c0_108 = arith.constant 0 : index
      %125 = arith.index_cast %124 : i32 to index
      %c1_109 = arith.constant 1 : index
      %c0_110 = arith.constant 0 : index
      %126 = vector.load %arg1[%c0_108, %125, %c1_109, %c0_110] : memref<1x15x15x128xbf16, #tpu.memory_space<vmem>>, vector<1x1x13x128xbf16>
      %127 = vector.shape_cast %126 : vector<1x1x13x128xbf16> to vector<13x128xbf16>
      %c2_111 = arith.constant 2 : index
      %c1_112 = arith.constant 1 : index
      %c0_113 = arith.constant 0 : index
      %c0_114 = arith.constant 0 : index
      %128 = vector.load %arg2[%c2_111, %c1_112, %c0_113, %c0_114] : memref<3x3x128x128xbf16, #tpu.memory_space<vmem>>, vector<1x1x128x128xbf16>
      %129 = vector.shape_cast %128 : vector<1x1x128x128xbf16> to vector<128x128xbf16>
      %cst_115 = arith.constant dense<0.000000e+00> : vector<13x128xf32>
      %130 = tpu.matmul %127, %129, %cst_115 {dimension_numbers = #tpu.dot_dimension_numbers<[1], [0], [0], [1], [0, 0, 1, 1], [], []>} : vector<13x128xbf16>, vector<128x128xbf16>, vector<13x128xf32> -> vector<13x128xf32>
      %131 = arith.addf %123, %130 : vector<13x128xf32>
      %c2_i32_116 = arith.constant 2 : i32
      %132 = arith.addi %arg6, %c2_i32_116 : i32
      %c0_117 = arith.constant 0 : index
      %133 = arith.index_cast %132 : i32 to index
      %c2_118 = arith.constant 2 : index
      %c0_119 = arith.constant 0 : index
      %134 = vector.load %arg1[%c0_117, %133, %c2_118, %c0_119] : memref<1x15x15x128xbf16, #tpu.memory_space<vmem>>, vector<1x1x13x128xbf16>
      %135 = vector.shape_cast %134 : vector<1x1x13x128xbf16> to vector<13x128xbf16>
      %c2_120 = arith.constant 2 : index
      %c2_121 = arith.constant 2 : index
      %c0_122 = arith.constant 0 : index
      %c0_123 = arith.constant 0 : index
      %136 = vector.load %arg2[%c2_120, %c2_121, %c0_122, %c0_123] : memref<3x3x128x128xbf16, #tpu.memory_space<vmem>>, vector<1x1x128x128xbf16>
      %137 = vector.shape_cast %136 : vector<1x1x128x128xbf16> to vector<128x128xbf16>
      %cst_124 = arith.constant dense<0.000000e+00> : vector<13x128xf32>
      %138 = tpu.matmul %135, %137, %cst_124 {dimension_numbers = #tpu.dot_dimension_numbers<[1], [0], [0], [1], [0, 0, 1, 1], [], []>} : vector<13x128xbf16>, vector<128x128xbf16>, vector<13x128xf32> -> vector<13x128xf32>
      %139 = arith.addf %131, %138 : vector<13x128xf32>
      %c0_125 = arith.constant 0 : index
      %c0_126 = arith.constant 0 : index
      %140 = vector.load %arg3[%c0_125, %c0_126] : memref<1x128xf32, #tpu.memory_space<vmem>>, vector<1x128xf32>
      %141 = vector.broadcast %140 : vector<1x128xf32> to vector<13x128xf32>
      %142 = arith.addf %139, %141 : vector<13x128xf32>
      %cst_127 = arith.constant 0.000000e+00 : f32
      %143 = vector.broadcast %cst_127 : f32 to vector<13x128xf32>
      %144 = arith.maximumf %142, %143 : vector<13x128xf32>
      %c13_i32_128 = arith.constant 13 : i32
      %145 = arith.muli %arg6, %c13_i32_128 : i32
      %146 = arith.index_cast %145 : i32 to index
      %c0_129 = arith.constant 0 : index
      %147 = vector.load %arg5[%146, %c0_129] : memref<169x128xf32, #tpu.memory_space<vmem>>, vector<13x128xf32>
      tpu.vector_store %arg5[%146, %c0_129], %144 {strides = array<i32>} : memref<169x128xf32, #tpu.memory_space<vmem>>, vector<13x128xf32>,
    }
    %c13_i32_0 = arith.constant 13 : i32
    %c0 = arith.constant 0 : index
    %c0_1 = arith.constant 0 : index
    %1 = tpu.strided_load %arg5[%c0, %c0_1] {strides = array<i32: 2, 1>} : memref<169x128xf32, #tpu.memory_space<vmem>>, vector<6x128xf32>
    %c1 = arith.constant 1 : index
    %c0_2 = arith.constant 0 : index
    %2 = tpu.strided_load %arg5[%c1, %c0_2] {strides = array<i32: 2, 1>} : memref<169x128xf32, #tpu.memory_space<vmem>>, vector<6x128xf32>
    %c13 = arith.constant 13 : index
    %c0_3 = arith.constant 0 : index
    %3 = tpu.strided_load %arg5[%c13, %c0_3] {strides = array<i32: 2, 1>} : memref<169x128xf32, #tpu.memory_space<vmem>>, vector<6x128xf32>
    %c14 = arith.constant 14 : index
    %c0_4 = arith.constant 0 : index
    %4 = tpu.strided_load %arg5[%c14, %c0_4] {strides = array<i32: 2, 1>} : memref<169x128xf32, #tpu.memory_space<vmem>>, vector<6x128xf32>
    %5 = arith.maximumf %1, %2 : vector<6x128xf32>
    %6 = arith.maximumf %3, %4 : vector<6x128xf32>
    %7 = arith.maximumf %5, %6 : vector<6x128xf32>
    %8 = arith.truncf %7 : vector<6x128xf32> to vector<6x128xbf16>
    %c0_5 = arith.constant 0 : index
    %c0_6 = arith.constant 0 : index
    %c0_7 = arith.constant 0 : index
    %c0_8 = arith.constant 0 : index
    %9 = vector.load %arg4[%c0_5, %c0_6, %c0_7, %c0_8] : memref<1x6x6x128xbf16, #tpu.memory_space<vmem>>, vector<1x1x6x128xbf16>
    %10 = vector.shape_cast %9 : vector<1x1x6x128xbf16> to vector<6x128xbf16>
    %11 = vector.shape_cast %8 : vector<6x128xbf16> to vector<1x1x6x128xbf16>
    tpu.vector_store %arg4[%c0_5, %c0_6, %c0_7, %c0_8], %11 {strides = array<i32>} : memref<1x6x6x128xbf16, #tpu.memory_space<vmem>>, vector<1x1x6x128xbf16>,
    %c26 = arith.constant 26 : index
    %c0_9 = arith.constant 0 : index
    %12 = tpu.strided_load %arg5[%c26, %c0_9] {strides = array<i32: 2, 1>} : memref<169x128xf32, #tpu.memory_space<vmem>>, vector<6x128xf32>
    %c27 = arith.constant 27 : index
    %c0_10 = arith.constant 0 : index
    %13 = tpu.strided_load %arg5[%c27, %c0_10] {strides = array<i32: 2, 1>} : memref<169x128xf32, #tpu.memory_space<vmem>>, vector<6x128xf32>
    %c39 = arith.constant 39 : index
    %c0_11 = arith.constant 0 : index
    %14 = tpu.strided_load %arg5[%c39, %c0_11] {strides = array<i32: 2, 1>} : memref<169x128xf32, #tpu.memory_space<vmem>>, vector<6x128xf32>
    %c40 = arith.constant 40 : index
    %c0_12 = arith.constant 0 : index
    %15 = tpu.strided_load %arg5[%c40, %c0_12] {strides = array<i32: 2, 1>} : memref<169x128xf32, #tpu.memory_space<vmem>>, vector<6x128xf32>
    %16 = arith.maximumf %12, %13 : vector<6x128xf32>
    %17 = arith.maximumf %14, %15 : vector<6x128xf32>
    %18 = arith.maximumf %16, %17 : vector<6x128xf32>
    %19 = arith.truncf %18 : vector<6x128xf32> to vector<6x128xbf16>
    %c0_13 = arith.constant 0 : index
    %c1_14 = arith.constant 1 : index
    %c0_15 = arith.constant 0 : index
    %c0_16 = arith.constant 0 : index
    %20 = vector.load %arg4[%c0_13, %c1_14, %c0_15, %c0_16] : memref<1x6x6x128xbf16, #tpu.memory_space<vmem>>, vector<1x1x6x128xbf16>
    %21 = vector.shape_cast %20 : vector<1x1x6x128xbf16> to vector<6x128xbf16>
    %22 = vector.shape_cast %19 : vector<6x128xbf16> to vector<1x1x6x128xbf16>
    tpu.vector_store %arg4[%c0_13, %c1_14, %c0_15, %c0_16], %22 {strides = array<i32>} : memref<1x6x6x128xbf16, #tpu.memory_space<vmem>>, vector<1x1x6x128xbf16>,
    %c52 = arith.constant 52 : index
    %c0_17 = arith.constant 0 : index
    %23 = tpu.strided_load %arg5[%c52, %c0_17] {strides = array<i32: 2, 1>} : memref<169x128xf32, #tpu.memory_space<vmem>>, vector<6x128xf32>
    %c53 = arith.constant 53 : index
    %c0_18 = arith.constant 0 : index
    %24 = tpu.strided_load %arg5[%c53, %c0_18] {strides = array<i32: 2, 1>} : memref<169x128xf32, #tpu.memory_space<vmem>>, vector<6x128xf32>
    %c65 = arith.constant 65 : index
    %c0_19 = arith.constant 0 : index
    %25 = tpu.strided_load %arg5[%c65, %c0_19] {strides = array<i32: 2, 1>} : memref<169x128xf32, #tpu.memory_space<vmem>>, vector<6x128xf32>
    %c66 = arith.constant 66 : index
    %c0_20 = arith.constant 0 : index
    %26 = tpu.strided_load %arg5[%c66, %c0_20] {strides = array<i32: 2, 1>} : memref<169x128xf32, #tpu.memory_space<vmem>>, vector<6x128xf32>
    %27 = arith.maximumf %23, %24 : vector<6x128xf32>
    %28 = arith.maximumf %25, %26 : vector<6x128xf32>
    %29 = arith.maximumf %27, %28 : vector<6x128xf32>
    %30 = arith.truncf %29 : vector<6x128xf32> to vector<6x128xbf16>
    %c0_21 = arith.constant 0 : index
    %c2 = arith.constant 2 : index
    %c0_22 = arith.constant 0 : index
    %c0_23 = arith.constant 0 : index
    %31 = vector.load %arg4[%c0_21, %c2, %c0_22, %c0_23] : memref<1x6x6x128xbf16, #tpu.memory_space<vmem>>, vector<1x1x6x128xbf16>
    %32 = vector.shape_cast %31 : vector<1x1x6x128xbf16> to vector<6x128xbf16>
    %33 = vector.shape_cast %30 : vector<6x128xbf16> to vector<1x1x6x128xbf16>
    tpu.vector_store %arg4[%c0_21, %c2, %c0_22, %c0_23], %33 {strides = array<i32>} : memref<1x6x6x128xbf16, #tpu.memory_space<vmem>>, vector<1x1x6x128xbf16>,
    %c78 = arith.constant 78 : index
    %c0_24 = arith.constant 0 : index
    %34 = tpu.strided_load %arg5[%c78, %c0_24] {strides = array<i32: 2, 1>} : memref<169x128xf32, #tpu.memory_space<vmem>>, vector<6x128xf32>
    %c79 = arith.constant 79 : index
    %c0_25 = arith.constant 0 : index
    %35 = tpu.strided_load %arg5[%c79, %c0_25] {strides = array<i32: 2, 1>} : memref<169x128xf32, #tpu.memory_space<vmem>>, vector<6x128xf32>
    %c91 = arith.constant 91 : index
    %c0_26 = arith.constant 0 : index
    %36 = tpu.strided_load %arg5[%c91, %c0_26] {strides = array<i32: 2, 1>} : memref<169x128xf32, #tpu.memory_space<vmem>>, vector<6x128xf32>
    %c92 = arith.constant 92 : index
    %c0_27 = arith.constant 0 : index
    %37 = tpu.strided_load %arg5[%c92, %c0_27] {strides = array<i32: 2, 1>} : memref<169x128xf32, #tpu.memory_space<vmem>>, vector<6x128xf32>
    %38 = arith.maximumf %34, %35 : vector<6x128xf32>
    %39 = arith.maximumf %36, %37 : vector<6x128xf32>
    %40 = arith.maximumf %38, %39 : vector<6x128xf32>
    %41 = arith.truncf %40 : vector<6x128xf32> to vector<6x128xbf16>
    %c0_28 = arith.constant 0 : index
    %c3 = arith.constant 3 : index
    %c0_29 = arith.constant 0 : index
    %c0_30 = arith.constant 0 : index
    %42 = vector.load %arg4[%c0_28, %c3, %c0_29, %c0_30] : memref<1x6x6x128xbf16, #tpu.memory_space<vmem>>, vector<1x1x6x128xbf16>
    %43 = vector.shape_cast %42 : vector<1x1x6x128xbf16> to vector<6x128xbf16>
    %44 = vector.shape_cast %41 : vector<6x128xbf16> to vector<1x1x6x128xbf16>
    tpu.vector_store %arg4[%c0_28, %c3, %c0_29, %c0_30], %44 {strides = array<i32>} : memref<1x6x6x128xbf16, #tpu.memory_space<vmem>>, vector<1x1x6x128xbf16>,
    %c104 = arith.constant 104 : index
    %c0_31 = arith.constant 0 : index
    %45 = tpu.strided_load %arg5[%c104, %c0_31] {strides = array<i32: 2, 1>} : memref<169x128xf32, #tpu.memory_space<vmem>>, vector<6x128xf32>
    %c105 = arith.constant 105 : index
    %c0_32 = arith.constant 0 : index
    %46 = tpu.strided_load %arg5[%c105, %c0_32] {strides = array<i32: 2, 1>} : memref<169x128xf32, #tpu.memory_space<vmem>>, vector<6x128xf32>
    %c117 = arith.constant 117 : index
    %c0_33 = arith.constant 0 : index
    %47 = tpu.strided_load %arg5[%c117, %c0_33] {strides = array<i32: 2, 1>} : memref<169x128xf32, #tpu.memory_space<vmem>>, vector<6x128xf32>
    %c118 = arith.constant 118 : index
    %c0_34 = arith.constant 0 : index
    %48 = tpu.strided_load %arg5[%c118, %c0_34] {strides = array<i32: 2, 1>} : memref<169x128xf32, #tpu.memory_space<vmem>>, vector<6x128xf32>
    %49 = arith.maximumf %45, %46 : vector<6x128xf32>
    %50 = arith.maximumf %47, %48 : vector<6x128xf32>
    %51 = arith.maximumf %49, %50 : vector<6x128xf32>
    %52 = arith.truncf %51 : vector<6x128xf32> to vector<6x128xbf16>
    %c0_35 = arith.constant 0 : index
    %c4 = arith.constant 4 : index
    %c0_36 = arith.constant 0 : index
    %c0_37 = arith.constant 0 : index
    %53 = vector.load %arg4[%c0_35, %c4, %c0_36, %c0_37] : memref<1x6x6x128xbf16, #tpu.memory_space<vmem>>, vector<1x1x6x128xbf16>
    %54 = vector.shape_cast %53 : vector<1x1x6x128xbf16> to vector<6x128xbf16>
    %55 = vector.shape_cast %52 : vector<6x128xbf16> to vector<1x1x6x128xbf16>
    tpu.vector_store %arg4[%c0_35, %c4, %c0_36, %c0_37], %55 {strides = array<i32>} : memref<1x6x6x128xbf16, #tpu.memory_space<vmem>>, vector<1x1x6x128xbf16>,
    %c130 = arith.constant 130 : index
    %c0_38 = arith.constant 0 : index
    %56 = tpu.strided_load %arg5[%c130, %c0_38] {strides = array<i32: 2, 1>} : memref<169x128xf32, #tpu.memory_space<vmem>>, vector<6x128xf32>
    %c131 = arith.constant 131 : index
    %c0_39 = arith.constant 0 : index
    %57 = tpu.strided_load %arg5[%c131, %c0_39] {strides = array<i32: 2, 1>} : memref<169x128xf32, #tpu.memory_space<vmem>>, vector<6x128xf32>
    %c143 = arith.constant 143 : index
    %c0_40 = arith.constant 0 : index
    %58 = tpu.strided_load %arg5[%c143, %c0_40] {strides = array<i32: 2, 1>} : memref<169x128xf32, #tpu.memory_space<vmem>>, vector<6x128xf32>
    %c144 = arith.constant 144 : index
    %c0_41 = arith.constant 0 : index
    %59 = tpu.strided_load %arg5[%c144, %c0_41] {strides = array<i32: 2, 1>} : memref<169x128xf32, #tpu.memory_space<vmem>>, vector<6x128xf32>
    %60 = arith.maximumf %56, %57 : vector<6x128xf32>
    %61 = arith.maximumf %58, %59 : vector<6x128xf32>
    %62 = arith.maximumf %60, %61 : vector<6x128xf32>
    %63 = arith.truncf %62 : vector<6x128xf32> to vector<6x128xbf16>
    %c0_42 = arith.constant 0 : index
    %c5 = arith.constant 5 : index
    %c0_43 = arith.constant 0 : index
    %c0_44 = arith.constant 0 : index
    %64 = vector.load %arg4[%c0_42, %c5, %c0_43, %c0_44] : memref<1x6x6x128xbf16, #tpu.memory_space<vmem>>, vector<1x1x6x128xbf16>
    %65 = vector.shape_cast %64 : vector<1x1x6x128xbf16> to vector<6x128xbf16>
    %66 = vector.shape_cast %63 : vector<6x128xbf16> to vector<1x1x6x128xbf16>
    tpu.vector_store %arg4[%c0_42, %c5, %c0_43, %c0_44], %66 {strides = array<i32>} : memref<1x6x6x128xbf16, #tpu.memory_space<vmem>>, vector<1x1x6x128xbf16>,
    return
  }
  func.func @transform_0(%arg0: i32) -> (i32, i32, i32, i32) {
    %c0_i32 = arith.constant 0 : i32
    %c0_i32_0 = arith.constant 0 : i32
    %c0_i32_1 = arith.constant 0 : i32
    %c0_i32_2 = arith.constant 0 : i32
    return %arg0, %c0_i32, %c0_i32_0, %c0_i32_1 : i32, i32, i32, i32
  }
  func.func @transform_1(%arg0: i32) -> (i32, i32, i32, i32) {
    %c0_i32 = arith.constant 0 : i32
    %c0_i32_0 = arith.constant 0 : i32
    %c0_i32_1 = arith.constant 0 : i32
    %c0_i32_2 = arith.constant 0 : i32
    %c0_i32_3 = arith.constant 0 : i32
    return %c0_i32, %c0_i32_0, %c0_i32_1, %c0_i32_2 : i32, i32, i32, i32
  }
  func.func @transform_2(%arg0: i32) -> (i32, i32) {
    %c0_i32 = arith.constant 0 : i32
    %c0_i32_0 = arith.constant 0 : i32
    %c0_i32_1 = arith.constant 0 : i32
    return %c0_i32, %c0_i32_0 : i32, i32
  }
  func.func @transform_3(%arg0: i32) -> (i32, i32, i32, i32) {
    %c0_i32 = arith.constant 0 : i32
    %c0_i32_0 = arith.constant 0 : i32
    %c0_i32_1 = arith.constant 0 : i32
    %c0_i32_2 = arith.constant 0 : i32
    return %arg0, %c0_i32, %c0_i32_0, %c0_i32_1 : i32, i32, i32, i32
  }
}

module attributes {stable_mosaic.version = 11 : i64} {
  func.func @_conv_head_kernel(%arg0: i32, %arg1: memref<1x6x6x128xbf16, #tpu.memory_space<vmem>>, %arg2: memref<3x3x128x128xbf16, #tpu.memory_space<vmem>>, %arg3: memref<1x128xf32, #tpu.memory_space<vmem>>, %arg4: memref<128x128xf32, #tpu.memory_space<vmem>>, %arg5: memref<1x128xf32, #tpu.memory_space<vmem>>, %arg6: memref<1x1x128xf32, #tpu.memory_space<vmem>>) attributes {dimension_semantics = [#tpu.dimension_semantics<parallel>], iteration_bounds = array<i64: 2>, scalar_prefetch = 0 : i64, scratch_operands = 0 : i64, tpu.core_type = #tpu.core_type<tc>, window_params = [{transform_indices = @transform_0, window_bounds = array<i64: 1, 6, 6, 128>}, {pipeline_mode = #tpu.pipeline_mode<synchronous>, transform_indices = @transform_1, window_bounds = array<i64: 3, 3, 128, 128>}, {pipeline_mode = #tpu.pipeline_mode<synchronous>, transform_indices = @transform_2, window_bounds = array<i64: 1, 128>}, {pipeline_mode = #tpu.pipeline_mode<synchronous>, transform_indices = @transform_3, window_bounds = array<i64: 128, 128>}, {pipeline_mode = #tpu.pipeline_mode<synchronous>, transform_indices = @transform_4, window_bounds = array<i64: 1, 128>}, {transform_indices = @transform_5, window_bounds = array<i64: 1, 1, 128>}]} {
    %cst = arith.constant 0.000000e+00 : f32
    %0 = vector.broadcast %cst : f32 to vector<1x128xf32>
    %cst_0 = arith.constant 0.000000e+00 : f32
    %1 = vector.broadcast %cst_0 : f32 to vector<4x128xf32>
    %c0 = arith.constant 0 : index
    %c0_1 = arith.constant 0 : index
    %c0_2 = arith.constant 0 : index
    %c0_3 = arith.constant 0 : index
    %2 = vector.load %arg1[%c0, %c0_1, %c0_2, %c0_3] : memref<1x6x6x128xbf16, #tpu.memory_space<vmem>>, vector<1x1x4x128xbf16>
    %3 = vector.shape_cast %2 : vector<1x1x4x128xbf16> to vector<4x128xbf16>
    %c0_4 = arith.constant 0 : index
    %c0_5 = arith.constant 0 : index
    %c0_6 = arith.constant 0 : index
    %c0_7 = arith.constant 0 : index
    %4 = vector.load %arg2[%c0_4, %c0_5, %c0_6, %c0_7] : memref<3x3x128x128xbf16, #tpu.memory_space<vmem>>, vector<1x1x128x128xbf16>
    %5 = vector.shape_cast %4 : vector<1x1x128x128xbf16> to vector<128x128xbf16>
    %cst_8 = arith.constant dense<0.000000e+00> : vector<4x128xf32>
    %6 = tpu.matmul %3, %5, %cst_8 {dimension_numbers = #tpu.dot_dimension_numbers<[1], [0], [0], [1], [0, 0, 1, 1], [], []>} : vector<4x128xbf16>, vector<128x128xbf16>, vector<4x128xf32> -> vector<4x128xf32>
    %7 = arith.addf %1, %6 : vector<4x128xf32>
    %c0_9 = arith.constant 0 : index
    %c0_10 = arith.constant 0 : index
    %c1 = arith.constant 1 : index
    %c0_11 = arith.constant 0 : index
    %8 = vector.load %arg1[%c0_9, %c0_10, %c1, %c0_11] : memref<1x6x6x128xbf16, #tpu.memory_space<vmem>>, vector<1x1x4x128xbf16>
    %9 = vector.shape_cast %8 : vector<1x1x4x128xbf16> to vector<4x128xbf16>
    %c0_12 = arith.constant 0 : index
    %c1_13 = arith.constant 1 : index
    %c0_14 = arith.constant 0 : index
    %c0_15 = arith.constant 0 : index
    %10 = vector.load %arg2[%c0_12, %c1_13, %c0_14, %c0_15] : memref<3x3x128x128xbf16, #tpu.memory_space<vmem>>, vector<1x1x128x128xbf16>
    %11 = vector.shape_cast %10 : vector<1x1x128x128xbf16> to vector<128x128xbf16>
    %cst_16 = arith.constant dense<0.000000e+00> : vector<4x128xf32>
    %12 = tpu.matmul %9, %11, %cst_16 {dimension_numbers = #tpu.dot_dimension_numbers<[1], [0], [0], [1], [0, 0, 1, 1], [], []>} : vector<4x128xbf16>, vector<128x128xbf16>, vector<4x128xf32> -> vector<4x128xf32>
    %13 = arith.addf %7, %12 : vector<4x128xf32>
    %c0_17 = arith.constant 0 : index
    %c0_18 = arith.constant 0 : index
    %c2 = arith.constant 2 : index
    %c0_19 = arith.constant 0 : index
    %14 = vector.load %arg1[%c0_17, %c0_18, %c2, %c0_19] : memref<1x6x6x128xbf16, #tpu.memory_space<vmem>>, vector<1x1x4x128xbf16>
    %15 = vector.shape_cast %14 : vector<1x1x4x128xbf16> to vector<4x128xbf16>
    %c0_20 = arith.constant 0 : index
    %c2_21 = arith.constant 2 : index
    %c0_22 = arith.constant 0 : index
    %c0_23 = arith.constant 0 : index
    %16 = vector.load %arg2[%c0_20, %c2_21, %c0_22, %c0_23] : memref<3x3x128x128xbf16, #tpu.memory_space<vmem>>, vector<1x1x128x128xbf16>
    %17 = vector.shape_cast %16 : vector<1x1x128x128xbf16> to vector<128x128xbf16>
    %cst_24 = arith.constant dense<0.000000e+00> : vector<4x128xf32>
    %18 = tpu.matmul %15, %17, %cst_24 {dimension_numbers = #tpu.dot_dimension_numbers<[1], [0], [0], [1], [0, 0, 1, 1], [], []>} : vector<4x128xbf16>, vector<128x128xbf16>, vector<4x128xf32> -> vector<4x128xf32>
    %19 = arith.addf %13, %18 : vector<4x128xf32>
    %c0_25 = arith.constant 0 : index
    %c1_26 = arith.constant 1 : index
    %c0_27 = arith.constant 0 : index
    %c0_28 = arith.constant 0 : index
    %20 = vector.load %arg1[%c0_25, %c1_26, %c0_27, %c0_28] : memref<1x6x6x128xbf16, #tpu.memory_space<vmem>>, vector<1x1x4x128xbf16>
    %21 = vector.shape_cast %20 : vector<1x1x4x128xbf16> to vector<4x128xbf16>
    %c1_29 = arith.constant 1 : index
    %c0_30 = arith.constant 0 : index
    %c0_31 = arith.constant 0 : index
    %c0_32 = arith.constant 0 : index
    %22 = vector.load %arg2[%c1_29, %c0_30, %c0_31, %c0_32] : memref<3x3x128x128xbf16, #tpu.memory_space<vmem>>, vector<1x1x128x128xbf16>
    %23 = vector.shape_cast %22 : vector<1x1x128x128xbf16> to vector<128x128xbf16>
    %cst_33 = arith.constant dense<0.000000e+00> : vector<4x128xf32>
    %24 = tpu.matmul %21, %23, %cst_33 {dimension_numbers = #tpu.dot_dimension_numbers<[1], [0], [0], [1], [0, 0, 1, 1], [], []>} : vector<4x128xbf16>, vector<128x128xbf16>, vector<4x128xf32> -> vector<4x128xf32>
    %25 = arith.addf %19, %24 : vector<4x128xf32>
    %c0_34 = arith.constant 0 : index
    %c1_35 = arith.constant 1 : index
    %c1_36 = arith.constant 1 : index
    %c0_37 = arith.constant 0 : index
    %26 = vector.load %arg1[%c0_34, %c1_35, %c1_36, %c0_37] : memref<1x6x6x128xbf16, #tpu.memory_space<vmem>>, vector<1x1x4x128xbf16>
    %27 = vector.shape_cast %26 : vector<1x1x4x128xbf16> to vector<4x128xbf16>
    %c1_38 = arith.constant 1 : index
    %c1_39 = arith.constant 1 : index
    %c0_40 = arith.constant 0 : index
    %c0_41 = arith.constant 0 : index
    %28 = vector.load %arg2[%c1_38, %c1_39, %c0_40, %c0_41] : memref<3x3x128x128xbf16, #tpu.memory_space<vmem>>, vector<1x1x128x128xbf16>
    %29 = vector.shape_cast %28 : vector<1x1x128x128xbf16> to vector<128x128xbf16>
    %cst_42 = arith.constant dense<0.000000e+00> : vector<4x128xf32>
    %30 = tpu.matmul %27, %29, %cst_42 {dimension_numbers = #tpu.dot_dimension_numbers<[1], [0], [0], [1], [0, 0, 1, 1], [], []>} : vector<4x128xbf16>, vector<128x128xbf16>, vector<4x128xf32> -> vector<4x128xf32>
    %31 = arith.addf %25, %30 : vector<4x128xf32>
    %c0_43 = arith.constant 0 : index
    %c1_44 = arith.constant 1 : index
    %c2_45 = arith.constant 2 : index
    %c0_46 = arith.constant 0 : index
    %32 = vector.load %arg1[%c0_43, %c1_44, %c2_45, %c0_46] : memref<1x6x6x128xbf16, #tpu.memory_space<vmem>>, vector<1x1x4x128xbf16>
    %33 = vector.shape_cast %32 : vector<1x1x4x128xbf16> to vector<4x128xbf16>
    %c1_47 = arith.constant 1 : index
    %c2_48 = arith.constant 2 : index
    %c0_49 = arith.constant 0 : index
    %c0_50 = arith.constant 0 : index
    %34 = vector.load %arg2[%c1_47, %c2_48, %c0_49, %c0_50] : memref<3x3x128x128xbf16, #tpu.memory_space<vmem>>, vector<1x1x128x128xbf16>
    %35 = vector.shape_cast %34 : vector<1x1x128x128xbf16> to vector<128x128xbf16>
    %cst_51 = arith.constant dense<0.000000e+00> : vector<4x128xf32>
    %36 = tpu.matmul %33, %35, %cst_51 {dimension_numbers = #tpu.dot_dimension_numbers<[1], [0], [0], [1], [0, 0, 1, 1], [], []>} : vector<4x128xbf16>, vector<128x128xbf16>, vector<4x128xf32> -> vector<4x128xf32>
    %37 = arith.addf %31, %36 : vector<4x128xf32>
    %c0_52 = arith.constant 0 : index
    %c2_53 = arith.constant 2 : index
    %c0_54 = arith.constant 0 : index
    %c0_55 = arith.constant 0 : index
    %38 = vector.load %arg1[%c0_52, %c2_53, %c0_54, %c0_55] : memref<1x6x6x128xbf16, #tpu.memory_space<vmem>>, vector<1x1x4x128xbf16>
    %39 = vector.shape_cast %38 : vector<1x1x4x128xbf16> to vector<4x128xbf16>
    %c2_56 = arith.constant 2 : index
    %c0_57 = arith.constant 0 : index
    %c0_58 = arith.constant 0 : index
    %c0_59 = arith.constant 0 : index
    %40 = vector.load %arg2[%c2_56, %c0_57, %c0_58, %c0_59] : memref<3x3x128x128xbf16, #tpu.memory_space<vmem>>, vector<1x1x128x128xbf16>
    %41 = vector.shape_cast %40 : vector<1x1x128x128xbf16> to vector<128x128xbf16>
    %cst_60 = arith.constant dense<0.000000e+00> : vector<4x128xf32>
    %42 = tpu.matmul %39, %41, %cst_60 {dimension_numbers = #tpu.dot_dimension_numbers<[1], [0], [0], [1], [0, 0, 1, 1], [], []>} : vector<4x128xbf16>, vector<128x128xbf16>, vector<4x128xf32> -> vector<4x128xf32>
    %43 = arith.addf %37, %42 : vector<4x128xf32>
    %c0_61 = arith.constant 0 : index
    %c2_62 = arith.constant 2 : index
    %c1_63 = arith.constant 1 : index
    %c0_64 = arith.constant 0 : index
    %44 = vector.load %arg1[%c0_61, %c2_62, %c1_63, %c0_64] : memref<1x6x6x128xbf16, #tpu.memory_space<vmem>>, vector<1x1x4x128xbf16>
    %45 = vector.shape_cast %44 : vector<1x1x4x128xbf16> to vector<4x128xbf16>
    %c2_65 = arith.constant 2 : index
    %c1_66 = arith.constant 1 : index
    %c0_67 = arith.constant 0 : index
    %c0_68 = arith.constant 0 : index
    %46 = vector.load %arg2[%c2_65, %c1_66, %c0_67, %c0_68] : memref<3x3x128x128xbf16, #tpu.memory_space<vmem>>, vector<1x1x128x128xbf16>
    %47 = vector.shape_cast %46 : vector<1x1x128x128xbf16> to vector<128x128xbf16>
    %cst_69 = arith.constant dense<0.000000e+00> : vector<4x128xf32>
    %48 = tpu.matmul %45, %47, %cst_69 {dimension_numbers = #tpu.dot_dimension_numbers<[1], [0], [0], [1], [0, 0, 1, 1], [], []>} : vector<4x128xbf16>, vector<128x128xbf16>, vector<4x128xf32> -> vector<4x128xf32>
    %49 = arith.addf %43, %48 : vector<4x128xf32>
    %c0_70 = arith.constant 0 : index
    %c2_71 = arith.constant 2 : index
    %c2_72 = arith.constant 2 : index
    %c0_73 = arith.constant 0 : index
    %50 = vector.load %arg1[%c0_70, %c2_71, %c2_72, %c0_73] : memref<1x6x6x128xbf16, #tpu.memory_space<vmem>>, vector<1x1x4x128xbf16>
    %51 = vector.shape_cast %50 : vector<1x1x4x128xbf16> to vector<4x128xbf16>
    %c2_74 = arith.constant 2 : index
    %c2_75 = arith.constant 2 : index
    %c0_76 = arith.constant 0 : index
    %c0_77 = arith.constant 0 : index
    %52 = vector.load %arg2[%c2_74, %c2_75, %c0_76, %c0_77] : memref<3x3x128x128xbf16, #tpu.memory_space<vmem>>, vector<1x1x128x128xbf16>
    %53 = vector.shape_cast %52 : vector<1x1x128x128xbf16> to vector<128x128xbf16>
    %cst_78 = arith.constant dense<0.000000e+00> : vector<4x128xf32>
    %54 = tpu.matmul %51, %53, %cst_78 {dimension_numbers = #tpu.dot_dimension_numbers<[1], [0], [0], [1], [0, 0, 1, 1], [], []>} : vector<4x128xbf16>, vector<128x128xbf16>, vector<4x128xf32> -> vector<4x128xf32>
    %55 = arith.addf %49, %54 : vector<4x128xf32>
    %c0_79 = arith.constant 0 : index
    %c0_80 = arith.constant 0 : index
    %56 = vector.load %arg3[%c0_79, %c0_80] : memref<1x128xf32, #tpu.memory_space<vmem>>, vector<1x128xf32>
    %57 = vector.broadcast %56 : vector<1x128xf32> to vector<4x128xf32>
    %58 = arith.addf %55, %57 : vector<4x128xf32>
    %cst_81 = arith.constant 0.000000e+00 : f32
    %59 = vector.broadcast %cst_81 : f32 to vector<4x128xf32>
    %60 = arith.maximumf %58, %59 : vector<4x128xf32>
    %cst_82 = arith.constant dense<0.000000e+00> : vector<128xf32>
    %61 = vector.multi_reduction <add>, %60, %cst_82 [0] : vector<4x128xf32> to vector<128xf32>
    %62 = vector.shape_cast %61 : vector<128xf32> to vector<1x128xf32>
    %63 = arith.addf %0, %62 : vector<1x128xf32>
    %cst_83 = arith.constant 0.000000e+00 : f32
    %64 = vector.broadcast %cst_83 : f32 to vector<4x128xf32>
    %c0_84 = arith.constant 0 : index
    %c1_85 = arith.constant 1 : index
    %c0_86 = arith.constant 0 : index
    %c0_87 = arith.constant 0 : index
    %65 = vector.load %arg1[%c0_84, %c1_85, %c0_86, %c0_87] : memref<1x6x6x128xbf16, #tpu.memory_space<vmem>>, vector<1x1x4x128xbf16>
    %66 = vector.shape_cast %65 : vector<1x1x4x128xbf16> to vector<4x128xbf16>
    %c0_88 = arith.constant 0 : index
    %c0_89 = arith.constant 0 : index
    %c0_90 = arith.constant 0 : index
    %c0_91 = arith.constant 0 : index
    %67 = vector.load %arg2[%c0_88, %c0_89, %c0_90, %c0_91] : memref<3x3x128x128xbf16, #tpu.memory_space<vmem>>, vector<1x1x128x128xbf16>
    %68 = vector.shape_cast %67 : vector<1x1x128x128xbf16> to vector<128x128xbf16>
    %cst_92 = arith.constant dense<0.000000e+00> : vector<4x128xf32>
    %69 = tpu.matmul %66, %68, %cst_92 {dimension_numbers = #tpu.dot_dimension_numbers<[1], [0], [0], [1], [0, 0, 1, 1], [], []>} : vector<4x128xbf16>, vector<128x128xbf16>, vector<4x128xf32> -> vector<4x128xf32>
    %70 = arith.addf %64, %69 : vector<4x128xf32>
    %c0_93 = arith.constant 0 : index
    %c1_94 = arith.constant 1 : index
    %c1_95 = arith.constant 1 : index
    %c0_96 = arith.constant 0 : index
    %71 = vector.load %arg1[%c0_93, %c1_94, %c1_95, %c0_96] : memref<1x6x6x128xbf16, #tpu.memory_space<vmem>>, vector<1x1x4x128xbf16>
    %72 = vector.shape_cast %71 : vector<1x1x4x128xbf16> to vector<4x128xbf16>
    %c0_97 = arith.constant 0 : index
    %c1_98 = arith.constant 1 : index
    %c0_99 = arith.constant 0 : index
    %c0_100 = arith.constant 0 : index
    %73 = vector.load %arg2[%c0_97, %c1_98, %c0_99, %c0_100] : memref<3x3x128x128xbf16, #tpu.memory_space<vmem>>, vector<1x1x128x128xbf16>
    %74 = vector.shape_cast %73 : vector<1x1x128x128xbf16> to vector<128x128xbf16>
    %cst_101 = arith.constant dense<0.000000e+00> : vector<4x128xf32>
    %75 = tpu.matmul %72, %74, %cst_101 {dimension_numbers = #tpu.dot_dimension_numbers<[1], [0], [0], [1], [0, 0, 1, 1], [], []>} : vector<4x128xbf16>, vector<128x128xbf16>, vector<4x128xf32> -> vector<4x128xf32>
    %76 = arith.addf %70, %75 : vector<4x128xf32>
    %c0_102 = arith.constant 0 : index
    %c1_103 = arith.constant 1 : index
    %c2_104 = arith.constant 2 : index
    %c0_105 = arith.constant 0 : index
    %77 = vector.load %arg1[%c0_102, %c1_103, %c2_104, %c0_105] : memref<1x6x6x128xbf16, #tpu.memory_space<vmem>>, vector<1x1x4x128xbf16>
    %78 = vector.shape_cast %77 : vector<1x1x4x128xbf16> to vector<4x128xbf16>
    %c0_106 = arith.constant 0 : index
    %c2_107 = arith.constant 2 : index
    %c0_108 = arith.constant 0 : index
    %c0_109 = arith.constant 0 : index
    %79 = vector.load %arg2[%c0_106, %c2_107, %c0_108, %c0_109] : memref<3x3x128x128xbf16, #tpu.memory_space<vmem>>, vector<1x1x128x128xbf16>
    %80 = vector.shape_cast %79 : vector<1x1x128x128xbf16> to vector<128x128xbf16>
    %cst_110 = arith.constant dense<0.000000e+00> : vector<4x128xf32>
    %81 = tpu.matmul %78, %80, %cst_110 {dimension_numbers = #tpu.dot_dimension_numbers<[1], [0], [0], [1], [0, 0, 1, 1], [], []>} : vector<4x128xbf16>, vector<128x128xbf16>, vector<4x128xf32> -> vector<4x128xf32>
    %82 = arith.addf %76, %81 : vector<4x128xf32>
    %c0_111 = arith.constant 0 : index
    %c2_112 = arith.constant 2 : index
    %c0_113 = arith.constant 0 : index
    %c0_114 = arith.constant 0 : index
    %83 = vector.load %arg1[%c0_111, %c2_112, %c0_113, %c0_114] : memref<1x6x6x128xbf16, #tpu.memory_space<vmem>>, vector<1x1x4x128xbf16>
    %84 = vector.shape_cast %83 : vector<1x1x4x128xbf16> to vector<4x128xbf16>
    %c1_115 = arith.constant 1 : index
    %c0_116 = arith.constant 0 : index
    %c0_117 = arith.constant 0 : index
    %c0_118 = arith.constant 0 : index
    %85 = vector.load %arg2[%c1_115, %c0_116, %c0_117, %c0_118] : memref<3x3x128x128xbf16, #tpu.memory_space<vmem>>, vector<1x1x128x128xbf16>
    %86 = vector.shape_cast %85 : vector<1x1x128x128xbf16> to vector<128x128xbf16>
    %cst_119 = arith.constant dense<0.000000e+00> : vector<4x128xf32>
    %87 = tpu.matmul %84, %86, %cst_119 {dimension_numbers = #tpu.dot_dimension_numbers<[1], [0], [0], [1], [0, 0, 1, 1], [], []>} : vector<4x128xbf16>, vector<128x128xbf16>, vector<4x128xf32> -> vector<4x128xf32>
    %88 = arith.addf %82, %87 : vector<4x128xf32>
    %c0_120 = arith.constant 0 : index
    %c2_121 = arith.constant 2 : index
    %c1_122 = arith.constant 1 : index
    %c0_123 = arith.constant 0 : index
    %89 = vector.load %arg1[%c0_120, %c2_121, %c1_122, %c0_123] : memref<1x6x6x128xbf16, #tpu.memory_space<vmem>>, vector<1x1x4x128xbf16>
    %90 = vector.shape_cast %89 : vector<1x1x4x128xbf16> to vector<4x128xbf16>
    %c1_124 = arith.constant 1 : index
    %c1_125 = arith.constant 1 : index
    %c0_126 = arith.constant 0 : index
    %c0_127 = arith.constant 0 : index
    %91 = vector.load %arg2[%c1_124, %c1_125, %c0_126, %c0_127] : memref<3x3x128x128xbf16, #tpu.memory_space<vmem>>, vector<1x1x128x128xbf16>
    %92 = vector.shape_cast %91 : vector<1x1x128x128xbf16> to vector<128x128xbf16>
    %cst_128 = arith.constant dense<0.000000e+00> : vector<4x128xf32>
    %93 = tpu.matmul %90, %92, %cst_128 {dimension_numbers = #tpu.dot_dimension_numbers<[1], [0], [0], [1], [0, 0, 1, 1], [], []>} : vector<4x128xbf16>, vector<128x128xbf16>, vector<4x128xf32> -> vector<4x128xf32>
    %94 = arith.addf %88, %93 : vector<4x128xf32>
    %c0_129 = arith.constant 0 : index
    %c2_130 = arith.constant 2 : index
    %c2_131 = arith.constant 2 : index
    %c0_132 = arith.constant 0 : index
    %95 = vector.load %arg1[%c0_129, %c2_130, %c2_131, %c0_132] : memref<1x6x6x128xbf16, #tpu.memory_space<vmem>>, vector<1x1x4x128xbf16>
    %96 = vector.shape_cast %95 : vector<1x1x4x128xbf16> to vector<4x128xbf16>
    %c1_133 = arith.constant 1 : index
    %c2_134 = arith.constant 2 : index
    %c0_135 = arith.constant 0 : index
    %c0_136 = arith.constant 0 : index
    %97 = vector.load %arg2[%c1_133, %c2_134, %c0_135, %c0_136] : memref<3x3x128x128xbf16, #tpu.memory_space<vmem>>, vector<1x1x128x128xbf16>
    %98 = vector.shape_cast %97 : vector<1x1x128x128xbf16> to vector<128x128xbf16>
    %cst_137 = arith.constant dense<0.000000e+00> : vector<4x128xf32>
    %99 = tpu.matmul %96, %98, %cst_137 {dimension_numbers = #tpu.dot_dimension_numbers<[1], [0], [0], [1], [0, 0, 1, 1], [], []>} : vector<4x128xbf16>, vector<128x128xbf16>, vector<4x128xf32> -> vector<4x128xf32>
    %100 = arith.addf %94, %99 : vector<4x128xf32>
    %c0_138 = arith.constant 0 : index
    %c3 = arith.constant 3 : index
    %c0_139 = arith.constant 0 : index
    %c0_140 = arith.constant 0 : index
    %101 = vector.load %arg1[%c0_138, %c3, %c0_139, %c0_140] : memref<1x6x6x128xbf16, #tpu.memory_space<vmem>>, vector<1x1x4x128xbf16>
    %102 = vector.shape_cast %101 : vector<1x1x4x128xbf16> to vector<4x128xbf16>
    %c2_141 = arith.constant 2 : index
    %c0_142 = arith.constant 0 : index
    %c0_143 = arith.constant 0 : index
    %c0_144 = arith.constant 0 : index
    %103 = vector.load %arg2[%c2_141, %c0_142, %c0_143, %c0_144] : memref<3x3x128x128xbf16, #tpu.memory_space<vmem>>, vector<1x1x128x128xbf16>
    %104 = vector.shape_cast %103 : vector<1x1x128x128xbf16> to vector<128x128xbf16>
    %cst_145 = arith.constant dense<0.000000e+00> : vector<4x128xf32>
    %105 = tpu.matmul %102, %104, %cst_145 {dimension_numbers = #tpu.dot_dimension_numbers<[1], [0], [0], [1], [0, 0, 1, 1], [], []>} : vector<4x128xbf16>, vector<128x128xbf16>, vector<4x128xf32> -> vector<4x128xf32>
    %106 = arith.addf %100, %105 : vector<4x128xf32>
    %c0_146 = arith.constant 0 : index
    %c3_147 = arith.constant 3 : index
    %c1_148 = arith.constant 1 : index
    %c0_149 = arith.constant 0 : index
    %107 = vector.load %arg1[%c0_146, %c3_147, %c1_148, %c0_149] : memref<1x6x6x128xbf16, #tpu.memory_space<vmem>>, vector<1x1x4x128xbf16>
    %108 = vector.shape_cast %107 : vector<1x1x4x128xbf16> to vector<4x128xbf16>
    %c2_150 = arith.constant 2 : index
    %c1_151 = arith.constant 1 : index
    %c0_152 = arith.constant 0 : index
    %c0_153 = arith.constant 0 : index
    %109 = vector.load %arg2[%c2_150, %c1_151, %c0_152, %c0_153] : memref<3x3x128x128xbf16, #tpu.memory_space<vmem>>, vector<1x1x128x128xbf16>
    %110 = vector.shape_cast %109 : vector<1x1x128x128xbf16> to vector<128x128xbf16>
    %cst_154 = arith.constant dense<0.000000e+00> : vector<4x128xf32>
    %111 = tpu.matmul %108, %110, %cst_154 {dimension_numbers = #tpu.dot_dimension_numbers<[1], [0], [0], [1], [0, 0, 1, 1], [], []>} : vector<4x128xbf16>, vector<128x128xbf16>, vector<4x128xf32> -> vector<4x128xf32>
    %112 = arith.addf %106, %111 : vector<4x128xf32>
    %c0_155 = arith.constant 0 : index
    %c3_156 = arith.constant 3 : index
    %c2_157 = arith.constant 2 : index
    %c0_158 = arith.constant 0 : index
    %113 = vector.load %arg1[%c0_155, %c3_156, %c2_157, %c0_158] : memref<1x6x6x128xbf16, #tpu.memory_space<vmem>>, vector<1x1x4x128xbf16>
    %114 = vector.shape_cast %113 : vector<1x1x4x128xbf16> to vector<4x128xbf16>
    %c2_159 = arith.constant 2 : index
    %c2_160 = arith.constant 2 : index
    %c0_161 = arith.constant 0 : index
    %c0_162 = arith.constant 0 : index
    %115 = vector.load %arg2[%c2_159, %c2_160, %c0_161, %c0_162] : memref<3x3x128x128xbf16, #tpu.memory_space<vmem>>, vector<1x1x128x128xbf16>
    %116 = vector.shape_cast %115 : vector<1x1x128x128xbf16> to vector<128x128xbf16>
    %cst_163 = arith.constant dense<0.000000e+00> : vector<4x128xf32>
    %117 = tpu.matmul %114, %116, %cst_163 {dimension_numbers = #tpu.dot_dimension_numbers<[1], [0], [0], [1], [0, 0, 1, 1], [], []>} : vector<4x128xbf16>, vector<128x128xbf16>, vector<4x128xf32> -> vector<4x128xf32>
    %118 = arith.addf %112, %117 : vector<4x128xf32>
    %c0_164 = arith.constant 0 : index
    %c0_165 = arith.constant 0 : index
    %119 = vector.load %arg3[%c0_164, %c0_165] : memref<1x128xf32, #tpu.memory_space<vmem>>, vector<1x128xf32>
    %120 = vector.broadcast %119 : vector<1x128xf32> to vector<4x128xf32>
    %121 = arith.addf %118, %120 : vector<4x128xf32>
    %cst_166 = arith.constant 0.000000e+00 : f32
    %122 = vector.broadcast %cst_166 : f32 to vector<4x128xf32>
    %123 = arith.maximumf %121, %122 : vector<4x128xf32>
    %cst_167 = arith.constant dense<0.000000e+00> : vector<128xf32>
    %124 = vector.multi_reduction <add>, %123, %cst_167 [0] : vector<4x128xf32> to vector<128xf32>
    %125 = vector.shape_cast %124 : vector<128xf32> to vector<1x128xf32>
    %126 = arith.addf %63, %125 : vector<1x128xf32>
    %cst_168 = arith.constant 0.000000e+00 : f32
    %127 = vector.broadcast %cst_168 : f32 to vector<4x128xf32>
    %c0_169 = arith.constant 0 : index
    %c2_170 = arith.constant 2 : index
    %c0_171 = arith.constant 0 : index
    %c0_172 = arith.constant 0 : index
    %128 = vector.load %arg1[%c0_169, %c2_170, %c0_171, %c0_172] : memref<1x6x6x128xbf16, #tpu.memory_space<vmem>>, vector<1x1x4x128xbf16>
    %129 = vector.shape_cast %128 : vector<1x1x4x128xbf16> to vector<4x128xbf16>
    %c0_173 = arith.constant 0 : index
    %c0_174 = arith.constant 0 : index
    %c0_175 = arith.constant 0 : index
    %c0_176 = arith.constant 0 : index
    %130 = vector.load %arg2[%c0_173, %c0_174, %c0_175, %c0_176] : memref<3x3x128x128xbf16, #tpu.memory_space<vmem>>, vector<1x1x128x128xbf16>
    %131 = vector.shape_cast %130 : vector<1x1x128x128xbf16> to vector<128x128xbf16>
    %cst_177 = arith.constant dense<0.000000e+00> : vector<4x128xf32>
    %132 = tpu.matmul %129, %131, %cst_177 {dimension_numbers = #tpu.dot_dimension_numbers<[1], [0], [0], [1], [0, 0, 1, 1], [], []>} : vector<4x128xbf16>, vector<128x128xbf16>, vector<4x128xf32> -> vector<4x128xf32>
    %133 = arith.addf %127, %132 : vector<4x128xf32>
    %c0_178 = arith.constant 0 : index
    %c2_179 = arith.constant 2 : index
    %c1_180 = arith.constant 1 : index
    %c0_181 = arith.constant 0 : index
    %134 = vector.load %arg1[%c0_178, %c2_179, %c1_180, %c0_181] : memref<1x6x6x128xbf16, #tpu.memory_space<vmem>>, vector<1x1x4x128xbf16>
    %135 = vector.shape_cast %134 : vector<1x1x4x128xbf16> to vector<4x128xbf16>
    %c0_182 = arith.constant 0 : index
    %c1_183 = arith.constant 1 : index
    %c0_184 = arith.constant 0 : index
    %c0_185 = arith.constant 0 : index
    %136 = vector.load %arg2[%c0_182, %c1_183, %c0_184, %c0_185] : memref<3x3x128x128xbf16, #tpu.memory_space<vmem>>, vector<1x1x128x128xbf16>
    %137 = vector.shape_cast %136 : vector<1x1x128x128xbf16> to vector<128x128xbf16>
    %cst_186 = arith.constant dense<0.000000e+00> : vector<4x128xf32>
    %138 = tpu.matmul %135, %137, %cst_186 {dimension_numbers = #tpu.dot_dimension_numbers<[1], [0], [0], [1], [0, 0, 1, 1], [], []>} : vector<4x128xbf16>, vector<128x128xbf16>, vector<4x128xf32> -> vector<4x128xf32>
    %139 = arith.addf %133, %138 : vector<4x128xf32>
    %c0_187 = arith.constant 0 : index
    %c2_188 = arith.constant 2 : index
    %c2_189 = arith.constant 2 : index
    %c0_190 = arith.constant 0 : index
    %140 = vector.load %arg1[%c0_187, %c2_188, %c2_189, %c0_190] : memref<1x6x6x128xbf16, #tpu.memory_space<vmem>>, vector<1x1x4x128xbf16>
    %141 = vector.shape_cast %140 : vector<1x1x4x128xbf16> to vector<4x128xbf16>
    %c0_191 = arith.constant 0 : index
    %c2_192 = arith.constant 2 : index
    %c0_193 = arith.constant 0 : index
    %c0_194 = arith.constant 0 : index
    %142 = vector.load %arg2[%c0_191, %c2_192, %c0_193, %c0_194] : memref<3x3x128x128xbf16, #tpu.memory_space<vmem>>, vector<1x1x128x128xbf16>
    %143 = vector.shape_cast %142 : vector<1x1x128x128xbf16> to vector<128x128xbf16>
    %cst_195 = arith.constant dense<0.000000e+00> : vector<4x128xf32>
    %144 = tpu.matmul %141, %143, %cst_195 {dimension_numbers = #tpu.dot_dimension_numbers<[1], [0], [0], [1], [0, 0, 1, 1], [], []>} : vector<4x128xbf16>, vector<128x128xbf16>, vector<4x128xf32> -> vector<4x128xf32>
    %145 = arith.addf %139, %144 : vector<4x128xf32>
    %c0_196 = arith.constant 0 : index
    %c3_197 = arith.constant 3 : index
    %c0_198 = arith.constant 0 : index
    %c0_199 = arith.constant 0 : index
    %146 = vector.load %arg1[%c0_196, %c3_197, %c0_198, %c0_199] : memref<1x6x6x128xbf16, #tpu.memory_space<vmem>>, vector<1x1x4x128xbf16>
    %147 = vector.shape_cast %146 : vector<1x1x4x128xbf16> to vector<4x128xbf16>
    %c1_200 = arith.constant 1 : index
    %c0_201 = arith.constant 0 : index
    %c0_202 = arith.constant 0 : index
    %c0_203 = arith.constant 0 : index
    %148 = vector.load %arg2[%c1_200, %c0_201, %c0_202, %c0_203] : memref<3x3x128x128xbf16, #tpu.memory_space<vmem>>, vector<1x1x128x128xbf16>
    %149 = vector.shape_cast %148 : vector<1x1x128x128xbf16> to vector<128x128xbf16>
    %cst_204 = arith.constant dense<0.000000e+00> : vector<4x128xf32>
    %150 = tpu.matmul %147, %149, %cst_204 {dimension_numbers = #tpu.dot_dimension_numbers<[1], [0], [0], [1], [0, 0, 1, 1], [], []>} : vector<4x128xbf16>, vector<128x128xbf16>, vector<4x128xf32> -> vector<4x128xf32>
    %151 = arith.addf %145, %150 : vector<4x128xf32>
    %c0_205 = arith.constant 0 : index
    %c3_206 = arith.constant 3 : index
    %c1_207 = arith.constant 1 : index
    %c0_208 = arith.constant 0 : index
    %152 = vector.load %arg1[%c0_205, %c3_206, %c1_207, %c0_208] : memref<1x6x6x128xbf16, #tpu.memory_space<vmem>>, vector<1x1x4x128xbf16>
    %153 = vector.shape_cast %152 : vector<1x1x4x128xbf16> to vector<4x128xbf16>
    %c1_209 = arith.constant 1 : index
    %c1_210 = arith.constant 1 : index
    %c0_211 = arith.constant 0 : index
    %c0_212 = arith.constant 0 : index
    %154 = vector.load %arg2[%c1_209, %c1_210, %c0_211, %c0_212] : memref<3x3x128x128xbf16, #tpu.memory_space<vmem>>, vector<1x1x128x128xbf16>
    %155 = vector.shape_cast %154 : vector<1x1x128x128xbf16> to vector<128x128xbf16>
    %cst_213 = arith.constant dense<0.000000e+00> : vector<4x128xf32>
    %156 = tpu.matmul %153, %155, %cst_213 {dimension_numbers = #tpu.dot_dimension_numbers<[1], [0], [0], [1], [0, 0, 1, 1], [], []>} : vector<4x128xbf16>, vector<128x128xbf16>, vector<4x128xf32> -> vector<4x128xf32>
    %157 = arith.addf %151, %156 : vector<4x128xf32>
    %c0_214 = arith.constant 0 : index
    %c3_215 = arith.constant 3 : index
    %c2_216 = arith.constant 2 : index
    %c0_217 = arith.constant 0 : index
    %158 = vector.load %arg1[%c0_214, %c3_215, %c2_216, %c0_217] : memref<1x6x6x128xbf16, #tpu.memory_space<vmem>>, vector<1x1x4x128xbf16>
    %159 = vector.shape_cast %158 : vector<1x1x4x128xbf16> to vector<4x128xbf16>
    %c1_218 = arith.constant 1 : index
    %c2_219 = arith.constant 2 : index
    %c0_220 = arith.constant 0 : index
    %c0_221 = arith.constant 0 : index
    %160 = vector.load %arg2[%c1_218, %c2_219, %c0_220, %c0_221] : memref<3x3x128x128xbf16, #tpu.memory_space<vmem>>, vector<1x1x128x128xbf16>
    %161 = vector.shape_cast %160 : vector<1x1x128x128xbf16> to vector<128x128xbf16>
    %cst_222 = arith.constant dense<0.000000e+00> : vector<4x128xf32>
    %162 = tpu.matmul %159, %161, %cst_222 {dimension_numbers = #tpu.dot_dimension_numbers<[1], [0], [0], [1], [0, 0, 1, 1], [], []>} : vector<4x128xbf16>, vector<128x128xbf16>, vector<4x128xf32> -> vector<4x128xf32>
    %163 = arith.addf %157, %162 : vector<4x128xf32>
    %c0_223 = arith.constant 0 : index
    %c4 = arith.constant 4 : index
    %c0_224 = arith.constant 0 : index
    %c0_225 = arith.constant 0 : index
    %164 = vector.load %arg1[%c0_223, %c4, %c0_224, %c0_225] : memref<1x6x6x128xbf16, #tpu.memory_space<vmem>>, vector<1x1x4x128xbf16>
    %165 = vector.shape_cast %164 : vector<1x1x4x128xbf16> to vector<4x128xbf16>
    %c2_226 = arith.constant 2 : index
    %c0_227 = arith.constant 0 : index
    %c0_228 = arith.constant 0 : index
    %c0_229 = arith.constant 0 : index
    %166 = vector.load %arg2[%c2_226, %c0_227, %c0_228, %c0_229] : memref<3x3x128x128xbf16, #tpu.memory_space<vmem>>, vector<1x1x128x128xbf16>
    %167 = vector.shape_cast %166 : vector<1x1x128x128xbf16> to vector<128x128xbf16>
    %cst_230 = arith.constant dense<0.000000e+00> : vector<4x128xf32>
    %168 = tpu.matmul %165, %167, %cst_230 {dimension_numbers = #tpu.dot_dimension_numbers<[1], [0], [0], [1], [0, 0, 1, 1], [], []>} : vector<4x128xbf16>, vector<128x128xbf16>, vector<4x128xf32> -> vector<4x128xf32>
    %169 = arith.addf %163, %168 : vector<4x128xf32>
    %c0_231 = arith.constant 0 : index
    %c4_232 = arith.constant 4 : index
    %c1_233 = arith.constant 1 : index
    %c0_234 = arith.constant 0 : index
    %170 = vector.load %arg1[%c0_231, %c4_232, %c1_233, %c0_234] : memref<1x6x6x128xbf16, #tpu.memory_space<vmem>>, vector<1x1x4x128xbf16>
    %171 = vector.shape_cast %170 : vector<1x1x4x128xbf16> to vector<4x128xbf16>
    %c2_235 = arith.constant 2 : index
    %c1_236 = arith.constant 1 : index
    %c0_237 = arith.constant 0 : index
    %c0_238 = arith.constant 0 : index
    %172 = vector.load %arg2[%c2_235, %c1_236, %c0_237, %c0_238] : memref<3x3x128x128xbf16, #tpu.memory_space<vmem>>, vector<1x1x128x128xbf16>
    %173 = vector.shape_cast %172 : vector<1x1x128x128xbf16> to vector<128x128xbf16>
    %cst_239 = arith.constant dense<0.000000e+00> : vector<4x128xf32>
    %174 = tpu.matmul %171, %173, %cst_239 {dimension_numbers = #tpu.dot_dimension_numbers<[1], [0], [0], [1], [0, 0, 1, 1], [], []>} : vector<4x128xbf16>, vector<128x128xbf16>, vector<4x128xf32> -> vector<4x128xf32>
    %175 = arith.addf %169, %174 : vector<4x128xf32>
    %c0_240 = arith.constant 0 : index
    %c4_241 = arith.constant 4 : index
    %c2_242 = arith.constant 2 : index
    %c0_243 = arith.constant 0 : index
    %176 = vector.load %arg1[%c0_240, %c4_241, %c2_242, %c0_243] : memref<1x6x6x128xbf16, #tpu.memory_space<vmem>>, vector<1x1x4x128xbf16>
    %177 = vector.shape_cast %176 : vector<1x1x4x128xbf16> to vector<4x128xbf16>
    %c2_244 = arith.constant 2 : index
    %c2_245 = arith.constant 2 : index
    %c0_246 = arith.constant 0 : index
    %c0_247 = arith.constant 0 : index
    %178 = vector.load %arg2[%c2_244, %c2_245, %c0_246, %c0_247] : memref<3x3x128x128xbf16, #tpu.memory_space<vmem>>, vector<1x1x128x128xbf16>
    %179 = vector.shape_cast %178 : vector<1x1x128x128xbf16> to vector<128x128xbf16>
    %cst_248 = arith.constant dense<0.000000e+00> : vector<4x128xf32>
    %180 = tpu.matmul %177, %179, %cst_248 {dimension_numbers = #tpu.dot_dimension_numbers<[1], [0], [0], [1], [0, 0, 1, 1], [], []>} : vector<4x128xbf16>, vector<128x128xbf16>, vector<4x128xf32> -> vector<4x128xf32>
    %181 = arith.addf %175, %180 : vector<4x128xf32>
    %c0_249 = arith.constant 0 : index
    %c0_250 = arith.constant 0 : index
    %182 = vector.load %arg3[%c0_249, %c0_250] : memref<1x128xf32, #tpu.memory_space<vmem>>, vector<1x128xf32>
    %183 = vector.broadcast %182 : vector<1x128xf32> to vector<4x128xf32>
    %184 = arith.addf %181, %183 : vector<4x128xf32>
    %cst_251 = arith.constant 0.000000e+00 : f32
    %185 = vector.broadcast %cst_251 : f32 to vector<4x128xf32>
    %186 = arith.maximumf %184, %185 : vector<4x128xf32>
    %cst_252 = arith.constant dense<0.000000e+00> : vector<128xf32>
    %187 = vector.multi_reduction <add>, %186, %cst_252 [0] : vector<4x128xf32> to vector<128xf32>
    %188 = vector.shape_cast %187 : vector<128xf32> to vector<1x128xf32>
    %189 = arith.addf %126, %188 : vector<1x128xf32>
    %cst_253 = arith.constant 0.000000e+00 : f32
    %190 = vector.broadcast %cst_253 : f32 to vector<4x128xf32>
    %c0_254 = arith.constant 0 : index
    %c3_255 = arith.constant 3 : index
    %c0_256 = arith.constant 0 : index
    %c0_257 = arith.constant 0 : index
    %191 = vector.load %arg1[%c0_254, %c3_255, %c0_256, %c0_257] : memref<1x6x6x128xbf16, #tpu.memory_space<vmem>>, vector<1x1x4x128xbf16>
    %192 = vector.shape_cast %191 : vector<1x1x4x128xbf16> to vector<4x128xbf16>
    %c0_258 = arith.constant 0 : index
    %c0_259 = arith.constant 0 : index
    %c0_260 = arith.constant 0 : index
    %c0_261 = arith.constant 0 : index
    %193 = vector.load %arg2[%c0_258, %c0_259, %c0_260, %c0_261] : memref<3x3x128x128xbf16, #tpu.memory_space<vmem>>, vector<1x1x128x128xbf16>
    %194 = vector.shape_cast %193 : vector<1x1x128x128xbf16> to vector<128x128xbf16>
    %cst_262 = arith.constant dense<0.000000e+00> : vector<4x128xf32>
    %195 = tpu.matmul %192, %194, %cst_262 {dimension_numbers = #tpu.dot_dimension_numbers<[1], [0], [0], [1], [0, 0, 1, 1], [], []>} : vector<4x128xbf16>, vector<128x128xbf16>, vector<4x128xf32> -> vector<4x128xf32>
    %196 = arith.addf %190, %195 : vector<4x128xf32>
    %c0_263 = arith.constant 0 : index
    %c3_264 = arith.constant 3 : index
    %c1_265 = arith.constant 1 : index
    %c0_266 = arith.constant 0 : index
    %197 = vector.load %arg1[%c0_263, %c3_264, %c1_265, %c0_266] : memref<1x6x6x128xbf16, #tpu.memory_space<vmem>>, vector<1x1x4x128xbf16>
    %198 = vector.shape_cast %197 : vector<1x1x4x128xbf16> to vector<4x128xbf16>
    %c0_267 = arith.constant 0 : index
    %c1_268 = arith.constant 1 : index
    %c0_269 = arith.constant 0 : index
    %c0_270 = arith.constant 0 : index
    %199 = vector.load %arg2[%c0_267, %c1_268, %c0_269, %c0_270] : memref<3x3x128x128xbf16, #tpu.memory_space<vmem>>, vector<1x1x128x128xbf16>
    %200 = vector.shape_cast %199 : vector<1x1x128x128xbf16> to vector<128x128xbf16>
    %cst_271 = arith.constant dense<0.000000e+00> : vector<4x128xf32>
    %201 = tpu.matmul %198, %200, %cst_271 {dimension_numbers = #tpu.dot_dimension_numbers<[1], [0], [0], [1], [0, 0, 1, 1], [], []>} : vector<4x128xbf16>, vector<128x128xbf16>, vector<4x128xf32> -> vector<4x128xf32>
    %202 = arith.addf %196, %201 : vector<4x128xf32>
    %c0_272 = arith.constant 0 : index
    %c3_273 = arith.constant 3 : index
    %c2_274 = arith.constant 2 : index
    %c0_275 = arith.constant 0 : index
    %203 = vector.load %arg1[%c0_272, %c3_273, %c2_274, %c0_275] : memref<1x6x6x128xbf16, #tpu.memory_space<vmem>>, vector<1x1x4x128xbf16>
    %204 = vector.shape_cast %203 : vector<1x1x4x128xbf16> to vector<4x128xbf16>
    %c0_276 = arith.constant 0 : index
    %c2_277 = arith.constant 2 : index
    %c0_278 = arith.constant 0 : index
    %c0_279 = arith.constant 0 : index
    %205 = vector.load %arg2[%c0_276, %c2_277, %c0_278, %c0_279] : memref<3x3x128x128xbf16, #tpu.memory_space<vmem>>, vector<1x1x128x128xbf16>
    %206 = vector.shape_cast %205 : vector<1x1x128x128xbf16> to vector<128x128xbf16>
    %cst_280 = arith.constant dense<0.000000e+00> : vector<4x128xf32>
    %207 = tpu.matmul %204, %206, %cst_280 {dimension_numbers = #tpu.dot_dimension_numbers<[1], [0], [0], [1], [0, 0, 1, 1], [], []>} : vector<4x128xbf16>, vector<128x128xbf16>, vector<4x128xf32> -> vector<4x128xf32>
    %208 = arith.addf %202, %207 : vector<4x128xf32>
    %c0_281 = arith.constant 0 : index
    %c4_282 = arith.constant 4 : index
    %c0_283 = arith.constant 0 : index
    %c0_284 = arith.constant 0 : index
    %209 = vector.load %arg1[%c0_281, %c4_282, %c0_283, %c0_284] : memref<1x6x6x128xbf16, #tpu.memory_space<vmem>>, vector<1x1x4x128xbf16>
    %210 = vector.shape_cast %209 : vector<1x1x4x128xbf16> to vector<4x128xbf16>
    %c1_285 = arith.constant 1 : index
    %c0_286 = arith.constant 0 : index
    %c0_287 = arith.constant 0 : index
    %c0_288 = arith.constant 0 : index
    %211 = vector.load %arg2[%c1_285, %c0_286, %c0_287, %c0_288] : memref<3x3x128x128xbf16, #tpu.memory_space<vmem>>, vector<1x1x128x128xbf16>
    %212 = vector.shape_cast %211 : vector<1x1x128x128xbf16> to vector<128x128xbf16>
    %cst_289 = arith.constant dense<0.000000e+00> : vector<4x128xf32>
    %213 = tpu.matmul %210, %212, %cst_289 {dimension_numbers = #tpu.dot_dimension_numbers<[1], [0], [0], [1], [0, 0, 1, 1], [], []>} : vector<4x128xbf16>, vector<128x128xbf16>, vector<4x128xf32> -> vector<4x128xf32>
    %214 = arith.addf %208, %213 : vector<4x128xf32>
    %c0_290 = arith.constant 0 : index
    %c4_291 = arith.constant 4 : index
    %c1_292 = arith.constant 1 : index
    %c0_293 = arith.constant 0 : index
    %215 = vector.load %arg1[%c0_290, %c4_291, %c1_292, %c0_293] : memref<1x6x6x128xbf16, #tpu.memory_space<vmem>>, vector<1x1x4x128xbf16>
    %216 = vector.shape_cast %215 : vector<1x1x4x128xbf16> to vector<4x128xbf16>
    %c1_294 = arith.constant 1 : index
    %c1_295 = arith.constant 1 : index
    %c0_296 = arith.constant 0 : index
    %c0_297 = arith.constant 0 : index
    %217 = vector.load %arg2[%c1_294, %c1_295, %c0_296, %c0_297] : memref<3x3x128x128xbf16, #tpu.memory_space<vmem>>, vector<1x1x128x128xbf16>
    %218 = vector.shape_cast %217 : vector<1x1x128x128xbf16> to vector<128x128xbf16>
    %cst_298 = arith.constant dense<0.000000e+00> : vector<4x128xf32>
    %219 = tpu.matmul %216, %218, %cst_298 {dimension_numbers = #tpu.dot_dimension_numbers<[1], [0], [0], [1], [0, 0, 1, 1], [], []>} : vector<4x128xbf16>, vector<128x128xbf16>, vector<4x128xf32> -> vector<4x128xf32>
    %220 = arith.addf %214, %219 : vector<4x128xf32>
    %c0_299 = arith.constant 0 : index
    %c4_300 = arith.constant 4 : index
    %c2_301 = arith.constant 2 : index
    %c0_302 = arith.constant 0 : index
    %221 = vector.load %arg1[%c0_299, %c4_300, %c2_301, %c0_302] : memref<1x6x6x128xbf16, #tpu.memory_space<vmem>>, vector<1x1x4x128xbf16>
    %222 = vector.shape_cast %221 : vector<1x1x4x128xbf16> to vector<4x128xbf16>
    %c1_303 = arith.constant 1 : index
    %c2_304 = arith.constant 2 : index
    %c0_305 = arith.constant 0 : index
    %c0_306 = arith.constant 0 : index
    %223 = vector.load %arg2[%c1_303, %c2_304, %c0_305, %c0_306] : memref<3x3x128x128xbf16, #tpu.memory_space<vmem>>, vector<1x1x128x128xbf16>
    %224 = vector.shape_cast %223 : vector<1x1x128x128xbf16> to vector<128x128xbf16>
    %cst_307 = arith.constant dense<0.000000e+00> : vector<4x128xf32>
    %225 = tpu.matmul %222, %224, %cst_307 {dimension_numbers = #tpu.dot_dimension_numbers<[1], [0], [0], [1], [0, 0, 1, 1], [], []>} : vector<4x128xbf16>, vector<128x128xbf16>, vector<4x128xf32> -> vector<4x128xf32>
    %226 = arith.addf %220, %225 : vector<4x128xf32>
    %c0_308 = arith.constant 0 : index
    %c5 = arith.constant 5 : index
    %c0_309 = arith.constant 0 : index
    %c0_310 = arith.constant 0 : index
    %227 = vector.load %arg1[%c0_308, %c5, %c0_309, %c0_310] : memref<1x6x6x128xbf16, #tpu.memory_space<vmem>>, vector<1x1x4x128xbf16>
    %228 = vector.shape_cast %227 : vector<1x1x4x128xbf16> to vector<4x128xbf16>
    %c2_311 = arith.constant 2 : index
    %c0_312 = arith.constant 0 : index
    %c0_313 = arith.constant 0 : index
    %c0_314 = arith.constant 0 : index
    %229 = vector.load %arg2[%c2_311, %c0_312, %c0_313, %c0_314] : memref<3x3x128x128xbf16, #tpu.memory_space<vmem>>, vector<1x1x128x128xbf16>
    %230 = vector.shape_cast %229 : vector<1x1x128x128xbf16> to vector<128x128xbf16>
    %cst_315 = arith.constant dense<0.000000e+00> : vector<4x128xf32>
    %231 = tpu.matmul %228, %230, %cst_315 {dimension_numbers = #tpu.dot_dimension_numbers<[1], [0], [0], [1], [0, 0, 1, 1], [], []>} : vector<4x128xbf16>, vector<128x128xbf16>, vector<4x128xf32> -> vector<4x128xf32>
    %232 = arith.addf %226, %231 : vector<4x128xf32>
    %c0_316 = arith.constant 0 : index
    %c5_317 = arith.constant 5 : index
    %c1_318 = arith.constant 1 : index
    %c0_319 = arith.constant 0 : index
    %233 = vector.load %arg1[%c0_316, %c5_317, %c1_318, %c0_319] : memref<1x6x6x128xbf16, #tpu.memory_space<vmem>>, vector<1x1x4x128xbf16>
    %234 = vector.shape_cast %233 : vector<1x1x4x128xbf16> to vector<4x128xbf16>
    %c2_320 = arith.constant 2 : index
    %c1_321 = arith.constant 1 : index
    %c0_322 = arith.constant 0 : index
    %c0_323 = arith.constant 0 : index
    %235 = vector.load %arg2[%c2_320, %c1_321, %c0_322, %c0_323] : memref<3x3x128x128xbf16, #tpu.memory_space<vmem>>, vector<1x1x128x128xbf16>
    %236 = vector.shape_cast %235 : vector<1x1x128x128xbf16> to vector<128x128xbf16>
    %cst_324 = arith.constant dense<0.000000e+00> : vector<4x128xf32>
    %237 = tpu.matmul %234, %236, %cst_324 {dimension_numbers = #tpu.dot_dimension_numbers<[1], [0], [0], [1], [0, 0, 1, 1], [], []>} : vector<4x128xbf16>, vector<128x128xbf16>, vector<4x128xf32> -> vector<4x128xf32>
    %238 = arith.addf %232, %237 : vector<4x128xf32>
    %c0_325 = arith.constant 0 : index
    %c5_326 = arith.constant 5 : index
    %c2_327 = arith.constant 2 : index
    %c0_328 = arith.constant 0 : index
    %239 = vector.load %arg1[%c0_325, %c5_326, %c2_327, %c0_328] : memref<1x6x6x128xbf16, #tpu.memory_space<vmem>>, vector<1x1x4x128xbf16>
    %240 = vector.shape_cast %239 : vector<1x1x4x128xbf16> to vector<4x128xbf16>
    %c2_329 = arith.constant 2 : index
    %c2_330 = arith.constant 2 : index
    %c0_331 = arith.constant 0 : index
    %c0_332 = arith.constant 0 : index
    %241 = vector.load %arg2[%c2_329, %c2_330, %c0_331, %c0_332] : memref<3x3x128x128xbf16, #tpu.memory_space<vmem>>, vector<1x1x128x128xbf16>
    %242 = vector.shape_cast %241 : vector<1x1x128x128xbf16> to vector<128x128xbf16>
    %cst_333 = arith.constant dense<0.000000e+00> : vector<4x128xf32>
    %243 = tpu.matmul %240, %242, %cst_333 {dimension_numbers = #tpu.dot_dimension_numbers<[1], [0], [0], [1], [0, 0, 1, 1], [], []>} : vector<4x128xbf16>, vector<128x128xbf16>, vector<4x128xf32> -> vector<4x128xf32>
    %244 = arith.addf %238, %243 : vector<4x128xf32>
    %c0_334 = arith.constant 0 : index
    %c0_335 = arith.constant 0 : index
    %245 = vector.load %arg3[%c0_334, %c0_335] : memref<1x128xf32, #tpu.memory_space<vmem>>, vector<1x128xf32>
    %246 = vector.broadcast %245 : vector<1x128xf32> to vector<4x128xf32>
    %247 = arith.addf %244, %246 : vector<4x128xf32>
    %cst_336 = arith.constant 0.000000e+00 : f32
    %248 = vector.broadcast %cst_336 : f32 to vector<4x128xf32>
    %249 = arith.maximumf %247, %248 : vector<4x128xf32>
    %cst_337 = arith.constant dense<0.000000e+00> : vector<128xf32>
    %250 = vector.multi_reduction <add>, %249, %cst_337 [0] : vector<4x128xf32> to vector<128xf32>
    %251 = vector.shape_cast %250 : vector<128xf32> to vector<1x128xf32>
    %252 = arith.addf %189, %251 : vector<1x128xf32>
    %cst_338 = arith.constant 6.250000e-02 : f32
    %253 = vector.broadcast %cst_338 : f32 to vector<1x128xf32>
    %254 = arith.mulf %252, %253 : vector<1x128xf32>
    %c0_339 = arith.constant 0 : index
    %c0_340 = arith.constant 0 : index
    %255 = vector.load %arg4[%c0_339, %c0_340] : memref<128x128xf32, #tpu.memory_space<vmem>>, vector<128x128xf32>
    %cst_341 = arith.constant dense<0.000000e+00> : vector<1x128xf32>
    %256 = tpu.matmul %254, %255, %cst_341 {dimension_numbers = #tpu.dot_dimension_numbers<[1], [0], [0], [1], [0, 0, 1, 1], [], []>} : vector<1x128xf32>, vector<128x128xf32>, vector<1x128xf32> -> vector<1x128xf32>
    %c0_342 = arith.constant 0 : index
    %c0_343 = arith.constant 0 : index
    %257 = vector.load %arg5[%c0_342, %c0_343] : memref<1x128xf32, #tpu.memory_space<vmem>>, vector<1x128xf32>
    %258 = arith.addf %256, %257 : vector<1x128xf32>
    %259 = tpu.iota {dimensions = array<i32: 1>} : vector<1x128xi32>
    %c10_i32 = arith.constant 10 : i32
    %260 = vector.broadcast %c10_i32 : i32 to vector<1x128xi32>
    %261 = arith.cmpi slt, %259, %260 : vector<1x128xi32>
    %cst_344 = arith.constant -1.000000e+30 : f32
    %262 = vector.broadcast %cst_344 : f32 to vector<1x128xf32>
    %263 = arith.select %261, %258, %262 : vector<1x128xi1>, vector<1x128xf32>
    %cst_345 = arith.constant dense<0xFF800000> : vector<1xf32>
    %264 = vector.multi_reduction <maximumf>, %263, %cst_345 [1] : vector<1x128xf32> to vector<1xf32>
    %265 = vector.shape_cast %264 : vector<1xf32> to vector<1x1xf32>
    %266 = vector.broadcast %265 : vector<1x1xf32> to vector<1x128xf32>
    %267 = arith.subf %263, %266 : vector<1x128xf32>
    %268 = math.exp %267 : vector<1x128xf32>
    %cst_346 = arith.constant 0.000000e+00 : f32
    %269 = vector.broadcast %cst_346 : f32 to vector<1x128xf32>
    %270 = arith.select %261, %268, %269 : vector<1x128xi1>, vector<1x128xf32>
    %271 = vector.broadcast %265 : vector<1x1xf32> to vector<1x128xf32>
    %272 = arith.subf %263, %271 : vector<1x128xf32>
    %cst_347 = arith.constant dense<0.000000e+00> : vector<1xf32>
    %273 = vector.multi_reduction <add>, %270, %cst_347 [1] : vector<1x128xf32> to vector<1xf32>
    %274 = vector.shape_cast %273 : vector<1xf32> to vector<1x1xf32>
    %275 = math.log %274 : vector<1x1xf32>
    %276 = vector.broadcast %275 : vector<1x1xf32> to vector<1x128xf32>
    %277 = arith.subf %272, %276 : vector<1x128xf32>
    %c0_348 = arith.constant 0 : index
    %c0_349 = arith.constant 0 : index
    %c0_350 = arith.constant 0 : index
    %278 = vector.load %arg6[%c0_348, %c0_349, %c0_350] : memref<1x1x128xf32, #tpu.memory_space<vmem>>, vector<1x1x128xf32>
    %279 = vector.shape_cast %278 : vector<1x1x128xf32> to vector<1x128xf32>
    %280 = vector.shape_cast %277 : vector<1x128xf32> to vector<1x1x128xf32>
    tpu.vector_store %arg6[%c0_348, %c0_349, %c0_350], %280 {strides = array<i32>} : memref<1x1x128xf32, #tpu.memory_space<vmem>>, vector<1x1x128xf32>,
    return
  }
  func.func @transform_0(%arg0: i32) -> (i32, i32, i32, i32) {
    %c0_i32 = arith.constant 0 : i32
    %c0_i32_0 = arith.constant 0 : i32
    %c0_i32_1 = arith.constant 0 : i32
    %c0_i32_2 = arith.constant 0 : i32
    return %arg0, %c0_i32, %c0_i32_0, %c0_i32_1 : i32, i32, i32, i32
  }
  func.func @transform_1(%arg0: i32) -> (i32, i32, i32, i32) {
    %c0_i32 = arith.constant 0 : i32
    %c0_i32_0 = arith.constant 0 : i32
    %c0_i32_1 = arith.constant 0 : i32
    %c0_i32_2 = arith.constant 0 : i32
    %c0_i32_3 = arith.constant 0 : i32
    return %c0_i32, %c0_i32_0, %c0_i32_1, %c0_i32_2 : i32, i32, i32, i32
  }
  func.func @transform_2(%arg0: i32) -> (i32, i32) {
    %c0_i32 = arith.constant 0 : i32
    %c0_i32_0 = arith.constant 0 : i32
    %c0_i32_1 = arith.constant 0 : i32
    return %c0_i32, %c0_i32_0 : i32, i32
  }
  func.func @transform_3(%arg0: i32) -> (i32, i32) {
    %c0_i32 = arith.constant 0 : i32
    %c0_i32_0 = arith.constant 0 : i32
    %c0_i32_1 = arith.constant 0 : i32
    return %c0_i32, %c0_i32_0 : i32, i32
  }
  func.func @transform_4(%arg0: i32) -> (i32, i32) {
    %c0_i32 = arith.constant 0 : i32
    %c0_i32_0 = arith.constant 0 : i32
    %c0_i32_1 = arith.constant 0 : i32
    return %c0_i32, %c0_i32_0 : i32, i32
  }
  func.func @transform_5(%arg0: i32) -> (i32, i32, i32) {
    %c0_i32 = arith.constant 0 : i32
    %c0_i32_0 = arith.constant 0 : i32
    %c0_i32_1 = arith.constant 0 : i32
    return %arg0, %c0_i32, %c0_i32_0 : i32, i32, i32
  }
}

</mosaic_0001>

<bundles_post_ra>
// kernel: small_convnet_forward.3
= control target key start
LH: loop header
LB: loop body
LE: loop exit
PB: predicated region body
PF: predicated region fallthrough
CT: control target
= control target key end

     0   :  { %s1224_s12 = smov 0   ;;  %s1437_s0 = inlined_call_operand.vmem [shape: f32[2,32,32,8], index: 0, kind: input, shape index: {}]   ;;  %s1438_s1 = inlined_call_operand.vmem [shape: bf16[3,3,8,128], index: 1, kind: input, shape index: {}]   ;;  %s1439_s2 = inlined_call_operand.vmem [shape: f32[1,128], index: 2, kind: input, shape index: {}]   ;;  %s1440_s3 = inlined_call_operand.vmem [shape: bf16[2,15,15,128], index: 3, kind: output, shape index: {}]  }
   0x1 LB: > { %s1063_s13 = sadd.s32 4294967295, %s1198_s12   ;;  %p1067_p0 = scmp.ge.s32.totalorder %s1198_s12, 1  ;;  %s1198_s12 = sphi %s1224_s12, %s13_s12  }
   0x2   : > { %p137_p1 = scmp.lt.s32.totalorder %s1198_s12, 3 }
   0x4   : > { %p138_p2 = pnand %p1067_p0, %p137_p1 }
   0x5   : > { %p161_p3 = scmp.lt.s32.totalorder (!%p138_p2), %s1063_s13, 1  ;;  %s1242_s22 = smov (!%p138_p2), 0  }
   0x6   : > { %141 = sbr.rel (%p138_p2) target bundleno = 322 (0x142), region = 32 }
   0xb   : > { %s1444_s13 = smov (!%p161_p3, %s1063_s13), 1 }
   0xc   : > { %s1168_s14 = sshll.u32 %s1444_s13, 10  ;;  %s1170_s15 = smul.u32 120, %s1444_s13 }
   0xd   : > { %s1235_s18 = scalar_lea.vmem %s1437_s0, %s1168_s14 }
   0xe   : > { %s1240_s21 = scalar_lea.vmem %s1440_s3, %s1170_s15 }
   0xf LB: >> { %v1072_v0 = vld [vmem:[%s1438_s1 + $0x4] sm:$0xf]  ;;  %vm202_vm0 = vcmask 1043456   ;;  %v186_v1 = vld [vmem:[%s1438_s1] sm:$0xf]  ;;  %s1071_s4 = sshll.u32 %s1202_s22, 5  ;;  %s1202_s22 = sphi %s1242_s22, %s177_s22  }
  0x10   : >> { %v204_v2 = vsel %vm202_vm0, %v1072_v0, 0  ;;  %v232_v3 = vsel %vm202_vm0, %v186_v1, 0  ;;  %v1077_v4 = vld [vmem:[%s1438_s1 + $0x8] sm:$0xf]  ;;  %v1085_v5 = vld [vmem:[%s1438_s1 + $0xc] sm:$0xf]  ;;  %s1268_s7 = scalar_lea.vmem %s1235_s18, %s1071_s4 }
  0x11   : >> { %213 = vmatpush.bf16.msra.mxu0 %v204_v2  ;;  %1169 = vmatpush.bf16.msra.mxu1 %v204_v2  ;;  %v268_v6 = vsel %vm202_vm0, %v1077_v4, 0  ;;  %v311_v7 = vsel %vm202_vm0, %v1085_v5, 0  ;;  %v1092_v8 = vld [vmem:[%s1438_s1 + $0x10] sm:$0xf]  ;;  %v1107_v10 = vld [vmem:[%s1438_s1 + $0x18] sm:$0xf] }
  0x12   : >> { %277 = vmatpush.bf16.msra.mxu2 %v268_v6  ;;  %v351_v9 = vsel %vm202_vm0, %v1092_v8, 0  ;;  %v1114_v11 = vld [vmem:[%s1438_s1 + $0x1c] sm:$0xf]  ;;  %v187_v12 = vld [vmem:[%s1268_s7 + $0x1] sm:$0xff]  ;;  %v188_v13 = vld [vmem:[%s1268_s7 + $0x9] sm:$0xff]  ;;  %vm195_vm1 = vcmask 64512   ;;  %320 = vmatpush.bf16.msra.mxu3 %v311_v7 }
  0x13   : >> { %v189_v14 = vld [vmem:[%s1268_s7 + $0x11] sm:$0xff]  ;;  %v434_v15 = vsel %vm202_vm0, %v1107_v10, 0  ;;  %v474_v16 = vsel %vm202_vm0, %v1114_v11, 0  ;;  %v191_v17 = vpack.c.bf16 %v188_v13, %v187_v12  ;;  %v190_v18 = vld [vmem:[%s1268_s7 + $0x19] sm:$0x3f]  ;;  %v253_v19 = vld [vmem:[%s1268_s7 + $0x2] sm:$0xff] }
  0x14   : >> { %v254_v20 = vld [vmem:[%s1268_s7 + $0xa] sm:$0xff]  ;;  %v192_v21 = vpack.c.bf16 %v190_v18, %v189_v14  ;;  %v1081_v23 = vld [vmem:[%s1268_s7 + $0x20] sm:$0xff]  ;;  %v1099_v26 = vld [vmem:[%s1438_s1 + $0x14] sm:$0xf]  ;;  %s551_s20 = smul.u32 30, %s1202_s22  ;;  %s177_s22 = sadd.s32 1, %s1202_s22  }
  0x15   : >> { %241 = vmatpush.bf16.msrb.mxu1 %v232_v3  ;;  %360 = vmatpush.bf16.msrb.mxu0 %v351_v9  ;;  %v257_v22 = vpack.c.bf16 %v254_v20, %v253_v19  ;;  %v1082_v24 = vld [vmem:[%s1268_s7 + $0x28] sm:$0xff]  ;;  %v391_v27 = vsel %vm202_vm0, %v1099_v26, 0  ;;  %v1121_v28 = vld [vmem:[%s1438_s1 + $0x20] sm:$0xf]  ;;  %v255_v34 = vld [vmem:[%s1268_s7 + $0x12] sm:$0xff]  ;;  %p174_p4 = scmp.ge.s32.totalorder %s177_s22, 30  }
  0x16   : >> { %443 = vmatpush.bf16.msrb.mxu2 %v434_v15  ;;  %483 = vmatpush.bf16.msrb.mxu3 %v474_v16  ;;  %v300_v25 = vpack.c.bf16 %v1082_v24, %v1081_v23  ;;  %v514_v29 = vsel %vm202_vm0, %v1121_v28, 0  ;;  %v180_v30 = vld [vmem:[%s1268_s7] sm:$0xff]  ;;  %v1089_v32 = vld [vmem:[%s1268_s7 + $0x29] sm:$0xff]  ;;  %v256_v35 = vld [vmem:[%s1268_s7 + $0x1a] sm:$0x3f]  ;;  %s1345_s23 = scalar_lea.vmem [#allocation2], %s551_s20 }
  0x17   : >> { %1073 = vmatmul.msk.bf16.vlgmr.msra.gmra.mxu0 %vm195_vm1, %v191_v17  ;;  %1074 = vmatmul.msk.bf16.vlgmr.msra.gmra.mxu1 %vm195_vm1, %v192_v21  ;;  %v1088_v31 = vld [vmem:[%s1268_s7 + $0x21] sm:$0xff]  ;;  %v1083_v36 = vld [vmem:[%s1268_s7 + $0x30] sm:$0xff]  ;;  %v1084_v37 = vld [vmem:[%s1268_s7 + $0x38] sm:$0x3f]  ;;  %v258_v40 = vpack.c.bf16 %v256_v35, %v255_v34  ;;  %vm582_vm2 = vsmask.f32 (%p174_p4), 3328 }
  0x18   : >> { %1078 = vmatmul.msk.bf16.vlgmr.msra.gmra.mxu2 %vm195_vm1, %v257_v22  ;;  %1086 = vmatmul.msk.bf16.vlgmr.msra.gmra.mxu3 %vm195_vm1, %v300_v25  ;;  %v181_v33 = vld [vmem:[%s1268_s7 + $0x8] sm:$0xff]  ;;  %v340_v38 = vpack.c.bf16 %v1089_v32, %v1088_v31  ;;  %v301_v41 = vpack.c.bf16 %v1084_v37, %v1083_v36  ;;  %v182_v42 = vld [vmem:[%s1268_s7 + $0x10] sm:$0xff]  ;;  %v1091_v44 = vld [vmem:[%s1268_s7 + $0x39] sm:$0x3f] }
  0x19   : >> { %400 = vmatpush.bf16.msra.mxu1 %v391_v27  ;;  %523 = vmatpush.bf16.msra.mxu0 %v514_v29  ;;  %v184_v39 = vpack.c.bf16 %v181_v33, %v180_v30  ;;  %v1090_v43 = vld [vmem:[%s1268_s7 + $0x31] sm:$0xff]  ;;  %v1103_v46 = vld [vmem:[%s1268_s7 + $0x40] sm:$0xff]  ;;  %v1104_v47 = vld [vmem:[%s1268_s7 + $0x48] sm:$0xff] }
  0x1a   : >> { %v183_v45 = vld [vmem:[%s1268_s7 + $0x18] sm:$0x3f]  ;;  %v1110_v48 = vld [vmem:[%s1268_s7 + $0x41] sm:$0xff]  ;;  %v1111_v49 = vld [vmem:[%s1268_s7 + $0x49] sm:$0xff]  ;;  %v341_v50 = vpack.c.bf16 %v1091_v44, %v1090_v43  ;;  %v423_v52 = vpack.c.bf16 %v1104_v47, %v1103_v46 }
  0x1b   : >> { %v185_v51 = vpack.c.bf16 %v183_v45, %v182_v42  ;;  %v463_v53 = vpack.c.bf16 %v1111_v49, %v1110_v48  ;;  %v1095_v54 = vld [vmem:[%s1268_s7 + $0x22] sm:$0xff]  ;;  %v1118_v56 = vld [vmem:[%s1268_s7 + $0x4a] sm:$0xff]  ;;  %v1106_v59 = vld [vmem:[%s1268_s7 + $0x58] sm:$0x3f] }
  0x1c   : >> { %v1117_v55 = vld [vmem:[%s1268_s7 + $0x42] sm:$0xff]  ;;  %v1096_v57 = vld [vmem:[%s1268_s7 + $0x2a] sm:$0xff]  ;;  %v1113_v61 = vld [vmem:[%s1268_s7 + $0x59] sm:$0x3f] }
  0x1d   : >> { %v1105_v58 = vld [vmem:[%s1268_s7 + $0x50] sm:$0xff]  ;;  %v503_v62 = vpack.c.bf16 %v1118_v56, %v1117_v55  ;;  %v380_v63 = vpack.c.bf16 %v1096_v57, %v1095_v54  ;;  %v1120_v3 = vld [vmem:[%s1268_s7 + $0x5a] sm:$0x3f]  ;;  %v1187_v43 = vld [vmem:[%s1439_s2] ss:$0 sm:$0xff] }
  0x1e   : >> { %v1112_v60 = vld [vmem:[%s1268_s7 + $0x51] sm:$0xff]  ;;  %v424_v0 = vpack.c.bf16 %v1106_v59, %v1105_v58  ;;  %v1098_v5 = vld [vmem:[%s1268_s7 + $0x3a] sm:$0x3f]  ;;  %vm1356_vm3 = vmand (%p174_p4), %vm202_vm0, %vm582_vm2 }
  0x1f   : >> { %v464_v1 = vpack.c.bf16 %v1113_v61, %v1112_v60  ;;  %v1119_v2 = vld [vmem:[%s1268_s7 + $0x52] sm:$0xff] }
  0x20   : >> { %v1097_v4 = vld [vmem:[%s1268_s7 + $0x32] sm:$0xff]  ;;  %v504_v6 = vpack.c.bf16 %v1120_v3, %v1119_v2 }
  0x21   : >> { %v381_v7 = vpack.c.bf16 %v1098_v5, %v1097_v4 }
  0x27   : >> { %1093 = vmatmul.msk.bf16.vlgmr.msrb.gmra.mxu0 %vm195_vm1, %v340_v38  ;;  %1075 = vmatmul.msk.bf16.vlgmr.msrb.gmra.mxu1 %vm195_vm1, %v184_v39 }
  0x28   : >> { %1079 = vmatmul.msk.bf16.gmra.mxu2 %vm195_vm1, %v258_v40  ;;  %1087 = vmatmul.msk.bf16.gmra.mxu3 %vm195_vm1, %v301_v41 }
  0x37   : >> { %1094 = vmatmul.msk.bf16.gmra.mxu0 %vm195_vm1, %v341_v50  ;;  %1076 = vmatmul.msk.bf16.gmra.mxu1 %vm195_vm1, %v185_v51 }
  0x38   : >> { %1108 = vmatmul.msk.bf16.vlgmr.msrb.gmra.mxu2 %vm195_vm1, %v423_v52  ;;  %1115 = vmatmul.msk.bf16.vlgmr.msrb.gmra.mxu3 %vm195_vm1, %v463_v53 }
  0x47   : >> { %1122 = vmatmul.msk.bf16.vlgmr.msra.gmra.mxu0 %vm195_vm1, %v503_v62  ;;  %1100 = vmatmul.msk.bf16.vlgmr.msra.gmra.mxu1 %vm195_vm1, %v380_v63 }
  0x48   : >> { %1109 = vmatmul.msk.bf16.gmra.mxu2 %vm195_vm1, %v424_v0  ;;  %1116 = vmatmul.msk.bf16.gmra.mxu3 %vm195_vm1, %v464_v1 }
  0x57   : >> { %1123 = vmatmul.msk.bf16.gmra.mxu0 %vm195_vm1, %v504_v6  ;;  %1101 = vmatmul.msk.bf16.gmra.mxu1 %vm195_vm1, %v381_v7 }
  0x94   : >> { %v215_v8 = vpop.f32.mrf.mxu0  ;;  %v220_v9 = vpop.f32.mrf.mxu1 }
  0x9b   : >> { %v279_v10 = vpop.f32.mrf.mxu2  ;;  %v322_v12 = vpop.f32.mrf.mxu3 }
  0x9c   : >> { %v217_v11 = vpop.f32.mrf.mxu0  ;;  %v222_v13 = vpop.f32.mrf.mxu1 }
  0xa3   : >> { %v281_v14 = vpop.f32.mrf.mxu2  ;;  %v324_v17 = vpop.f32.mrf.mxu3 }
  0xa4   : >> { %v362_v15 = vpop.f32.mrf.mxu0  ;;  %v243_v16 = vpop.f32.mrf.mxu1 }
  0xa5   : >> { %v244_v25 = vadd.f32 %v243_v16, %v215_v8 }
  0xa7   : >> { %v289_v27 = vadd.f32 %v279_v10, %v244_v25 }
  0xa9   : >> { %v332_v30 = vadd.f32 %v322_v12, %v289_v27 }
  0xab   : >> { %v284_v20 = vpop.f32.mrf.mxu2  ;;  %v327_v21 = vpop.f32.mrf.mxu3  ;;  %v372_v34 = vadd.f32 %v362_v15, %v332_v30 }
  0xac   : >> { %v364_v18 = vpop.f32.mrf.mxu0  ;;  %v245_v19 = vpop.f32.mrf.mxu1 }
  0xad   : >> { %v246_v31 = vadd.f32 %v245_v19, %v217_v11 }
  0xaf   : >> { %v290_v35 = vadd.f32 %v281_v14, %v246_v31 }
  0xb1   : >> { %v333_v39 = vadd.f32 %v324_v17, %v290_v35  ;;  %v584_v35 = vld [vmem:[%s1240_s21 + $0x4] sm:$0xf] (%p174_p4) }
  0xb3   : >> { %v286_v24 = vpop.f32.mrf.mxu2  ;;  %v329_v26 = vpop.f32.mrf.mxu3  ;;  %v373_v45 = vadd.f32 %v364_v18, %v333_v39 }
  0xb4   : >> { %v367_v22 = vpop.f32.mrf.mxu0  ;;  %v248_v23 = vpop.f32.mrf.mxu1 }
  0xb5   : >> { %v249_v40 = vadd.f32 %v248_v23, %v220_v9 }
  0xb7   : >> { %v291_v46 = vadd.f32 %v284_v20, %v249_v40 }
  0xb9   : >> { %v334_v53 = vadd.f32 %v327_v21, %v291_v46 }
  0xbb   : >> { %v445_v32 = vpop.f32.mrf.mxu2  ;;  %v485_v33 = vpop.f32.mrf.mxu3  ;;  %v374_v58 = vadd.f32 %v367_v22, %v334_v53  ;;  %v1125_v53 = vld [vmem:[%s1240_s21 + $0xc] sm:$0xf] (%p174_p4) }
  0xbc   : >> { %v369_v28 = vpop.f32.mrf.mxu0  ;;  %v250_v29 = vpop.f32.mrf.mxu1 }
  0xbd   : >> { %v251_v54 = vadd.f32 %v250_v29, %v222_v13 }
  0xbf   : >> { %v292_v59 = vadd.f32 %v286_v24, %v251_v54 }
  0xc1   : >> { %v335_v2 = vadd.f32 %v329_v26, %v292_v59 }
  0xc3   : >> { %v447_v44 = vpop.f32.mrf.mxu2  ;;  %v487_v48 = vpop.f32.mrf.mxu3  ;;  %v375_v7 = vadd.f32 %v369_v28, %v335_v2 }
  0xc4   : >> { %v402_v36 = vpop.f32.mrf.mxu1  ;;  %v525_v37 = vpop.f32.mrf.mxu0 }
  0xc5   : >> { %v412_v38 = vadd.f32 %v402_v36, %v372_v34 }
  0xc7   : >> { %v455_v41 = vadd.f32 %v445_v32, %v412_v38 }
  0xc9   : >> { %v495_v42 = vadd.f32 %v485_v33, %v455_v41 }
  0xcb   : >> { %v535_v47 = vadd.f32 %v525_v37, %v495_v42  ;;  %v450_v61 = vpop.f32.mrf.mxu2  ;;  %v490_v1 = vpop.f32.mrf.mxu3 }
  0xcc   : >> { %v404_v49 = vpop.f32.mrf.mxu1  ;;  %v527_v52 = vpop.f32.mrf.mxu0 }
  0xcd   : >> { %v543_v50 = vadd.f32 %v1187_v43, %v535_v47  ;;  %v413_v51 = vadd.f32 %v404_v49, %v373_v45 }
  0xcf   : >> { %v547_v55 = vmax.f32 %v543_v50, 0.0  ;;  %v456_v56 = vadd.f32 %v447_v44, %v413_v51 }
  0xd1   : >> { %553 = vst [vmem:[%s1345_s23] sm:$0xff] %v547_v55  ;;  %v496_v57 = vadd.f32 %v487_v48, %v456_v56 }
  0xd3   : >> { %v536_v60 = vadd.f32 %v527_v52, %v496_v57  ;;  %v452_v12 = vpop.f32.mrf.mxu2  ;;  %v492_v15 = vpop.f32.mrf.mxu3 }
  0xd4   : >> { %v407_v62 = vpop.f32.mrf.mxu1  ;;  %v530_v5 = vpop.f32.mrf.mxu0 }
  0xd5   : >> { %v544_v63 = vadd.f32 %v1187_v43, %v536_v60  ;;  %v414_v0 = vadd.f32 %v407_v62, %v374_v58 }
  0xd7   : >> { %v548_v3 = vmax.f32 %v544_v63, 0.0  ;;  %v457_v4 = vadd.f32 %v450_v61, %v414_v0 }
  0xd9   : >> { %554 = vst [vmem:[%s1345_s23 + $0x8] sm:$0xff] %v548_v3  ;;  %v497_v6 = vadd.f32 %v490_v1, %v457_v4 }
  0xdb   : >> { %v537_v8 = vadd.f32 %v530_v5, %v497_v6 }
  0xdc   : >> { %v409_v9 = vpop.f32.mrf.mxu1  ;;  %v532_v17 = vpop.f32.mrf.mxu0 }
  0xdd   : >> { %v545_v10 = vadd.f32 %v1187_v43, %v537_v8  ;;  %v415_v11 = vadd.f32 %v409_v9, %v375_v7  ;;  %v1128_v9 = vld [vmem:[%s1240_s21 + $0x14] sm:$0xf] (%p174_p4) }
  0xdf   : >> { %v549_v13 = vmax.f32 %v545_v10, 0.0  ;;  %v458_v14 = vadd.f32 %v452_v12, %v415_v11 }
  0xe1   : >> { %555 = vst [vmem:[%s1345_s23 + $0x10] sm:$0xff] %v549_v13  ;;  %v498_v16 = vadd.f32 %v492_v15, %v458_v14 }
  0xe3   : >> { %v538_v18 = vadd.f32 %v532_v17, %v498_v16 }
  0xe5   : >> { %v546_v19 = vadd.f32 %v1187_v43, %v538_v18  ;;  %176 = sbr.rel (!%p174_p4) target bundleno = 15 (0xf), region = 214 }
  0xe7   : >> { %v550_v20 = vmax.f32 %v546_v19, 0.0 }
  0xe9   : >> { %556 = vst [vmem:[%s1345_s23 + $0x18] sm:$0x3f] %v550_v20 }
  0xf0   : > { %v557_v21 = vld [vmem:[#allocation2] ss:$2 sm:$0xff]  ;;  %v561_v22 = vld [vmem:[#allocation2 + $0x1] ss:$2 sm:$0xff] }
  0xf1   : > { %v565_v23 = vld [vmem:[#allocation2 + $0x1e] ss:$2 sm:$0xff]  ;;  %v569_v24 = vld [vmem:[#allocation2 + $0x1f] ss:$2 sm:$0xff]  ;;  %v572_v25 = vmax.f32 %v557_v21, %v561_v22 }
  0xf2   : > { %v559_v26 = vld [vmem:[#allocation2 + $0x10] ss:$2 sm:$0x7f]  ;;  %v574_v27 = vmax.f32 %v565_v23, %v569_v24  ;;  %v563_v28 = vld [vmem:[#allocation2 + $0x11] ss:$2 sm:$0x7f] }
  0xf3   : > { %v567_v29 = vld [vmem:[#allocation2 + $0x2e] ss:$2 sm:$0x7f]  ;;  %v571_v30 = vld [vmem:[#allocation2 + $0x2f] ss:$2 sm:$0x7f]  ;;  %v573_v31 = vmax.f32 %v559_v26, %v563_v28 }
  0xf4   : > { %v576_v32 = vmax.f32 %v572_v25, %v574_v27  ;;  %v575_v33 = vmax.f32 %v567_v29, %v571_v30  ;;  %v588_v34 = vld [vmem:[#allocation2 + $0x3c] ss:$2 sm:$0xff]  ;;  %v592_v36 = vld [vmem:[#allocation2 + $0x3d] ss:$2 sm:$0xff] }
  0xf5   : > { %v596_v37 = vld [vmem:[#allocation2 + $0x5a] ss:$2 sm:$0xff]  ;;  %v600_v38 = vld [vmem:[#allocation2 + $0x5b] ss:$2 sm:$0xff]  ;;  %v603_v41 = vmax.f32 %v588_v34, %v592_v36 }
  0xf6   : > { %v578_v39 = vpack.c.bf16 %v576_v32, %v576_v32  ;;  %v577_v40 = vmax.f32 %v573_v31, %v575_v33  ;;  %v605_v42 = vmax.f32 %v596_v37, %v600_v38  ;;  %v590_v43 = vld [vmem:[#allocation2 + $0x4c] ss:$2 sm:$0x7f]  ;;  %v594_v44 = vld [vmem:[#allocation2 + $0x4d] ss:$2 sm:$0x7f] }
  0xf7   : > { %v598_v46 = vld [vmem:[#allocation2 + $0x6a] ss:$2 sm:$0x7f]  ;;  %v602_v47 = vld [vmem:[#allocation2 + $0x6b] ss:$2 sm:$0x7f]  ;;  %v604_v48 = vmax.f32 %v590_v43, %v594_v44 }
  0xf8   : > { %580 = vst [vmem:[%s1240_s21] sm:$0xf] %v578_v39  ;;  %v579_v49 = vpack.c.bf16 %v577_v40, %v577_v40  ;;  %v607_v50 = vmax.f32 %v603_v41, %v605_v42  ;;  %v606_v51 = vmax.f32 %v598_v46, %v602_v47  ;;  %v617_v52 = vld [vmem:[#allocation2 + $0x78] ss:$2 sm:$0xff]  ;;  %v621_v54 = vld [vmem:[#allocation2 + $0x79] ss:$2 sm:$0xff] }
  0xf9   : > { %v625_v55 = vld [vmem:[#allocation2 + $0x96] ss:$2 sm:$0xff]  ;;  %v629_v56 = vld [vmem:[#allocation2 + $0x97] ss:$2 sm:$0xff]  ;;  %v632_v60 = vmax.f32 %v617_v52, %v621_v54 }
  0xfa   : > { %v585_v57 = vsel %vm1356_vm3, %v579_v49, %v584_v35  ;;  %v609_v58 = vpack.c.bf16 %v607_v50, %v607_v50  ;;  %v608_v59 = vmax.f32 %v604_v48, %v606_v51  ;;  %v619_v61 = vld [vmem:[#allocation2 + $0x88] ss:$2 sm:$0x7f]  ;;  %v623_v62 = vld [vmem:[#allocation2 + $0x89] ss:$2 sm:$0x7f]  ;;  %v634_v63 = vmax.f32 %v625_v55, %v629_v56 }
  0xfb   : > { %586 = vst [vmem:[%s1240_s21 + $0x4] sm:$0xf] %v585_v57  ;;  %v627_v0 = vld [vmem:[#allocation2 + $0xa6] ss:$2 sm:$0x7f]  ;;  %v633_v1 = vmax.f32 %v619_v61, %v623_v62 }
  0xfc   : > { %1124 = vst [vmem:[%s1240_s21 + $0x8] sm:$0xf] %v609_v58  ;;  %v610_v2 = vpack.c.bf16 %v608_v59, %v608_v59  ;;  %v631_v3 = vld [vmem:[#allocation2 + $0xa7] ss:$2 sm:$0x7f]  ;;  %v636_v4 = vmax.f32 %v632_v60, %v634_v63 }
  0xfd   : > { %v635_v5 = vmax.f32 %v627_v0, %v631_v3  ;;  %v646_v6 = vld [vmem:[#allocation2 + $0xb4] ss:$2 sm:$0xff]  ;;  %v650_v7 = vld [vmem:[#allocation2 + $0xb5] ss:$2 sm:$0xff]  ;;  %v1134_v48 = vld [vmem:[%s1240_s21 + $0x24] sm:$0xf] }
  0xfe   : > { %v614_v8 = vsel %vm1356_vm3, %v610_v2, %v1125_v53  ;;  %v654_v10 = vld [vmem:[#allocation2 + $0xd2] ss:$2 sm:$0xff]  ;;  %v658_v11 = vld [vmem:[#allocation2 + $0xd3] ss:$2 sm:$0xff]  ;;  %v661_v12 = vmax.f32 %v646_v6, %v650_v7  ;;  %v638_v13 = vpack.c.bf16 %v636_v4, %v636_v4  ;;  %v1137_v2 = vld [vmem:[%s1240_s21 + $0x2c] sm:$0xf] }
  0xff   : > { %1126 = vst [vmem:[%s1240_s21 + $0xc] sm:$0xf] %v614_v8  ;;  %v637_v14 = vmax.f32 %v633_v1, %v635_v5  ;;  %v663_v15 = vmax.f32 %v654_v10, %v658_v11  ;;  %v648_v16 = vld [vmem:[#allocation2 + $0xc4] ss:$2 sm:$0x7f] }
 0x100   : > { %v652_v17 = vld [vmem:[#allocation2 + $0xc5] ss:$2 sm:$0x7f]  ;;  %v656_v18 = vld [vmem:[#allocation2 + $0xe2] ss:$2 sm:$0x7f] }
 0x101   : > { %1127 = vst [vmem:[%s1240_s21 + $0x10] sm:$0xf] %v638_v13  ;;  %v639_v19 = vpack.c.bf16 %v637_v14, %v637_v14  ;;  %v665_v20 = vmax.f32 %v661_v12, %v663_v15  ;;  %v660_v21 = vld [vmem:[#allocation2 + $0xe3] ss:$2 sm:$0x7f]  ;;  %v662_v22 = vmax.f32 %v648_v16, %v652_v17 }
 0x102   : > { %v664_v23 = vmax.f32 %v656_v18, %v660_v21  ;;  %v675_v24 = vld [vmem:[#allocation2 + $0xf0] ss:$2 sm:$0xff]  ;;  %v679_v25 = vld [vmem:[#allocation2 + $0xf1] ss:$2 sm:$0xff] }
 0x103   : > { %v683_v26 = vld [vmem:[#allocation2 + $0x10e] ss:$2 sm:$0xff]  ;;  %v643_v27 = vsel %vm1356_vm3, %v639_v19, %v1128_v9  ;;  %v667_v28 = vpack.c.bf16 %v665_v20, %v665_v20  ;;  %v687_v30 = vld [vmem:[#allocation2 + $0x10f] ss:$2 sm:$0xff]  ;;  %v690_v31 = vmax.f32 %v675_v24, %v679_v25 }
 0x104   : > { %v1131_v29 = vld [vmem:[%s1240_s21 + $0x1c] sm:$0xf]  ;;  %v677_v32 = vld [vmem:[#allocation2 + $0x100] ss:$2 sm:$0x7f]  ;;  %v666_v33 = vmax.f32 %v662_v22, %v664_v23  ;;  %v692_v34 = vmax.f32 %v683_v26, %v687_v30 }
 0x105   : > { %1129 = vst [vmem:[%s1240_s21 + $0x14] sm:$0xf] %v643_v27  ;;  %v681_v35 = vld [vmem:[#allocation2 + $0x101] ss:$2 sm:$0x7f] }
 0x106   : > { %1130 = vst [vmem:[%s1240_s21 + $0x18] sm:$0xf] %v667_v28  ;;  %v685_v36 = vld [vmem:[#allocation2 + $0x11e] ss:$2 sm:$0x7f]  ;;  %v691_v37 = vmax.f32 %v677_v32, %v681_v35  ;;  %v668_v38 = vpack.c.bf16 %v666_v33, %v666_v33  ;;  %v694_v39 = vmax.f32 %v690_v31, %v692_v34 }
 0x107   : > { %v689_v40 = vld [vmem:[#allocation2 + $0x11f] ss:$2 sm:$0x7f]  ;;  %v704_v42 = vld [vmem:[#allocation2 + $0x12c] ss:$2 sm:$0xff] }
 0x108   : > { %v693_v41 = vmax.f32 %v685_v36, %v689_v40  ;;  %v708_v43 = vld [vmem:[#allocation2 + $0x12d] ss:$2 sm:$0xff]  ;;  %v712_v44 = vld [vmem:[#allocation2 + $0x14a] ss:$2 sm:$0xff]  ;;  %v672_v46 = vsel %vm1356_vm3, %v668_v38, %v1131_v29  ;;  %v696_v47 = vpack.c.bf16 %v694_v39, %v694_v39  ;;  %v1143_v38 = vld [vmem:[%s1240_s21 + $0x3c] sm:$0xf] }
 0x109   : > { %v716_v49 = vld [vmem:[#allocation2 + $0x14b] ss:$2 sm:$0xff]  ;;  %v719_v50 = vmax.f32 %v704_v42, %v708_v43  ;;  %v706_v51 = vld [vmem:[#allocation2 + $0x13c] ss:$2 sm:$0x7f] }
 0x10a   : > { %1132 = vst [vmem:[%s1240_s21 + $0x1c] sm:$0xf] %v672_v46  ;;  %v695_v52 = vmax.f32 %v691_v37, %v693_v41  ;;  %v721_v53 = vmax.f32 %v712_v44, %v716_v49  ;;  %v710_v54 = vld [vmem:[#allocation2 + $0x13d] ss:$2 sm:$0x7f] }
 0x10b   : > { %1133 = vst [vmem:[%s1240_s21 + $0x20] sm:$0xf] %v696_v47  ;;  %v714_v55 = vld [vmem:[#allocation2 + $0x15a] ss:$2 sm:$0x7f]  ;;  %v720_v56 = vmax.f32 %v706_v51, %v710_v54 }
 0x10c   : > { %v697_v57 = vpack.c.bf16 %v695_v52, %v695_v52  ;;  %v723_v58 = vmax.f32 %v719_v50, %v721_v53  ;;  %v718_v59 = vld [vmem:[#allocation2 + $0x15b] ss:$2 sm:$0x7f]  ;;  %v733_v61 = vld [vmem:[#allocation2 + $0x168] ss:$2 sm:$0xff] }
 0x10d   : > { %v722_v60 = vmax.f32 %v714_v55, %v718_v59  ;;  %v737_v62 = vld [vmem:[#allocation2 + $0x169] ss:$2 sm:$0xff]  ;;  %v741_v63 = vld [vmem:[#allocation2 + $0x186] ss:$2 sm:$0xff] }
 0x10e   : > { %v701_v0 = vsel %vm1356_vm3, %v697_v57, %v1134_v48  ;;  %v725_v1 = vpack.c.bf16 %v723_v58, %v723_v58  ;;  %v745_v3 = vld [vmem:[#allocation2 + $0x187] ss:$2 sm:$0xff]  ;;  %v748_v4 = vmax.f32 %v733_v61, %v737_v62  ;;  %v735_v5 = vld [vmem:[#allocation2 + $0x178] ss:$2 sm:$0x7f] }
 0x10f   : > { %1135 = vst [vmem:[%s1240_s21 + $0x24] sm:$0xf] %v701_v0  ;;  %v724_v6 = vmax.f32 %v720_v56, %v722_v60  ;;  %v750_v7 = vmax.f32 %v741_v63, %v745_v3  ;;  %v739_v8 = vld [vmem:[#allocation2 + $0x179] ss:$2 sm:$0x7f] }
 0x110   : > { %1136 = vst [vmem:[%s1240_s21 + $0x28] sm:$0xf] %v725_v1  ;;  %v743_v9 = vld [vmem:[#allocation2 + $0x196] ss:$2 sm:$0x7f]  ;;  %v749_v10 = vmax.f32 %v735_v5, %v739_v8 }
 0x111   : > { %v726_v11 = vpack.c.bf16 %v724_v6, %v724_v6  ;;  %v752_v12 = vmax.f32 %v748_v4, %v750_v7  ;;  %v747_v13 = vld [vmem:[#allocation2 + $0x197] ss:$2 sm:$0x7f]  ;;  %v762_v15 = vld [vmem:[#allocation2 + $0x1a4] ss:$2 sm:$0xff] }
 0x112   : > { %v751_v14 = vmax.f32 %v743_v9, %v747_v13  ;;  %v766_v16 = vld [vmem:[#allocation2 + $0x1a5] ss:$2 sm:$0xff]  ;;  %v770_v17 = vld [vmem:[#allocation2 + $0x1c2] ss:$2 sm:$0xff]  ;;  %v1140_v20 = vld [vmem:[%s1240_s21 + $0x34] sm:$0xf] }
 0x113   : > { %v730_v18 = vsel %vm1356_vm3, %v726_v11, %v1137_v2  ;;  %v754_v19 = vpack.c.bf16 %v752_v12, %v752_v12  ;;  %v774_v21 = vld [vmem:[#allocation2 + $0x1c3] ss:$2 sm:$0xff]  ;;  %v777_v22 = vmax.f32 %v762_v15, %v766_v16  ;;  %v764_v23 = vld [vmem:[#allocation2 + $0x1b4] ss:$2 sm:$0x7f] }
 0x114   : > { %1138 = vst [vmem:[%s1240_s21 + $0x2c] sm:$0xf] %v730_v18  ;;  %v753_v24 = vmax.f32 %v749_v10, %v751_v14  ;;  %v779_v25 = vmax.f32 %v770_v17, %v774_v21  ;;  %v768_v26 = vld [vmem:[#allocation2 + $0x1b5] ss:$2 sm:$0x7f] }
 0x115   : > { %1139 = vst [vmem:[%s1240_s21 + $0x30] sm:$0xf] %v754_v19  ;;  %v772_v27 = vld [vmem:[#allocation2 + $0x1d2] ss:$2 sm:$0x7f]  ;;  %v778_v28 = vmax.f32 %v764_v23, %v768_v26 }
 0x116   : > { %v755_v29 = vpack.c.bf16 %v753_v24, %v753_v24  ;;  %v781_v30 = vmax.f32 %v777_v22, %v779_v25  ;;  %v776_v31 = vld [vmem:[#allocation2 + $0x1d3] ss:$2 sm:$0x7f]  ;;  %v791_v33 = vld [vmem:[#allocation2 + $0x1e0] ss:$2 sm:$0xff] }
 0x117   : > { %v780_v32 = vmax.f32 %v772_v27, %v776_v31  ;;  %v795_v34 = vld [vmem:[#allocation2 + $0x1e1] ss:$2 sm:$0xff]  ;;  %v799_v35 = vld [vmem:[#allocation2 + $0x1fe] ss:$2 sm:$0xff] }
 0x118   : > { %v759_v36 = vsel %vm1356_vm3, %v755_v29, %v1140_v20  ;;  %v783_v37 = vpack.c.bf16 %v781_v30, %v781_v30  ;;  %v803_v39 = vld [vmem:[#allocation2 + $0x1ff] ss:$2 sm:$0xff]  ;;  %v806_v40 = vmax.f32 %v791_v33, %v795_v34  ;;  %v793_v41 = vld [vmem:[#allocation2 + $0x1f0] ss:$2 sm:$0x7f] }
 0x119   : > { %1141 = vst [vmem:[%s1240_s21 + $0x34] sm:$0xf] %v759_v36  ;;  %v782_v42 = vmax.f32 %v778_v28, %v780_v32  ;;  %v808_v43 = vmax.f32 %v799_v35, %v803_v39  ;;  %v797_v44 = vld [vmem:[#allocation2 + $0x1f1] ss:$2 sm:$0x7f] }
 0x11a   : > { %1142 = vst [vmem:[%s1240_s21 + $0x38] sm:$0xf] %v783_v37  ;;  %v801_v46 = vld [vmem:[#allocation2 + $0x20e] ss:$2 sm:$0x7f]  ;;  %v807_v47 = vmax.f32 %v793_v41, %v797_v44 }
 0x11b   : > { %v784_v48 = vpack.c.bf16 %v782_v42, %v782_v42  ;;  %v810_v49 = vmax.f32 %v806_v40, %v808_v43  ;;  %v805_v50 = vld [vmem:[#allocation2 + $0x20f] ss:$2 sm:$0x7f]  ;;  %v820_v52 = vld [vmem:[#allocation2 + $0x21c] ss:$2 sm:$0xff] }
 0x11c   : > { %v809_v51 = vmax.f32 %v801_v46, %v805_v50  ;;  %v824_v53 = vld [vmem:[#allocation2 + $0x21d] ss:$2 sm:$0xff]  ;;  %v828_v54 = vld [vmem:[#allocation2 + $0x23a] ss:$2 sm:$0xff]  ;;  %v1149_v11 = vld [vmem:[%s1240_s21 + $0x4c] sm:$0xf] }
 0x11d   : > { %v788_v55 = vsel %vm1356_vm3, %v784_v48, %v1143_v38  ;;  %v812_v56 = vpack.c.bf16 %v810_v49, %v810_v49  ;;  %v1146_v57 = vld [vmem:[%s1240_s21 + $0x44] sm:$0xf]  ;;  %v835_v59 = vmax.f32 %v820_v52, %v824_v53  ;;  %v822_v60 = vld [vmem:[#allocation2 + $0x22c] ss:$2 sm:$0x7f] }
 0x11e   : > { %v832_v58 = vld [vmem:[#allocation2 + $0x23b] ss:$2 sm:$0xff]  ;;  %1144 = vst [vmem:[%s1240_s21 + $0x3c] sm:$0xf] %v788_v55  ;;  %v811_v61 = vmax.f32 %v807_v47, %v809_v51  ;;  %v849_v6 = vld [vmem:[#allocation2 + $0x258] ss:$2 sm:$0xff] }
 0x11f   : > { %v837_v62 = vmax.f32 %v828_v54, %v832_v58  ;;  %v826_v63 = vld [vmem:[#allocation2 + $0x22d] ss:$2 sm:$0x7f]  ;;  %1145 = vst [vmem:[%s1240_s21 + $0x40] sm:$0xf] %v812_v56 }
 0x120   : > { %v830_v0 = vld [vmem:[#allocation2 + $0x24a] ss:$2 sm:$0x7f]  ;;  %v836_v1 = vmax.f32 %v822_v60, %v826_v63  ;;  %v813_v2 = vpack.c.bf16 %v811_v61, %v811_v61  ;;  %v834_v4 = vld [vmem:[#allocation2 + $0x24b] ss:$2 sm:$0x7f] }
 0x121   : > { %v839_v3 = vmax.f32 %v835_v59, %v837_v62  ;;  %v838_v5 = vmax.f32 %v830_v0, %v834_v4  ;;  %v853_v7 = vld [vmem:[#allocation2 + $0x259] ss:$2 sm:$0xff]  ;;  %v857_v8 = vld [vmem:[#allocation2 + $0x276] ss:$2 sm:$0xff] }
 0x122   : > { %v817_v9 = vsel %vm1356_vm3, %v813_v2, %v1146_v57  ;;  %v861_v12 = vld [vmem:[#allocation2 + $0x277] ss:$2 sm:$0xff]  ;;  %v864_v13 = vmax.f32 %v849_v6, %v853_v7  ;;  %v851_v14 = vld [vmem:[#allocation2 + $0x268] ss:$2 sm:$0x7f] }
 0x123   : > { %v841_v10 = vpack.c.bf16 %v839_v3, %v839_v3  ;;  %1147 = vst [vmem:[%s1240_s21 + $0x44] sm:$0xf] %v817_v9  ;;  %v840_v15 = vmax.f32 %v836_v1, %v838_v5  ;;  %v866_v16 = vmax.f32 %v857_v8, %v861_v12  ;;  %v855_v17 = vld [vmem:[#allocation2 + $0x269] ss:$2 sm:$0x7f] }
 0x124   : > { %v859_v18 = vld [vmem:[#allocation2 + $0x286] ss:$2 sm:$0x7f]  ;;  %v865_v19 = vmax.f32 %v851_v14, %v855_v17  ;;  %v863_v22 = vld [vmem:[#allocation2 + $0x287] ss:$2 sm:$0x7f] }
 0x125   : > { %1148 = vst [vmem:[%s1240_s21 + $0x48] sm:$0xf] %v841_v10  ;;  %v842_v20 = vpack.c.bf16 %v840_v15, %v840_v15  ;;  %v868_v21 = vmax.f32 %v864_v13, %v866_v16  ;;  %v867_v23 = vmax.f32 %v859_v18, %v863_v22  ;;  %v878_v24 = vld [vmem:[#allocation2 + $0x294] ss:$2 sm:$0xff]  ;;  %v882_v25 = vld [vmem:[#allocation2 + $0x295] ss:$2 sm:$0xff] }
 0x126   : > { %v886_v26 = vld [vmem:[#allocation2 + $0x2b2] ss:$2 sm:$0xff]  ;;  %v890_v30 = vld [vmem:[#allocation2 + $0x2b3] ss:$2 sm:$0xff]  ;;  %v893_v31 = vmax.f32 %v878_v24, %v882_v25  ;;  %v1158_v2 = vld [vmem:[%s1240_s21 + $0x64] sm:$0xf] }
 0x127   : > { %v846_v27 = vsel %vm1356_vm3, %v842_v20, %v1149_v11  ;;  %v870_v28 = vpack.c.bf16 %v868_v21, %v868_v21  ;;  %v1152_v29 = vld [vmem:[%s1240_s21 + $0x54] sm:$0xf]  ;;  %v880_v32 = vld [vmem:[#allocation2 + $0x2a4] ss:$2 sm:$0x7f]  ;;  %v869_v33 = vmax.f32 %v865_v19, %v867_v23  ;;  %v895_v34 = vmax.f32 %v886_v26, %v890_v30 }
 0x128   : > { %1150 = vst [vmem:[%s1240_s21 + $0x4c] sm:$0xf] %v846_v27  ;;  %v884_v35 = vld [vmem:[#allocation2 + $0x2a5] ss:$2 sm:$0x7f] }
 0x129   : > { %1151 = vst [vmem:[%s1240_s21 + $0x50] sm:$0xf] %v870_v28  ;;  %v888_v36 = vld [vmem:[#allocation2 + $0x2c2] ss:$2 sm:$0x7f]  ;;  %v894_v37 = vmax.f32 %v880_v32, %v884_v35  ;;  %v871_v38 = vpack.c.bf16 %v869_v33, %v869_v33  ;;  %v897_v39 = vmax.f32 %v893_v31, %v895_v34 }
 0x12a   : > { %v892_v40 = vld [vmem:[#allocation2 + $0x2c3] ss:$2 sm:$0x7f]  ;;  %v907_v42 = vld [vmem:[#allocation2 + $0x2d0] ss:$2 sm:$0xff] }
 0x12b   : > { %v896_v41 = vmax.f32 %v888_v36, %v892_v40  ;;  %v911_v43 = vld [vmem:[#allocation2 + $0x2d1] ss:$2 sm:$0xff]  ;;  %v915_v44 = vld [vmem:[#allocation2 + $0x2ee] ss:$2 sm:$0xff]  ;;  %v875_v46 = vsel %vm1356_vm3, %v871_v38, %v1152_v29  ;;  %v899_v47 = vpack.c.bf16 %v897_v39, %v897_v39 }
 0x12c   : > { %v1155_v48 = vld [vmem:[%s1240_s21 + $0x5c] sm:$0xf]  ;;  %v922_v50 = vmax.f32 %v907_v42, %v911_v43  ;;  %v909_v51 = vld [vmem:[#allocation2 + $0x2e0] ss:$2 sm:$0x7f] }
 0x12d   : > { %v919_v49 = vld [vmem:[#allocation2 + $0x2ef] ss:$2 sm:$0xff]  ;;  %1153 = vst [vmem:[%s1240_s21 + $0x54] sm:$0xf] %v875_v46  ;;  %v898_v52 = vmax.f32 %v894_v37, %v896_v41  ;;  %v936_v61 = vld [vmem:[#allocation2 + $0x30c] ss:$2 sm:$0xff] }
 0x12e   : > { %v924_v53 = vmax.f32 %v915_v44, %v919_v49  ;;  %v913_v54 = vld [vmem:[#allocation2 + $0x2e1] ss:$2 sm:$0x7f]  ;;  %1154 = vst [vmem:[%s1240_s21 + $0x58] sm:$0xf] %v899_v47 }
 0x12f   : > { %v917_v55 = vld [vmem:[#allocation2 + $0x2fe] ss:$2 sm:$0x7f]  ;;  %v923_v56 = vmax.f32 %v909_v51, %v913_v54  ;;  %v900_v57 = vpack.c.bf16 %v898_v52, %v898_v52  ;;  %v921_v59 = vld [vmem:[#allocation2 + $0x2ff] ss:$2 sm:$0x7f] }
 0x130   : > { %v926_v58 = vmax.f32 %v922_v50, %v924_v53  ;;  %v925_v60 = vmax.f32 %v917_v55, %v921_v59  ;;  %v940_v62 = vld [vmem:[#allocation2 + $0x30d] ss:$2 sm:$0xff]  ;;  %v944_v63 = vld [vmem:[#allocation2 + $0x32a] ss:$2 sm:$0xff] }
 0x131   : > { %v904_v0 = vsel %vm1356_vm3, %v900_v57, %v1155_v48  ;;  %v948_v3 = vld [vmem:[#allocation2 + $0x32b] ss:$2 sm:$0xff]  ;;  %v951_v4 = vmax.f32 %v936_v61, %v940_v62  ;;  %v938_v5 = vld [vmem:[#allocation2 + $0x31c] ss:$2 sm:$0x7f] }
 0x132   : > { %v928_v1 = vpack.c.bf16 %v926_v58, %v926_v58  ;;  %1156 = vst [vmem:[%s1240_s21 + $0x5c] sm:$0xf] %v904_v0  ;;  %v927_v6 = vmax.f32 %v923_v56, %v925_v60  ;;  %v953_v7 = vmax.f32 %v944_v63, %v948_v3  ;;  %v942_v8 = vld [vmem:[#allocation2 + $0x31d] ss:$2 sm:$0x7f] }
 0x133   : > { %v946_v9 = vld [vmem:[#allocation2 + $0x33a] ss:$2 sm:$0x7f]  ;;  %v952_v10 = vmax.f32 %v938_v5, %v942_v8  ;;  %v950_v13 = vld [vmem:[#allocation2 + $0x33b] ss:$2 sm:$0x7f] }
 0x134   : > { %1157 = vst [vmem:[%s1240_s21 + $0x60] sm:$0xf] %v928_v1  ;;  %v929_v11 = vpack.c.bf16 %v927_v6, %v927_v6  ;;  %v955_v12 = vmax.f32 %v951_v4, %v953_v7  ;;  %v954_v14 = vmax.f32 %v946_v9, %v950_v13  ;;  %v965_v15 = vld [vmem:[#allocation2 + $0x348] ss:$2 sm:$0xff]  ;;  %v969_v16 = vld [vmem:[#allocation2 + $0x349] ss:$2 sm:$0xff] }
 0x135   : > { %v973_v17 = vld [vmem:[#allocation2 + $0x366] ss:$2 sm:$0xff]  ;;  %v977_v21 = vld [vmem:[#allocation2 + $0x367] ss:$2 sm:$0xff]  ;;  %v980_v22 = vmax.f32 %v965_v15, %v969_v16 }
 0x136   : > { %v933_v18 = vsel %vm1356_vm3, %v929_v11, %v1158_v2  ;;  %v957_v19 = vpack.c.bf16 %v955_v12, %v955_v12  ;;  %v1161_v20 = vld [vmem:[%s1240_s21 + $0x6c] sm:$0xf]  ;;  %v967_v23 = vld [vmem:[#allocation2 + $0x358] ss:$2 sm:$0x7f]  ;;  %v956_v24 = vmax.f32 %v952_v10, %v954_v14  ;;  %v982_v25 = vmax.f32 %v973_v17, %v977_v21 }
 0x137   : > { %1159 = vst [vmem:[%s1240_s21 + $0x64] sm:$0xf] %v933_v18  ;;  %v971_v26 = vld [vmem:[#allocation2 + $0x359] ss:$2 sm:$0x7f] }
 0x138   : > { %1160 = vst [vmem:[%s1240_s21 + $0x68] sm:$0xf] %v957_v19  ;;  %v975_v27 = vld [vmem:[#allocation2 + $0x376] ss:$2 sm:$0x7f]  ;;  %v981_v28 = vmax.f32 %v967_v23, %v971_v26  ;;  %v958_v29 = vpack.c.bf16 %v956_v24, %v956_v24  ;;  %v984_v30 = vmax.f32 %v980_v22, %v982_v25 }
 0x139   : > { %v979_v31 = vld [vmem:[#allocation2 + $0x377] ss:$2 sm:$0x7f] }
 0x13a   : > { %v983_v32 = vmax.f32 %v975_v27, %v979_v31  ;;  %v962_v33 = vsel %vm1356_vm3, %v958_v29, %v1161_v20  ;;  %v986_v34 = vpack.c.bf16 %v984_v30, %v984_v30  ;;  %v1164_v36 = vld [vmem:[%s1240_s21 + $0x74] sm:$0xf] }
 0x13b   : > { %1162 = vst [vmem:[%s1240_s21 + $0x6c] sm:$0xf] %v962_v33 }
 0x13c   : > { %v985_v35 = vmax.f32 %v981_v28, %v983_v32  ;;  %1163 = vst [vmem:[%s1240_s21 + $0x70] sm:$0xf] %v986_v34 }
 0x13e   : > { %v987_v37 = vpack.c.bf16 %v985_v35, %v985_v35 }
 0x140   : > { %v991_v38 = vsel %vm1356_vm3, %v987_v37, %v1164_v36 }
 0x141   : > { %1165 = vst [vmem:[%s1240_s21 + $0x74] sm:$0xf] %v991_v38 }
 0x142 PF: > { %s13_s12 = sadd.s32 1, %s1198_s12  }
 0x143   : > { %p10_p5 = scmp.ge.s32.totalorder %s13_s12, 4  }
 0x145   :  { %12 = sbr.rel (!%p10_p5) target bundleno = 1 (0x1), region = 225 }

// kernel: small_convnet_forward.4
= control target key start
LH: loop header
LB: loop body
LE: loop exit
PB: predicated region body
PF: predicated region fallthrough
CT: control target
= control target key end

     0   :  { %s1751_s12 = smov 0   ;;  %s2027_s0 = inlined_call_operand.vmem [shape: bf16[2,15,15,128], index: 0, kind: input, shape index: {}]   ;;  %s2028_s1 = inlined_call_operand.vmem [shape: bf16[3,3,128,128], index: 1, kind: input, shape index: {}]   ;;  %s2029_s2 = inlined_call_operand.vmem [shape: f32[1,128], index: 2, kind: input, shape index: {}]   ;;  %s2030_s3 = inlined_call_operand.vmem [shape: bf16[2,6,6,128], index: 3, kind: output, shape index: {}]  }
   0x1 LB: > { %s1151_s13 = sadd.s32 4294967295, %s1725_s12   ;;  %p1155_p0 = scmp.ge.s32.totalorder %s1725_s12, 1  ;;  %s1725_s12 = sphi %s1751_s12, %s13_s12  }
   0x2   : > { %p137_p1 = scmp.lt.s32.totalorder %s1725_s12, 3 }
   0x4   : > { %p138_p2 = pnand %p1155_p0, %p137_p1 }
   0x5   : > { %p161_p3 = scmp.lt.s32.totalorder (!%p138_p2), %s1151_s13, 1  ;;  %s1769_s22 = smov (!%p138_p2), 0  }
   0x6   : > { %141 = sbr.rel (%p138_p2) target bundleno = 280 (0x118), region = 32 }
   0xb   : > { %s2032_s13 = smov (!%p161_p3, %s1151_s13), 1 }
   0xc   : > { %s1696_s14 = smul.u32 120, %s2032_s13 }
   0xd   : > { %s1697_s15 = smul.u32 24, %s2032_s13 }
   0xe   : > { %s1762_s18 = scalar_lea.vmem %s2027_s0, %s1696_s14 }
   0xf   : > { %s1767_s21 = scalar_lea.vmem %s2030_s3, %s1697_s15 }
  0x10 LB: >> { %v1634_v0 = vld [vmem:[%s2028_s1 + $0x78] sm:$0xff]  ;;  %v1633_v4 = vld [vmem:[%s2028_s1 + $0x70] sm:$0xff]  ;;  %v1632_v8 = vld [vmem:[%s2028_s1 + $0x68] sm:$0xff]  ;;  %s1617_s28 = sshll.u32 %s1729_s22, 3  ;;  %s995_s10 = smul.u32 13, %s1729_s22  ;;  %s1729_s22 = sphi %s1769_s22, %s176_s22  }
  0x11   : >> { %v1643_v1 = vld [vmem:[%s2028_s1 + $0xb8] sm:$0xff]  ;;  %276 = vmatpush.bf16.msra.mxu0 %v1634_v0  ;;  %v1642_v5 = vld [vmem:[%s2028_s1 + $0xb0] sm:$0xff]  ;;  %v1641_v9 = vld [vmem:[%s2028_s1 + $0xa8] sm:$0xff]  ;;  %s1824_s6 = scalar_lea.vmem %s1762_s18, %s1617_s28  ;;  %s176_s22 = sadd.s32 1, %s1729_s22  }
  0x12   : >> { %v1626_v2 = vld [vmem:[%s2028_s1 + $0x38] sm:$0xff]  ;;  %427 = vmatpush.bf16.msra.mxu2 %v1643_v1  ;;  %v1625_v6 = vld [vmem:[%s2028_s1 + $0x30] sm:$0xff]  ;;  %v1624_v10 = vld [vmem:[%s2028_s1 + $0x28] sm:$0xff]  ;;  %s996_s11 = scalar_lea.vmem [#allocation2], %s995_s10  ;;  %p173_p4 = scmp.ge.s32.totalorder %s176_s22, 13  }
  0x13   : >> { %v1652_v3 = vld [vmem:[%s2028_s1 + $0xf8] sm:$0xff]  ;;  %339 = vmatpush.bf16.msra.mxu1 %v1626_v2  ;;  %v1651_v7 = vld [vmem:[%s2028_s1 + $0xf0] sm:$0xff]  ;;  %v1650_v11 = vld [vmem:[%s2028_s1 + $0xe8] sm:$0xff] }
  0x14   : >> { %520 = vmatpush.bf16.msra.mxu3 %v1652_v3  ;;  %v1631_v12 = vld [vmem:[%s2028_s1 + $0x60] sm:$0xff]  ;;  %v1630_v16 = vld [vmem:[%s2028_s1 + $0x58] sm:$0xff]  ;;  %v1629_v22 = vld [vmem:[%s2028_s1 + $0x50] sm:$0xff] }
  0x15   : >> { %277 = vmatpush.bf16.msra.mxu0 %v1633_v4  ;;  %v1640_v13 = vld [vmem:[%s2028_s1 + $0xa0] sm:$0xff]  ;;  %v1639_v17 = vld [vmem:[%s2028_s1 + $0x98] sm:$0xff]  ;;  %v1638_v23 = vld [vmem:[%s2028_s1 + $0x90] sm:$0xff] }
  0x16   : >> { %428 = vmatpush.bf16.msra.mxu2 %v1642_v5  ;;  %v1623_v14 = vld [vmem:[%s2028_s1 + $0x20] sm:$0xff]  ;;  %v1622_v18 = vld [vmem:[%s2028_s1 + $0x18] sm:$0xff]  ;;  %v1621_v25 = vld [vmem:[%s2028_s1 + $0x10] sm:$0xff] }
  0x17   : >> { %340 = vmatpush.bf16.msra.mxu1 %v1625_v6  ;;  %v1649_v15 = vld [vmem:[%s2028_s1 + $0xe0] sm:$0xff]  ;;  %v1648_v19 = vld [vmem:[%s2028_s1 + $0xd8] sm:$0xff]  ;;  %v1647_v26 = vld [vmem:[%s2028_s1 + $0xd0] sm:$0xff] }
  0x18   : >> { %521 = vmatpush.bf16.msra.mxu3 %v1651_v7  ;;  %v1178_v20 = vld [vmem:[%s1824_s6] sm:$0xf]  ;;  %v1618_v21 = vld [vmem:[%s1824_s6] sm:$0x70]  ;;  %v1628_v27 = vld [vmem:[%s2028_s1 + $0x48] sm:$0xff] }
  0x19   : >> { %278 = vmatpush.bf16.msra.mxu0 %v1632_v8  ;;  %v1179_v24 = vor.u32 %v1618_v21, %v1178_v20  ;;  %v1637_v28 = vld [vmem:[%s2028_s1 + $0x88] sm:$0xff]  ;;  %v1262_v32 = vld [vmem:[%s1824_s6] sm:$0xe]  ;;  %v1635_v33 = vld [vmem:[%s1824_s6] sm:$0xf0] }
  0x1a   : >> { %429 = vmatpush.bf16.msra.mxu2 %v1641_v9  ;;  %v1620_v29 = vld [vmem:[%s2028_s1 + $0x8] sm:$0xff]  ;;  %v1627_v34 = vld [vmem:[%s2028_s1 + $0x40] sm:$0xff]  ;;  %v1263_v38 = vor.u32 %v1635_v33, %v1262_v32  ;;  %v1660_v39 = vld [vmem:[%s2028_s1 + $0x138] sm:$0xff] }
  0x1b   : >> { %341 = vmatpush.bf16.msra.mxu1 %v1624_v10  ;;  %v223_v30 = vshll.u32 %v1179_v24, 16  ;;  %v1646_v31 = vld [vmem:[%s2028_s1 + $0xc8] sm:$0xff]  ;;  %v1636_v35 = vld [vmem:[%s2028_s1 + $0x80] sm:$0xff]  ;;  %v221_v36 = vshrl.u32 %v1179_v24, 16  ;;  %v1678_v40 = vld [vmem:[%s2028_s1 + $0x1b8] sm:$0xff] }
  0x1c   : >> { %522 = vmatpush.bf16.msra.mxu3 %v1650_v11  ;;  %v1619_v41 = vld [vmem:[%s2028_s1] sm:$0xff]  ;;  %v1669_v43 = vld [vmem:[%s2028_s1 + $0x178] sm:$0xff]  ;;  %v1317_v45 = vld [vmem:[%s1824_s6 + $0x8] sm:$0xf]  ;;  %v377_v48 = vrot.slane %v1263_v38, 1 }
  0x1d   : >> { %279 = vmatpush.bf16.msra.mxu0 %v1631_v12  ;;  %v225_v37 = vrot.slane %v223_v30, 1  ;;  %v1645_v42 = vld [vmem:[%s2028_s1 + $0xc0] sm:$0xff]  ;;  %v1686_v44 = vld [vmem:[%s2028_s1 + $0x1f8] sm:$0xff]  ;;  %v1644_v46 = vld [vmem:[%s1824_s6 + $0x8] sm:$0x70] }
  0x1e   : >> { %430 = vmatpush.bf16.msra.mxu2 %v1640_v13  ;;  %v1659_v49 = vld [vmem:[%s2028_s1 + $0x130] sm:$0xff]  ;;  %v1898_v51 = vor.u32 %v1644_v46, %v1317_v45  ;;  %v1658_v54 = vld [vmem:[%s2028_s1 + $0x128] sm:$0xff]  ;;  %v1657_v58 = vld [vmem:[%s2028_s1 + $0x120] sm:$0xff] }
  0x1f   : >> { %342 = vmatpush.bf16.msra.mxu1 %v1623_v14  ;;  %v226_v47 = vor.u32 %v225_v37, %v221_v36  ;;  %v1677_v50 = vld [vmem:[%s2028_s1 + $0x1b0] sm:$0xff]  ;;  %v1676_v55 = vld [vmem:[%s2028_s1 + $0x1a8] sm:$0xff]  ;;  %v1675_v59 = vld [vmem:[%s2028_s1 + $0x1a0] sm:$0xff] }
  0x20   : >> { %523 = vmatpush.bf16.msra.mxu3 %v1649_v15  ;;  %v1668_v52 = vld [vmem:[%s2028_s1 + $0x170] sm:$0xff]  ;;  %v1667_v56 = vld [vmem:[%s2028_s1 + $0x168] sm:$0xff]  ;;  %v1666_v60 = vld [vmem:[%s2028_s1 + $0x160] sm:$0xff]  ;;  %v556_v9 = vshll.u32 %v1898_v51, 16 }
  0x21   : >> { %280 = vmatpush.bf16.msra.mxu0 %v1630_v16  ;;  %v1685_v53 = vld [vmem:[%s2028_s1 + $0x1f0] sm:$0xff]  ;;  %v1684_v57 = vld [vmem:[%s2028_s1 + $0x1e8] sm:$0xff]  ;;  %v1683_v61 = vld [vmem:[%s2028_s1 + $0x1e0] sm:$0xff] }
  0x22   : >> { %431 = vmatpush.bf16.msra.mxu2 %v1639_v17  ;;  %v1656_v62 = vld [vmem:[%s2028_s1 + $0x118] sm:$0xff]  ;;  %v1474_v2 = vld [vmem:[%s1824_s6 + $0x10] sm:$0xf]  ;;  %v1670_v3 = vld [vmem:[%s1824_s6 + $0x10] sm:$0x70]  ;;  %v554_v17 = vshrl.u32 %v1898_v51, 16 }
  0x23   : >> { %343 = vmatpush.bf16.msra.mxu1 %v1622_v18  ;;  %v1674_v63 = vld [vmem:[%s2028_s1 + $0x198] sm:$0xff]  ;;  %v1655_v4 = vld [vmem:[%s2028_s1 + $0x110] sm:$0xff]  ;;  %v1475_v6 = vor.u32 %v1670_v3, %v1474_v2  ;;  %v1654_v10 = vld [vmem:[%s2028_s1 + $0x108] sm:$0xff]  ;;  %v558_v18 = vrot.slane %v556_v9, 1 }
  0x24   : >> { %524 = vmatpush.bf16.msra.mxu3 %v1648_v19  ;;  %v1665_v0 = vld [vmem:[%s2028_s1 + $0x158] sm:$0xff]  ;;  %v1673_v5 = vld [vmem:[%s2028_s1 + $0x190] sm:$0xff]  ;;  %v1672_v11 = vld [vmem:[%s2028_s1 + $0x188] sm:$0xff] }
  0x25   : >> { %281 = vmatpush.bf16.msra.mxu0 %v1629_v22  ;;  %v1682_v1 = vld [vmem:[%s2028_s1 + $0x1d8] sm:$0xff]  ;;  %v1664_v7 = vld [vmem:[%s2028_s1 + $0x150] sm:$0xff]  ;;  %v1663_v12 = vld [vmem:[%s2028_s1 + $0x148] sm:$0xff]  ;;  %v828_v13 = vshll.u32 %v1475_v6, 16 }
  0x26   : >> { %432 = vmatpush.bf16.msra.mxu2 %v1638_v23  ;;  %v1681_v8 = vld [vmem:[%s2028_s1 + $0x1d0] sm:$0xff]  ;;  %v1680_v14 = vld [vmem:[%s2028_s1 + $0x1c8] sm:$0xff]  ;;  %v1653_v19 = vld [vmem:[%s2028_s1 + $0x100] sm:$0xff]  ;;  %v826_v23 = vshrl.u32 %v1475_v6, 16 }
  0x27   : >> { %344 = vmatpush.bf16.msra.mxu1 %v1621_v25  ;;  %v1419_v15 = vld [vmem:[%s1824_s6 + $0x8] sm:$0xe]  ;;  %v1661_v16 = vld [vmem:[%s1824_s6 + $0x8] sm:$0xf0]  ;;  %v1671_v20 = vld [vmem:[%s2028_s1 + $0x180] sm:$0xff] }
  0x28   : >> { %525 = vmatpush.bf16.msra.mxu3 %v1647_v26  ;;  %v1695_v21 = vld [vmem:[%s2028_s1 + $0x238] sm:$0xff]  ;;  %v1420_v22 = vor.u32 %v1661_v16, %v1419_v15  ;;  %v1662_v25 = vld [vmem:[%s2028_s1 + $0x140] sm:$0xff]  ;;  %v1694_v30 = vld [vmem:[%s2028_s1 + $0x230] sm:$0xff] }
  0x29   : >> { %282 = vmatpush.bf16.msra.mxu0 %v1628_v27  ;;  %v1679_v26 = vld [vmem:[%s2028_s1 + $0x1c0] sm:$0xff]  ;;  %v559_v27 = vor.u32 %v558_v18, %v554_v17  ;;  %v1691_v33 = vld [vmem:[%s2028_s1 + $0x218] sm:$0xff]  ;;  %v1576_v36 = vld [vmem:[%s1824_s6 + $0x10] sm:$0xe] }
  0x2a   : >> { %433 = vmatpush.bf16.msra.mxu2 %v1637_v28  ;;  %v649_v28 = vrot.slane %v1420_v22, 1  ;;  %v1692_v32 = vld [vmem:[%s2028_s1 + $0x220] sm:$0xff]  ;;  %v1687_v37 = vld [vmem:[%s1824_s6 + $0x10] sm:$0xf0] }
  0x2b   : >> { %345 = vmatpush.bf16.msra.mxu1 %v1620_v29  ;;  %v1577_v38 = vor.u32 %v1687_v37, %v1576_v36  ;;  %v1714_v2 = vld [vmem:[%s2029_s2] ss:$0 sm:$0xff] }
  0x2c   : >> { %526 = vmatpush.bf16.msra.mxu3 %v1646_v31  ;;  %v1693_v31 = vld [vmem:[%s2028_s1 + $0x228] sm:$0xff] }
  0x2d   : >> { %283 = vmatpush.bf16.msra.mxu0 %v1627_v34  ;;  %v1690_v34 = vld [vmem:[%s2028_s1 + $0x210] sm:$0xff] }
  0x2e   : >> { %434 = vmatpush.bf16.msra.mxu2 %v1636_v35  ;;  %v1689_v35 = vld [vmem:[%s2028_s1 + $0x208] sm:$0xff] }
  0x2f   : >> { %346 = vmatpush.bf16.msra.mxu1 %v1619_v41 }
  0x30   : >> { %527 = vmatpush.bf16.msra.mxu3 %v1645_v42  ;;  %284 = vmatmul.bf16.vlgmr.msra.gmra.mxu0 %v226_v47 }
  0x31   : >> { %609 = vmatpush.bf16.msrb.mxu0 %v1660_v39  ;;  %435 = vmatmul.bf16.vlgmr.msra.gmra.mxu2 %v377_v48  ;;  %v1688_v39 = vld [vmem:[%s2028_s1 + $0x200] sm:$0xff] }
  0x32   : >> { %792 = vmatpush.bf16.msrb.mxu2 %v1678_v40  ;;  %347 = vmatmul.bf16.vlgmr.msra.gmra.mxu1 %v1179_v24  ;;  %v830_v24 = vrot.slane %v828_v13, 1  ;;  %v921_v40 = vrot.slane %v1577_v38, 1 }
  0x33   : >> { %699 = vmatpush.bf16.msrb.mxu1 %v1669_v43  ;;  %528 = vmatmul.bf16.vlgmr.msra.gmra.mxu3 %v1898_v51 }
  0x34   : >> { %881 = vmatpush.bf16.msrb.mxu3 %v1686_v44  ;;  %v831_v29 = vor.u32 %v830_v24, %v826_v23 }
  0x35   : >> { %610 = vmatpush.bf16.msrb.mxu0 %v1659_v49 }
  0x36   : >> { %793 = vmatpush.bf16.msrb.mxu2 %v1677_v50 }
  0x37   : >> { %700 = vmatpush.bf16.msrb.mxu1 %v1668_v52 }
  0x38   : >> { %882 = vmatpush.bf16.msrb.mxu3 %v1685_v53 }
  0x39   : >> { %611 = vmatpush.bf16.msrb.mxu0 %v1658_v54 }
  0x3a   : >> { %794 = vmatpush.bf16.msrb.mxu2 %v1676_v55 }
  0x3b   : >> { %701 = vmatpush.bf16.msrb.mxu1 %v1667_v56 }
  0x3c   : >> { %883 = vmatpush.bf16.msrb.mxu3 %v1684_v57 }
  0x3d   : >> { %612 = vmatpush.bf16.msrb.mxu0 %v1657_v58 }
  0x3e   : >> { %795 = vmatpush.bf16.msrb.mxu2 %v1675_v59 }
  0x3f   : >> { %702 = vmatpush.bf16.msrb.mxu1 %v1666_v60 }
  0x40   : >> { %884 = vmatpush.bf16.msrb.mxu3 %v1683_v61 }
  0x41   : >> { %613 = vmatpush.bf16.msrb.mxu0 %v1656_v62 }
  0x42   : >> { %796 = vmatpush.bf16.msrb.mxu2 %v1674_v63 }
  0x43   : >> { %703 = vmatpush.bf16.msrb.mxu1 %v1665_v0 }
  0x44   : >> { %885 = vmatpush.bf16.msrb.mxu3 %v1682_v1 }
  0x45   : >> { %614 = vmatpush.bf16.msrb.mxu0 %v1655_v4 }
  0x46   : >> { %797 = vmatpush.bf16.msrb.mxu2 %v1673_v5 }
  0x47   : >> { %704 = vmatpush.bf16.msrb.mxu1 %v1664_v7 }
  0x48   : >> { %886 = vmatpush.bf16.msrb.mxu3 %v1681_v8 }
  0x49   : >> { %615 = vmatpush.bf16.msrb.mxu0 %v1654_v10 }
  0x4a   : >> { %798 = vmatpush.bf16.msrb.mxu2 %v1672_v11 }
  0x4b   : >> { %705 = vmatpush.bf16.msrb.mxu1 %v1663_v12 }
  0x4c   : >> { %887 = vmatpush.bf16.msrb.mxu3 %v1680_v14 }
  0x4d   : >> { %616 = vmatpush.bf16.msrb.mxu0 %v1653_v19 }
  0x4e   : >> { %799 = vmatpush.bf16.msrb.mxu2 %v1671_v20 }
  0x4f   : >> { %706 = vmatpush.bf16.msrb.mxu1 %v1662_v25 }
  0x50   : >> { %888 = vmatpush.bf16.msrb.mxu3 %v1679_v26  ;;  %617 = vmatmul.bf16.vlgmr.msrb.gmra.mxu0 %v559_v27 }
  0x51   : >> { %971 = vmatpush.bf16.msra.mxu0 %v1695_v21  ;;  %800 = vmatmul.bf16.vlgmr.msrb.gmra.mxu2 %v1475_v6 }
  0x52   : >> { %707 = vmatmul.bf16.vlgmr.msrb.gmra.mxu1 %v649_v28 }
  0x53   : >> { %889 = vmatmul.bf16.vlgmr.msrb.gmra.mxu3 %v831_v29 }
  0x55   : >> { %972 = vmatpush.bf16.msra.mxu0 %v1694_v30 }
  0x59   : >> { %973 = vmatpush.bf16.msra.mxu0 %v1693_v31 }
  0x5d   : >> { %974 = vmatpush.bf16.msra.mxu0 %v1692_v32 }
  0x61   : >> { %975 = vmatpush.bf16.msra.mxu0 %v1691_v33 }
  0x65   : >> { %976 = vmatpush.bf16.msra.mxu0 %v1690_v34 }
  0x69   : >> { %977 = vmatpush.bf16.msra.mxu0 %v1689_v35 }
  0x6d   : >> { %978 = vmatpush.bf16.msra.mxu0 %v1688_v39 }
  0x70   : >> { %979 = vmatmul.bf16.vlgmr.msra.gmra.mxu0 %v921_v40 }
  0xad   : >> { %v285_v41 = vpop.f32.mrf.mxu0 }
  0xaf   : >> { %v348_v42 = vpop.f32.mrf.mxu1 }
  0xb0   : >> { %v349_v46 = vadd.f32 %v348_v42, %v285_v41 }
  0xb4   : >> { %v436_v43 = vpop.f32.mrf.mxu2 }
  0xb5   : >> { %v287_v44 = vpop.f32.mrf.mxu0  ;;  %v441_v48 = vadd.f32 %v436_v43, %v349_v46 }
  0xb6   : >> { %v529_v45 = vpop.f32.mrf.mxu3 }
  0xb7   : >> { %v350_v47 = vpop.f32.mrf.mxu1  ;;  %v534_v51 = vadd.f32 %v529_v45, %v441_v48 }
  0xb8   : >> { %v351_v53 = vadd.f32 %v350_v47, %v287_v44 }
  0xbc   : >> { %v438_v49 = vpop.f32.mrf.mxu2 }
  0xbd   : >> { %v442_v57 = vadd.f32 %v438_v49, %v351_v53 }
  0xbe   : >> { %v531_v52 = vpop.f32.mrf.mxu3 }
  0xbf   : >> { %v535_v61 = vadd.f32 %v531_v52, %v442_v57 }
  0xcd   : >> { %v618_v50 = vpop.f32.mrf.mxu0 }
  0xce   : >> { %v623_v54 = vadd.f32 %v618_v50, %v534_v51 }
  0xcf   : >> { %v708_v55 = vpop.f32.mrf.mxu1 }
  0xd0   : >> { %v713_v58 = vadd.f32 %v708_v55, %v623_v54 }
  0xd4   : >> { %v801_v56 = vpop.f32.mrf.mxu2 }
  0xd5   : >> { %v620_v59 = vpop.f32.mrf.mxu0  ;;  %v806_v62 = vadd.f32 %v801_v56, %v713_v58 }
  0xd6   : >> { %v890_v60 = vpop.f32.mrf.mxu3  ;;  %v624_v63 = vadd.f32 %v620_v59, %v535_v61 }
  0xd7   : >> { %v710_v0 = vpop.f32.mrf.mxu1  ;;  %v895_v1 = vadd.f32 %v890_v60, %v806_v62 }
  0xd8   : >> { %v714_v5 = vadd.f32 %v710_v0, %v624_v63 }
  0xdc   : >> { %v803_v3 = vpop.f32.mrf.mxu2 }
  0xdd   : >> { %v807_v7 = vadd.f32 %v803_v3, %v714_v5 }
  0xde   : >> { %v892_v9 = vpop.f32.mrf.mxu3 }
  0xdf   : >> { %v896_v11 = vadd.f32 %v892_v9, %v807_v7 }
  0xed   : >> { %v980_v4 = vpop.f32.mrf.mxu0 }
  0xee   : >> { %v985_v6 = vadd.f32 %v980_v4, %v895_v1 }
  0xf0   : >> { %v991_v8 = vadd.f32 %v1714_v2, %v985_v6 }
  0xf2   : >> { %v993_v10 = vmax.f32 %v991_v8, 0.0 }
  0xf4   : >> { %997 = vst [vmem:[%s996_s11] sm:$0xff] %v993_v10 }
  0xf5   : >> { %v982_v12 = vpop.f32.mrf.mxu0 }
  0xf6   : >> { %v986_v13 = vadd.f32 %v982_v12, %v896_v11 }
  0xf8   : >> { %v992_v14 = vadd.f32 %v1714_v2, %v986_v13  ;;  %175 = sbr.rel (!%p173_p4) target bundleno = 16 (0x10), region = 109 }
  0xfa   : >> { %v994_v15 = vmax.f32 %v992_v14, 0.0 }
  0xfc   : >> { %998 = vst [vmem:[%s996_s11 + $0x8] sm:$0x1f] %v994_v15 }
 0x103   : > { %v999_v16 = vld [vmem:[#allocation2] ss:$2 sm:$0x3f]  ;;  %v1001_v17 = vld [vmem:[#allocation2 + $0x1] ss:$2 sm:$0x3f] }
 0x104   : > { %v1003_v18 = vld [vmem:[#allocation2 + $0xd] ss:$2 sm:$0x3f]  ;;  %v1005_v19 = vld [vmem:[#allocation2 + $0xe] ss:$2 sm:$0x3f]  ;;  %v1006_v20 = vmax.f32 %v999_v16, %v1001_v17 }
 0x105   : > { %v1007_v21 = vmax.f32 %v1003_v18, %v1005_v19  ;;  %v1012_v22 = vld [vmem:[#allocation2 + $0x1a] ss:$2 sm:$0x3f]  ;;  %v1014_v23 = vld [vmem:[#allocation2 + $0x1b] ss:$2 sm:$0x3f] }
 0x106   : > { %v1016_v24 = vld [vmem:[#allocation2 + $0x27] ss:$2 sm:$0x3f]  ;;  %v1018_v25 = vld [vmem:[#allocation2 + $0x28] ss:$2 sm:$0x3f]  ;;  %v1019_v26 = vmax.f32 %v1012_v22, %v1014_v23 }
 0x107   : > { %v1008_v27 = vmax.f32 %v1006_v20, %v1007_v21  ;;  %v1020_v28 = vmax.f32 %v1016_v24, %v1018_v25  ;;  %v1026_v29 = vld [vmem:[#allocation2 + $0x34] ss:$2 sm:$0x3f]  ;;  %v1028_v30 = vld [vmem:[#allocation2 + $0x35] ss:$2 sm:$0x3f] }
 0x108   : > { %v1030_v31 = vld [vmem:[#allocation2 + $0x41] ss:$2 sm:$0x3f]  ;;  %v1032_v32 = vld [vmem:[#allocation2 + $0x42] ss:$2 sm:$0x3f]  ;;  %v1033_v33 = vmax.f32 %v1026_v29, %v1028_v30 }
 0x109   : > { %v1009_v34 = vpack.c.bf16 %v1008_v27, %v1008_v27  ;;  %v1021_v35 = vmax.f32 %v1019_v26, %v1020_v28  ;;  %v1034_v36 = vmax.f32 %v1030_v31, %v1032_v32  ;;  %v1040_v37 = vld [vmem:[#allocation2 + $0x4e] ss:$2 sm:$0x3f]  ;;  %v1042_v38 = vld [vmem:[#allocation2 + $0x4f] ss:$2 sm:$0x3f] }
 0x10a   : > { %v1044_v39 = vld [vmem:[#allocation2 + $0x5b] ss:$2 sm:$0x3f]  ;;  %v1046_v40 = vld [vmem:[#allocation2 + $0x5c] ss:$2 sm:$0x3f]  ;;  %v1047_v41 = vmax.f32 %v1040_v37, %v1042_v38 }
 0x10b   : > { %1010 = vst [vmem:[%s1767_s21] sm:$0x7] %v1009_v34  ;;  %v1022_v42 = vpack.c.bf16 %v1021_v35, %v1021_v35  ;;  %v1035_v43 = vmax.f32 %v1033_v33, %v1034_v36  ;;  %v1048_v44 = vmax.f32 %v1044_v39, %v1046_v40  ;;  %v1054_v45 = vld [vmem:[#allocation2 + $0x68] ss:$2 sm:$0x3f] }
 0x10c   : > { %v1056_v46 = vld [vmem:[#allocation2 + $0x69] ss:$2 sm:$0x3f]  ;;  %v1058_v47 = vld [vmem:[#allocation2 + $0x75] ss:$2 sm:$0x3f] }
 0x10d   : > { %1610 = vst [vmem:[%s1767_s21 + $0x4] sm:$0x7] %v1022_v42  ;;  %v1036_v48 = vpack.c.bf16 %v1035_v43, %v1035_v43  ;;  %v1049_v49 = vmax.f32 %v1047_v41, %v1048_v44  ;;  %v1060_v50 = vld [vmem:[#allocation2 + $0x76] ss:$2 sm:$0x3f]  ;;  %v1061_v51 = vmax.f32 %v1054_v45, %v1056_v46 }
 0x10e   : > { %v1062_v52 = vmax.f32 %v1058_v47, %v1060_v50  ;;  %v1068_v53 = vld [vmem:[#allocation2 + $0x82] ss:$2 sm:$0x3f]  ;;  %v1070_v54 = vld [vmem:[#allocation2 + $0x83] ss:$2 sm:$0x3f] }
 0x10f   : > { %1611 = vst [vmem:[%s1767_s21 + $0x8] sm:$0x7] %v1036_v48  ;;  %v1050_v55 = vpack.c.bf16 %v1049_v49, %v1049_v49  ;;  %v1072_v56 = vld [vmem:[#allocation2 + $0x8f] ss:$2 sm:$0x3f]  ;;  %v1075_v57 = vmax.f32 %v1068_v53, %v1070_v54 }
 0x110   : > { %v1063_v58 = vmax.f32 %v1061_v51, %v1062_v52  ;;  %v1074_v59 = vld [vmem:[#allocation2 + $0x90] ss:$2 sm:$0x3f] }
 0x111   : > { %1612 = vst [vmem:[%s1767_s21 + $0xc] sm:$0x7] %v1050_v55  ;;  %v1076_v60 = vmax.f32 %v1072_v56, %v1074_v59 }
 0x112   : > { %v1064_v61 = vpack.c.bf16 %v1063_v58, %v1063_v58 }
 0x113   : > { %v1077_v62 = vmax.f32 %v1075_v57, %v1076_v60 }
 0x114   : > { %1613 = vst [vmem:[%s1767_s21 + $0x10] sm:$0x7] %v1064_v61 }
 0x115   : > { %v1078_v63 = vpack.c.bf16 %v1077_v62, %v1077_v62 }
 0x117   : > { %1614 = vst [vmem:[%s1767_s21 + $0x14] sm:$0x7] %v1078_v63 }
 0x118 PF: > { %s13_s12 = sadd.s32 1, %s1725_s12  }
 0x119   : > { %p10_p5 = scmp.ge.s32.totalorder %s13_s12, 4  }
 0x11b   :  { %12 = sbr.rel (!%p10_p5) target bundleno = 1 (0x1), region = 120 }

// kernel: small_convnet_forward.5
= control target key start
LH: loop header
LB: loop body
LE: loop exit
PB: predicated region body
PF: predicated region fallthrough
CT: control target
= control target key end

     0   :  { %10 = vsyncpa [#allocation3], 0  ;;  %s3107_s0 = inlined_call_operand.vmem [shape: bf16[2,6,6,128], index: 0, kind: input, shape index: {}]   ;;  %s3108_s1 = inlined_call_operand.vmem [shape: bf16[3,3,128,128], index: 1, kind: input, shape index: {}]   ;;  %s3109_s2 = inlined_call_operand.vmem [shape: f32[1,128], index: 2, kind: input, shape index: {}]   ;;  %s3110_s3 = inlined_call_operand.vmem [shape: f32[128,128], index: 3, kind: input, shape index: {}]   ;;  %s3111_s4 = inlined_call_operand.vmem [shape: f32[1,128], index: 4, kind: input, shape index: {}]   ;;  %s3112_s5 = inlined_call_operand.hbm [shape: f32[2,1,128], index: 5, kind: output, shape index: {}]  }
   0x1   :  { %12 = vsyncpa [#allocation3 + $0x1], 0  ;;  %s2240_s18 = smov 0   ;;  %s2242_s19 = smov 0  }
   0x2   :  { %s2244_s20 = smov 0   ;;  %s2246_s21 = smov 0  }
   0x3 LB: > { %s2261_s22 = sadd.s32 4294967295, %s2208_s21   ;;  %s1591_s23 = sadd.s32 4294967294, %s2208_s21   ;;  %s2208_s21 = sphi %s2246_s21, %s3263_s21   ;;  %s2204_s20 = sphi %s2244_s20, %s3262_s20   ;;  %s2200_s19 = sphi %s2242_s19, %s3261_s19   ;;  %s2196_s18 = sphi %s2240_s18, %s3260_s18  }
   0x4   : > { %s2265_s24 = sadd.s32 1, %s2208_s21   ;;  %s135_s25 = sadd.s32 1, %s2204_s20 }
   0x5   : > { %s132_s26 = ssub.s32 %s2208_s21, %s2265_s24  ;;  %p145_p0 = scmp.ne.s32.totalorder %s2204_s20, %s2200_s19 }
   0x6   : > { %p133_p1 = scmp.eq.s32.totalorder %s132_s26, 0  ;;  %p146_p2 = scmp.eq.s32.totalorder %s2261_s22, 1 }
   0x7   : > { %p151_p3 = scmp.ne.s32.totalorder %s2200_s19, %s2196_s18  ;;  %p152_p4 = scmp.eq.s32.totalorder %s1591_s23, 1 }
   0x8   : > { %s2276_s27 = scalar_select %p133_p1, %s2204_s20, %s135_s25  }
   0x9   : > { %p2278_p5 = por %p146_p2, %p145_p0  ;;  %p2282_p6 = por %p152_p4, %p151_p3 }
   0xa   : > { %p1594_p7 = scmp.ge.s32.totalorder %s2208_s21, 1  ;;  %p190_p8 = scmp.lt.s32.totalorder %s2208_s21, 3 }
   0xc   : > { %p191_p9 = pnand %p1594_p7, %p190_p8 }
   0xe   : > { %194 = sbr.rel (%p191_p9) target bundleno = 855 (0x357), region = 40 }
  0x13   : > { %v2291_v0 = vld [vmem:[%s3108_s1 + $0x78] sm:$0xff]  ;;  %v2313_v4 = vld [vmem:[%s3108_s1 + $0x70] sm:$0xff]  ;;  %p217_p10 = scmp.lt.s32.totalorder %s2261_s22, 1  ;;  %v2338_v8 = vld [vmem:[%s3108_s1 + $0x68] sm:$0xff]  ;;  %vm995_vm0 = vcmask 1043456   ;;  %vm1508_vm2 = vcmask 1040384   ;;  %s1532_s7 = scalar_lea.hbm %s3112_s5, %s2261_s22 }
  0x14   : > { %v2296_v1 = vld [vmem:[%s3108_s1 + $0x38] sm:$0xff]  ;;  %316 = vmatpush.bf16.msra.mxu0 %v2291_v0  ;;  %v2318_v5 = vld [vmem:[%s3108_s1 + $0x30] sm:$0xff]  ;;  %3181 = vst [vmem:[#allocation8_spill] sm:$0xff] %v2338_v8  ;;  %v2343_v9 = vld [vmem:[%s3108_s1 + $0x28] sm:$0xff]  ;;  %s215_s26 = sand.u32 1, %s2200_s19   ;;  %s1536_s10 = sshll.u32 %s1532_s7, 4  ;;  %s1537_s10 = int_to_ptr.hbm [resolvable:$true] %s1536_s10 }
  0x15   : > { %3178 = vst [vmem:[#allocation5_spill] sm:$0xff] %v2296_v1  ;;  %v2301_v2 = vld [vmem:[%s3108_s1 + $0xb8] sm:$0xff]  ;;  %377 = vmatpush.bf16.msra.mxu1 %v2296_v1  ;;  %v2325_v6 = vld [vmem:[%s3108_s1 + $0xb0] sm:$0xff]  ;;  %v2350_v10 = vld [vmem:[%s3108_s1 + $0xa8] sm:$0xff]  ;;  %s218_s13 = scalar_select %p217_p10, %s2261_s22, 1 }
  0x16   : > { %v2306_v3 = vld [vmem:[%s3108_s1 + $0xf8] sm:$0xff]  ;;  %3179 = vst [vmem:[#allocation6_spill] sm:$0xff] %v2318_v5  ;;  %461 = vmatpush.bf16.msra.mxu2 %v2301_v2  ;;  %v2330_v7 = vld [vmem:[%s3108_s1 + $0xf0] sm:$0xff]  ;;  %v2355_v11 = vld [vmem:[%s3108_s1 + $0xe8] sm:$0xff]  ;;  %s216_s8 = scalar_lea.vmem [#allocation2], %s215_s26  ;;  %s1524_s11 = scalar_lea.sflag [#allocation3], %s215_s26 }
  0x17   : > { %542 = vmatpush.bf16.msra.mxu3 %v2306_v3  ;;  %3180 = vst [vmem:[#allocation7_spill] sm:$0xff] %v2325_v6  ;;  %v2363_v12 = vld [vmem:[%s3108_s1 + $0x60] sm:$0xff]  ;;  %s2101_s6 = smul.u32 24, %s218_s13  ;;  %v2387_v16 = vld [vmem:[%s3108_s1 + $0x58] sm:$0xff]  ;;  %v2414_v20 = vld [vmem:[%s3108_s1 + $0x50] sm:$0xff]  ;;  %s1534_s9 = sshll.u32 %s216_s8, 4  ;;  %s1535_s9 = int_to_ptr.vmem [resolvable:$true] %s1534_s9 }
  0x18   : > { %317 = vmatpush.bf16.msra.mxu0 %v2313_v4  ;;  %3182 = vst [vmem:[#allocation9_spill] sm:$0xff] %v2343_v9  ;;  %v2368_v13 = vld [vmem:[%s3108_s1 + $0x20] sm:$0xff]  ;;  %v2392_v17 = vld [vmem:[%s3108_s1 + $0x18] sm:$0xff]  ;;  %v2421_v21 = vld [vmem:[%s3108_s1 + $0x10] sm:$0xff]  ;;  %s2160_s12 = sshra.s32 %s1537_s10, 4  ;;  %s2166_s22 = scalar_lea.hbm %s3112_s5, 2  ;;  %s2161_s12 = int_to_ptr.hbm [resolvable:$true] %s2160_s12 }
  0x19   : > { %378 = vmatpush.bf16.msra.mxu1 %v2318_v5  ;;  %3183 = vst [vmem:[#allocation10_spill] sm:$0xff] %v2350_v10  ;;  %v2375_v14 = vld [vmem:[%s3108_s1 + $0xa0] sm:$0xff]  ;;  %v2399_v18 = vld [vmem:[%s3108_s1 + $0x98] sm:$0xff]  ;;  %s2409_s17 = scalar_lea.vmem %s3107_s0, %s2101_s6  ;;  %v2429_v23 = vld [vmem:[%s3108_s1 + $0x90] sm:$0xff]  ;;  %s2162_s13 = scalar_lea.hbm %s2161_s12, 1 }
  0x1a   : > { %462 = vmatpush.bf16.msra.mxu2 %v2325_v6  ;;  %3184 = vst [vmem:[#allocation11_spill] sm:$0xff] %v2368_v13  ;;  %v2380_v15 = vld [vmem:[%s3108_s1 + $0xe0] sm:$0xff]  ;;  %v2404_v19 = vld [vmem:[%s3108_s1 + $0xd8] sm:$0xff]  ;;  %v2434_v24 = vld [vmem:[%s3108_s1 + $0xd0] sm:$0xff]  ;;  %p2163_p11 = scmp.ne.s32.totalorder %s2161_s12, %s2162_s13  ;;  %p2167_p0 = scmp.lt.s32.totalorder %s2161_s12, %s3112_s5 }
  0x1b   : > { %543 = vmatpush.bf16.msra.mxu3 %v2330_v7  ;;  %3185 = vst [vmem:[#allocation12_spill] sm:$0xff] %v2375_v14  ;;  %v239_v22 = vld [vmem:[%s2409_s17] sm:$0x7]  ;;  %v2442_v28 = vld [vmem:[%s3108_s1 + $0x48] sm:$0xff]  ;;  %v2488_v41 = vld [vmem:[%s3108_s1 + $0x138] sm:$0xff]  ;;  %p2168_p1 = scmp.lt.s32.totalorder %s2166_s22, %s2162_s13 }
  0x1c   : > { %318 = vmatpush.bf16.msra.mxu0 %v2338_v8  ;;  %3186 = vst [vmem:[#allocation13_spill] sm:$0xff] %v2387_v16  ;;  %v390_v25 = vld [vmem:[%s2409_s17] sm:$0x6]  ;;  %v258_v26 = vunpack.c.l.b16 %v239_v22  ;;  %v2447_v29 = vld [vmem:[%s3108_s1 + $0x8] sm:$0xff]  ;;  %v2493_v42 = vld [vmem:[%s3108_s1 + $0x178] sm:$0xff]  ;;  %p2164_p12 = pnand %p2163_p11, %p2278_p5 }
  0x1d   : > { %379 = vmatpush.bf16.msra.mxu1 %v2343_v9  ;;  %3187 = vst [vmem:[#allocation14_spill] sm:$0xff] %v2392_v17  ;;  %v409_v30 = vunpack.c.l.b16 %v390_v25  ;;  %v2454_v31 = vld [vmem:[%s3108_s1 + $0x88] sm:$0xff]  ;;  %v2466_v34 = vld [vmem:[%s3108_s1 + $0x40] sm:$0xff]  ;;  %v2498_v43 = vld [vmem:[%s3108_s1 + $0x1b8] sm:$0xff]  ;;  %p2169_p2 = por %p2168_p1, %p2167_p0 }
  0x1e   : > { %463 = vmatpush.bf16.msra.mxu2 %v2350_v10  ;;  %3188 = vst [vmem:[#allocation15_spill] sm:$0xff] %v2399_v18  ;;  %v259_v27 = vpack.c.b16 %v258_v26, %v258_v26  ;;  %v2459_v32 = vld [vmem:[%s3108_s1 + $0xc8] sm:$0xff]  ;;  %v2471_v35 = vld [vmem:[%s3108_s1] sm:$0xff]  ;;  %v2503_v44 = vld [vmem:[%s3108_s1 + $0x1f8] sm:$0xff]  ;;  %p2165_p13 = pneg %p2164_p12 }
  0x1f   : > { %544 = vmatpush.bf16.msra.mxu3 %v2355_v11  ;;  %3189 = vst [vmem:[#allocation16_spill] sm:$0xff] %v2421_v21  ;;  %v410_v36 = vpack.c.b16 %v409_v30, %v409_v30  ;;  %v2478_v39 = vld [vmem:[%s3108_s1 + $0x80] sm:$0xff]  ;;  %v2512_v47 = vld [vmem:[%s3108_s1 + $0x130] sm:$0xff]  ;;  %v2543_v53 = vld [vmem:[%s3108_s1 + $0x128] sm:$0xff] }
  0x20   : > { %319 = vmatpush.bf16.msra.mxu0 %v2363_v12  ;;  %3190 = vst [vmem:[#allocation17_spill] sm:$0xff] %v2447_v29  ;;  %v263_v33 = vshll.u32 %v259_v27, 16  ;;  %v261_v37 = vshrl.u32 %v259_v27, 16  ;;  %v2483_v40 = vld [vmem:[%s3108_s1 + $0xc0] sm:$0xff]  ;;  %v2519_v48 = vld [vmem:[%s3108_s1 + $0x170] sm:$0xff]  ;;  %v2548_v54 = vld [vmem:[%s3108_s1 + $0x168] sm:$0xff]  ;;  %p2170_p3 = pnand %p2169_p2, %p2165_p13 }
  0x21   : > { %380 = vmatpush.bf16.msra.mxu1 %v2368_v13  ;;  %3191 = vst [vmem:[#allocation18_spill] sm:$0xff] %v2459_v32  ;;  %v411_v45 = vrot.slane %v410_v36, 1  ;;  %v2522_v49 = vld [vmem:[%s2409_s17 + $0x4] sm:$0x3]  ;;  %v222_v50 = vld [vmem:[%s2409_s17] sm:$0x3] }
  0x22   : > { %464 = vmatpush.bf16.msra.mxu2 %v2375_v14  ;;  %3192 = vst [vmem:[#allocation19_spill] sm:$0xff] %v2471_v35  ;;  %v265_v38 = vrot.slane %v263_v33, 1  ;;  %v2530_v51 = vld [vmem:[%s3108_s1 + $0x1b0] sm:$0xff]  ;;  %v2555_v55 = vld [vmem:[%s3108_s1 + $0x1a8] sm:$0xff]  ;;  %v2567_v57 = vld [vmem:[%s3108_s1 + $0x120] sm:$0xff] }
  0x23   : > { %545 = vmatpush.bf16.msra.mxu3 %v2380_v15  ;;  %3193 = vst [vmem:[#allocation20_spill] sm:$0xff] %v2483_v40  ;;  %v2535_v52 = vld [vmem:[%s3108_s1 + $0x1f0] sm:$0xff]  ;;  %v2560_v56 = vld [vmem:[%s3108_s1 + $0x1e8] sm:$0xff]  ;;  %v2572_v58 = vld [vmem:[%s3108_s1 + $0x160] sm:$0xff] }
  0x24   : > { %320 = vmatpush.bf16.msra.mxu0 %v2387_v16  ;;  %3194 = vst [vmem:[#allocation21_spill] sm:$0xff] %v2493_v42  ;;  %v266_v46 = vor.u32 %v265_v38, %v261_v37  ;;  %v2579_v59 = vld [vmem:[%s3108_s1 + $0x1a0] sm:$0xff]  ;;  %v1920_v62 = vld [vmem:[%s2409_s17 + $0x8] sm:$0x7]  ;;  %v2593_v63 = vld [vmem:[%s3108_s1 + $0x118] sm:$0xff] }
  0x25   : > { %381 = vmatpush.bf16.msra.mxu1 %v2392_v17  ;;  %3195 = vst [vmem:[#allocation22_spill] sm:$0xff] %v2503_v44  ;;  %v2584_v60 = vld [vmem:[%s3108_s1 + $0x1e0] sm:$0xff]  ;;  %v2598_v22 = vld [vmem:[%s3108_s1 + $0x158] sm:$0xff]  ;;  %v832_v30 = vunpack.c.l.b16 %v1920_v62  ;;  %v2617_v33 = vld [vmem:[%s3108_s1 + $0x110] sm:$0xff] }
  0x26   : > { %465 = vmatpush.bf16.msra.mxu2 %v2399_v18  ;;  %3196 = vst [vmem:[#allocation23_spill] sm:$0xff] %v2519_v48  ;;  %v1773_v61 = vld [vmem:[%s2409_s17 + $0x4] sm:$0x7]  ;;  %v2605_v26 = vld [vmem:[%s3108_s1 + $0x198] sm:$0xff]  ;;  %v2622_v36 = vld [vmem:[%s3108_s1 + $0x150] sm:$0xff] }
  0x27   : > { %546 = vmatpush.bf16.msra.mxu3 %v2404_v19  ;;  %3197 = vst [vmem:[#allocation24_spill] sm:$0xff] %v2535_v52  ;;  %v575_v25 = vunpack.c.l.b16 %v1773_v61  ;;  %v2610_v27 = vld [vmem:[%s3108_s1 + $0x1d8] sm:$0xff]  ;;  %v2629_v38 = vld [vmem:[%s3108_s1 + $0x190] sm:$0xff]  ;;  %v2642_v61 = vld [vmem:[%s3108_s1 + $0x108] sm:$0xff] }
  0x28   : > { %321 = vmatpush.bf16.msra.mxu0 %v2414_v20  ;;  %3198 = vst [vmem:[#allocation25_spill] sm:$0xff] %v2555_v55  ;;  %v2647_v62 = vld [vmem:[%s3108_s1 + $0x148] sm:$0xff] }
  0x29   : > { %382 = vmatpush.bf16.msra.mxu1 %v2421_v21  ;;  %3199 = vst [vmem:[#allocation26_spill] sm:$0xff] %v2560_v56  ;;  %v576_v37 = vpack.c.b16 %v575_v25, %v575_v25 }
  0x2a   : > { %466 = vmatpush.bf16.msra.mxu2 %v2429_v23  ;;  %3200 = vst [vmem:[#allocation27_spill] sm:$0xff] %v2579_v59 }
  0x2b   : > { %547 = vmatpush.bf16.msra.mxu3 %v2434_v24  ;;  %3201 = vst [vmem:[#allocation28_spill] sm:$0xff] %v2584_v60  ;;  %v580_v25 = vshll.u32 %v576_v37, 16 }
  0x2c   : > { %322 = vmatpush.bf16.msra.mxu0 %v2442_v28  ;;  %3202 = vst [vmem:[#allocation29_spill] sm:$0xff] %v2598_v22 }
  0x2d   : > { %383 = vmatpush.bf16.msra.mxu1 %v2447_v29  ;;  %3203 = vst [vmem:[#allocation30_spill] sm:$0xff] %v2605_v26 }
  0x2e   : > { %467 = vmatpush.bf16.msra.mxu2 %v2454_v31  ;;  %3204 = vst [vmem:[#allocation31_spill] sm:$0xff] %v2610_v27 }
  0x2f   : > { %548 = vmatpush.bf16.msra.mxu3 %v2459_v32  ;;  %3205 = vst [vmem:[#allocation32_spill] sm:$0xff] %v2622_v36 }
  0x30   : > { %323 = vmatpush.bf16.msra.mxu0 %v2466_v34  ;;  %3206 = vst [vmem:[#allocation33_spill] sm:$0xff] %v2629_v38 }
  0x31   : > { %384 = vmatpush.bf16.msra.mxu1 %v2471_v35  ;;  %3208 = vst [vmem:[#allocation35_spill] sm:$0xff] %v2642_v61 }
  0x32   : > { %468 = vmatpush.bf16.msra.mxu2 %v2478_v39  ;;  %3209 = vst [vmem:[#allocation36_spill] sm:$0xff] %v2647_v62 }
  0x33   : > { %549 = vmatpush.bf16.msra.mxu3 %v2483_v40  ;;  %324 = vmatmul.bf16.vlgmr.msra.gmra.mxu0 %v266_v46  ;;  %v833_v46 = vpack.c.b16 %v832_v30, %v832_v30  ;;  %v2654_v30 = vld [vmem:[%s3108_s1 + $0x188] sm:$0xff]  ;;  %v582_v40 = vrot.slane %v580_v25, 1 }
  0x34   : > { %633 = vmatpush.bf16.msrb.mxu0 %v2488_v41  ;;  %385 = vmatmul.bf16.vlgmr.msra.gmra.mxu1 %v222_v50  ;;  %v1822_v50 = vld [vmem:[%s2409_s17 + $0x4] sm:$0x6]  ;;  %3210 = vst [vmem:[#allocation37_spill] sm:$0xff] %v2654_v30 }
  0x35   : > { %718 = vmatpush.bf16.msrb.mxu1 %v2493_v42  ;;  %469 = vmatmul.bf16.vlgmr.msra.gmra.mxu2 %v411_v45  ;;  %v2634_v45 = vld [vmem:[%s3108_s1 + $0x1d0] sm:$0xff] }
  0x36   : > { %799 = vmatpush.bf16.msrb.mxu2 %v2498_v43  ;;  %550 = vmatmul.bf16.vlgmr.msra.gmra.mxu3 %v2522_v49  ;;  %3207 = vst [vmem:[#allocation34_spill] sm:$0xff] %v2634_v45 }
  0x37   : > { %890 = vmatpush.bf16.msrb.mxu3 %v2503_v44  ;;  %v578_v44 = vshrl.u32 %v576_v37, 16  ;;  %v2690_v37 = vld [vmem:[%s3108_s1 + $0x238] sm:$0xff] }
  0x38   : > { %634 = vmatpush.bf16.msrb.mxu0 %v2512_v47 }
  0x39   : > { %719 = vmatpush.bf16.msrb.mxu1 %v2519_v48  ;;  %v583_v25 = vor.u32 %v582_v40, %v578_v44  ;;  %v2727_v40 = vld [vmem:[%s3108_s1 + $0x220] sm:$0xff]  ;;  %v2736_v44 = vld [vmem:[%s3108_s1 + $0x218] sm:$0xff] }
  0x3a   : > { %800 = vmatpush.bf16.msrb.mxu2 %v2530_v51  ;;  %3214 = vst [vmem:[#allocation41_spill] sm:$0xff] %v2727_v40 }
  0x3b   : > { %891 = vmatpush.bf16.msrb.mxu3 %v2535_v52  ;;  %v2671_v52 = vld [vmem:[%s3108_s1 + $0x140] sm:$0xff]  ;;  %3215 = vst [vmem:[#allocation42_spill] sm:$0xff] %v2736_v44 }
  0x3c   : > { %635 = vmatpush.bf16.msrb.mxu0 %v2543_v53  ;;  %3212 = vst [vmem:[#allocation39_spill] sm:$0xff] %v2671_v52 }
  0x3d   : > { %720 = vmatpush.bf16.msrb.mxu1 %v2548_v54 }
  0x3e   : > { %801 = vmatpush.bf16.msrb.mxu2 %v2555_v55 }
  0x3f   : > { %892 = vmatpush.bf16.msrb.mxu3 %v2560_v56  ;;  %v666_v56 = vunpack.c.l.b16 %v1822_v50  ;;  %v2678_v50 = vld [vmem:[%s3108_s1 + $0x180] sm:$0xff] }
  0x40   : > { %636 = vmatpush.bf16.msrb.mxu0 %v2567_v57  ;;  %3213 = vst [vmem:[#allocation40_spill] sm:$0xff] %v2678_v50 }
  0x41   : > { %721 = vmatpush.bf16.msrb.mxu1 %v2572_v58 }
  0x42   : > { %802 = vmatpush.bf16.msrb.mxu2 %v2579_v59 }
  0x43   : > { %893 = vmatpush.bf16.msrb.mxu3 %v2584_v60  ;;  %v837_v60 = vshll.u32 %v833_v46, 16 }
  0x44   : > { %637 = vmatpush.bf16.msrb.mxu0 %v2593_v63 }
  0x45   : > { %722 = vmatpush.bf16.msrb.mxu1 %v2598_v22  ;;  %v839_v32 = vrot.slane %v837_v60, 1  ;;  %v2707_v60 = vld [vmem:[%s3108_s1 + $0x230] sm:$0xff] }
  0x46   : > { %803 = vmatpush.bf16.msrb.mxu2 %v2605_v26 }
  0x47   : > { %894 = vmatpush.bf16.msrb.mxu3 %v2610_v27  ;;  %v2659_v27 = vld [vmem:[%s3108_s1 + $0x1c8] sm:$0xff] }
  0x48   : > { %638 = vmatpush.bf16.msrb.mxu0 %v2617_v33  ;;  %3211 = vst [vmem:[#allocation38_spill] sm:$0xff] %v2659_v27 }
  0x49   : > { %723 = vmatpush.bf16.msrb.mxu1 %v2622_v36 }
  0x4a   : > { %804 = vmatpush.bf16.msrb.mxu2 %v2629_v38  ;;  %v2685_v38 = vpack.c.b16 %v666_v56, %v666_v56 }
  0x4b   : > { %895 = vmatpush.bf16.msrb.mxu3 %v2634_v45  ;;  %v2666_v45 = vld [vmem:[%s3108_s1 + $0x100] sm:$0xff] }
  0x4c   : > { %639 = vmatpush.bf16.msrb.mxu0 %v2642_v61  ;;  %v835_v61 = vshrl.u32 %v833_v46, 16  ;;  %v668_v56 = vrot.slane %v2685_v38, 1  ;;  %v2745_v38 = vld [vmem:[%s3108_s1 + $0x210] sm:$0xff] }
  0x4d   : > { %724 = vmatpush.bf16.msrb.mxu1 %v2647_v62  ;;  %v2683_v62 = vld [vmem:[%s3108_s1 + $0x1c0] sm:$0xff] }
  0x4e   : > { %805 = vmatpush.bf16.msrb.mxu2 %v2654_v30  ;;  %v2699_v46 = vor.u32 %v839_v32, %v835_v61  ;;  %v2718_v32 = vld [vmem:[%s3108_s1 + $0x228] sm:$0xff] }
  0x4f   : > { %896 = vmatpush.bf16.msrb.mxu3 %v2659_v27  ;;  %v2697_v27 = vld [vmem:[%s2409_s17 + $0x8] sm:$0x3] }
  0x50   : > { %640 = vmatpush.bf16.msrb.mxu0 %v2666_v45  ;;  %v1969_v61 = vld [vmem:[%s2409_s17 + $0x8] sm:$0x6] }
  0x51   : > { %725 = vmatpush.bf16.msrb.mxu1 %v2671_v52 }
  0x52   : > { %806 = vmatpush.bf16.msrb.mxu2 %v2678_v50 }
  0x53   : > { %897 = vmatpush.bf16.msrb.mxu3 %v2683_v62  ;;  %641 = vmatmul.bf16.vlgmr.msrb.gmra.mxu0 %v583_v25 }
  0x54   : > { %975 = vmatpush.bf16.msra.mxu0 %v2690_v37  ;;  %726 = vmatmul.bf16.vlgmr.msrb.gmra.mxu1 %v668_v56 }
  0x55   : > { %1004 = vmatpush.bf16.msra.mxu1 %v2291_v0  ;;  %807 = vmatmul.bf16.vlgmr.msrb.gmra.mxu2 %v2697_v27 }
  0x56   : > { %1017 = vmatpush.bf16.msra.mxu2 %v2296_v1  ;;  %898 = vmatmul.bf16.vlgmr.msrb.gmra.mxu3 %v2699_v46 }
  0x57   : > { %1030 = vmatpush.bf16.msra.mxu3 %v2301_v2 }
  0x58   : > { %976 = vmatpush.bf16.msra.mxu0 %v2707_v60 }
  0x59   : > { %1005 = vmatpush.bf16.msra.mxu1 %v2313_v4 }
  0x5a   : > { %1018 = vmatpush.bf16.msra.mxu2 %v2318_v5 }
  0x5b   : > { %1031 = vmatpush.bf16.msra.mxu3 %v2325_v6 }
  0x5c   : > { %977 = vmatpush.bf16.msra.mxu0 %v2718_v32 }
  0x5d   : > { %1006 = vmatpush.bf16.msra.mxu1 %v2338_v8 }
  0x5e   : > { %1019 = vmatpush.bf16.msra.mxu2 %v2343_v9 }
  0x5f   : > { %1032 = vmatpush.bf16.msra.mxu3 %v2350_v10  ;;  %v923_v10 = vunpack.c.l.b16 %v1969_v61 }
  0x60   : > { %978 = vmatpush.bf16.msra.mxu0 %v2727_v40 }
  0x61   : > { %1007 = vmatpush.bf16.msra.mxu1 %v2363_v12  ;;  %v924_v6 = vpack.c.b16 %v923_v10, %v923_v10  ;;  %v3217_v10 = vld [vmem:[#allocation18_spill] sm:$0xff] }
  0x62   : > { %1020 = vmatpush.bf16.msra.mxu2 %v2368_v13 }
  0x63   : > { %1033 = vmatpush.bf16.msra.mxu3 %v2375_v14  ;;  %v2755_v14 = vld [vmem:[%s3108_s1 + $0x208] sm:$0xff]  ;;  %v2770_v61 = vrot.slane %v924_v6, 1 }
  0x64   : > { %979 = vmatpush.bf16.msra.mxu0 %v2736_v44  ;;  %v3216_v6 = vld [vmem:[#allocation33_spill] sm:$0xff] }
  0x65   : > { %1008 = vmatpush.bf16.msra.mxu1 %v2387_v16 }
  0x66   : > { %1021 = vmatpush.bf16.msra.mxu2 %v2392_v17 }
  0x67   : > { %1034 = vmatpush.bf16.msra.mxu3 %v2399_v18  ;;  %v2764_v18 = vld [vmem:[%s3108_s1 + $0x200] sm:$0xff] }
  0x68   : > { %980 = vmatpush.bf16.msra.mxu0 %v2745_v38 }
  0x69   : > { %1009 = vmatpush.bf16.msra.mxu1 %v2414_v20 }
  0x6a   : > { %1022 = vmatpush.bf16.msra.mxu2 %v2421_v21 }
  0x6b   : > { %1035 = vmatpush.bf16.msra.mxu3 %v2429_v23 }
  0x6c   : > { %981 = vmatpush.bf16.msra.mxu0 %v2755_v14 }
  0x6d   : > { %1010 = vmatpush.bf16.msra.mxu1 %v2442_v28 }
  0x6e   : > { %1023 = vmatpush.bf16.msra.mxu2 %v2447_v29 }
  0x6f   : > { %1036 = vmatpush.bf16.msra.mxu3 %v2454_v31 }
  0x70   : > { %982 = vmatpush.bf16.msra.mxu0 %v2764_v18 }
  0x71   : > { %1011 = vmatpush.bf16.msra.mxu1 %v2466_v34 }
  0x72   : > { %1024 = vmatpush.bf16.msra.mxu2 %v2471_v35 }
  0x73   : > { %1037 = vmatpush.bf16.msra.mxu3 %v2478_v39  ;;  %983 = vmatmul.bf16.vlgmr.msra.gmra.mxu0 %v2770_v61 }
  0x74   : > { %1044 = vmatpush.bf16.msrb.mxu0 %v2306_v3  ;;  %1012 = vmatmul.bf16.vlgmr.msra.gmra.mxu1 %v583_v25  ;;  %v3219_v25 = vld [vmem:[#allocation36_spill] sm:$0xff] }
  0x75   : > { %1058 = vmatpush.bf16.msrb.mxu1 %v2488_v41  ;;  %1025 = vmatmul.bf16.vlgmr.msra.gmra.mxu2 %v2522_v49  ;;  %v3218_v49 = vld [vmem:[#allocation35_spill] sm:$0xff] }
  0x76   : > { %1072 = vmatpush.bf16.msrb.mxu2 %v2493_v42  ;;  %1038 = vmatmul.bf16.vlgmr.msra.gmra.mxu3 %v668_v56  ;;  %v3220_v56 = vld [vmem:[#allocation20_spill] sm:$0xff] }
  0x77   : > { %1088 = vmatpush.bf16.msrb.mxu3 %v2498_v43 }
  0x78   : > { %1045 = vmatpush.bf16.msrb.mxu0 %v2330_v7 }
  0x79   : > { %1059 = vmatpush.bf16.msrb.mxu1 %v2512_v47 }
  0x7a   : > { %1073 = vmatpush.bf16.msrb.mxu2 %v2519_v48 }
  0x7b   : > { %1089 = vmatpush.bf16.msrb.mxu3 %v2530_v51 }
  0x7c   : > { %1046 = vmatpush.bf16.msrb.mxu0 %v2355_v11 }
  0x7d   : > { %1060 = vmatpush.bf16.msrb.mxu1 %v2543_v53 }
  0x7e   : > { %1074 = vmatpush.bf16.msrb.mxu2 %v2548_v54 }
  0x7f   : > { %1090 = vmatpush.bf16.msrb.mxu3 %v2555_v55 }
  0x80   : > { %1047 = vmatpush.bf16.msrb.mxu0 %v2380_v15 }
  0x81   : > { %1061 = vmatpush.bf16.msrb.mxu1 %v2567_v57 }
  0x82   : > { %1075 = vmatpush.bf16.msrb.mxu2 %v2572_v58 }
  0x83   : > { %1091 = vmatpush.bf16.msrb.mxu3 %v2579_v59  ;;  %v3224_v59 = vld [vmem:[#allocation28_spill] sm:$0xff] }
  0x84   : > { %1048 = vmatpush.bf16.msrb.mxu0 %v2404_v19 }
  0x85   : > { %1062 = vmatpush.bf16.msrb.mxu1 %v2593_v63 }
  0x86   : > { %1076 = vmatpush.bf16.msrb.mxu2 %v2598_v22 }
  0x87   : > { %1092 = vmatpush.bf16.msrb.mxu3 %v2605_v26  ;;  %v3221_v26 = vld [vmem:[#allocation22_spill] sm:$0xff] }
  0x88   : > { %1049 = vmatpush.bf16.msrb.mxu0 %v2434_v24 }
  0x89   : > { %1063 = vmatpush.bf16.msrb.mxu1 %v2617_v33 }
  0x8a   : > { %1077 = vmatpush.bf16.msrb.mxu2 %v2622_v36 }
  0x8b   : > { %1093 = vmatpush.bf16.msrb.mxu3 %v3216_v6  ;;  %v2811_v6 = vld [vmem:[%s2409_s17 + $0xc] sm:$0x3] }
  0x8c   : > { %1050 = vmatpush.bf16.msrb.mxu0 %v3217_v10 }
  0x8d   : > { %1064 = vmatpush.bf16.msrb.mxu1 %v3218_v49 }
  0x8e   : > { %1078 = vmatpush.bf16.msrb.mxu2 %v3219_v25 }
  0x8f   : > { %1094 = vmatpush.bf16.msrb.mxu3 %v2654_v30  ;;  %v3223_v30 = vld [vmem:[#allocation26_spill] sm:$0xff] }
  0x90   : > { %1051 = vmatpush.bf16.msrb.mxu0 %v3220_v56 }
  0x91   : > { %1065 = vmatpush.bf16.msrb.mxu1 %v2666_v45 }
  0x92   : > { %1079 = vmatpush.bf16.msrb.mxu2 %v2671_v52 }
  0x93   : > { %1095 = vmatpush.bf16.msrb.mxu3 %v2678_v50  ;;  %1052 = vmatmul.bf16.vlgmr.msrb.gmra.mxu0 %v2697_v27  ;;  %v3222_v50 = vld [vmem:[#allocation24_spill] sm:$0xff] }
  0x94   : > { %1114 = vmatpush.bf16.msra.mxu0 %v3221_v26  ;;  %1066 = vmatmul.bf16.vlgmr.msrb.gmra.mxu1 %v2699_v46 }
  0x95   : > { %1134 = vmatpush.bf16.msra.mxu1 %v2690_v37  ;;  %1080 = vmatmul.bf16.vlgmr.msrb.gmra.mxu2 %v2770_v61 }
  0x96   : > { %1158 = vmatpush.bf16.msra.mxu2 %v2291_v0  ;;  %1096 = vmatmul.bf16.vlgmr.msrb.gmra.mxu3 %v2811_v6 }
  0x97   : > { %1171 = vmatpush.bf16.msra.mxu3 %v2296_v1  ;;  %v2019_v1 = vld [vmem:[%s2409_s17 + $0xc] sm:$0x7] }
  0x98   : > { %1115 = vmatpush.bf16.msra.mxu0 %v3222_v50  ;;  %v1104_v55 = vunpack.c.l.b16 %v2019_v1 }
  0x99   : > { %1135 = vmatpush.bf16.msra.mxu1 %v2707_v60 }
  0x9a   : > { %1159 = vmatpush.bf16.msra.mxu2 %v2313_v4 }
  0x9b   : > { %1172 = vmatpush.bf16.msra.mxu3 %v2318_v5  ;;  %v3225_v5 = vld [vmem:[#allocation31_spill] sm:$0xff] }
  0x9c   : > { %1116 = vmatpush.bf16.msra.mxu0 %v3223_v30  ;;  %v1105_v30 = vpack.c.b16 %v1104_v55, %v1104_v55 }
  0x9d   : > { %1136 = vmatpush.bf16.msra.mxu1 %v2718_v32 }
  0x9e   : > { %1160 = vmatpush.bf16.msra.mxu2 %v2338_v8  ;;  %v3226_v8 = vld [vmem:[#allocation34_spill] sm:$0xff]  ;;  %v1107_v55 = vshrl.u32 %v1105_v30, 16 }
  0x9f   : > { %1173 = vmatpush.bf16.msra.mxu3 %v2343_v9  ;;  %v2020_v9 = vld [vmem:[%s2409_s17 + $0xc] sm:$0x6] }
  0xa0   : > { %1117 = vmatpush.bf16.msra.mxu0 %v3224_v59  ;;  %v1130_v1 = vunpack.c.l.b16 %v2020_v9 }
  0xa1   : > { %1137 = vmatpush.bf16.msra.mxu1 %v2727_v40  ;;  %v1109_v40 = vshll.u32 %v1105_v30, 16 }
  0xa2   : > { %1161 = vmatpush.bf16.msra.mxu2 %v2363_v12 }
  0xa3   : > { %1174 = vmatpush.bf16.msra.mxu3 %v2368_v13  ;;  %v3227_v13 = vld [vmem:[#allocation38_spill] sm:$0xff] }
  0xa4   : > { %1118 = vmatpush.bf16.msra.mxu0 %v3225_v5 }
  0xa5   : > { %1138 = vmatpush.bf16.msra.mxu1 %v2736_v44  ;;  %v1111_v44 = vrot.slane %v1109_v40, 1  ;;  %v3229_v40 = vld [vmem:[#allocation10_spill] sm:$0xff] }
  0xa6   : > { %1162 = vmatpush.bf16.msra.mxu2 %v2387_v16  ;;  %v1131_v16 = vpack.c.b16 %v1130_v1, %v1130_v1 }
  0xa7   : > { %1175 = vmatpush.bf16.msra.mxu3 %v2392_v17  ;;  %v2847_v9 = vor.u32 %v1111_v44, %v1107_v55 }
  0xa8   : > { %1119 = vmatpush.bf16.msra.mxu0 %v3226_v8  ;;  %v2849_v17 = vrot.slane %v1131_v16, 1  ;;  %v3228_v16 = vld [vmem:[#allocation7_spill] sm:$0xff] }
  0xa9   : > { %1139 = vmatpush.bf16.msra.mxu1 %v2745_v38 }
  0xaa   : > { %1163 = vmatpush.bf16.msra.mxu2 %v2414_v20 }
  0xab   : > { %1176 = vmatpush.bf16.msra.mxu3 %v2421_v21 }
  0xac   : > { %1120 = vmatpush.bf16.msra.mxu0 %v3227_v13 }
  0xad   : > { %1140 = vmatpush.bf16.msra.mxu1 %v2755_v14 }
  0xae   : > { %1164 = vmatpush.bf16.msra.mxu2 %v2442_v28 }
  0xaf   : > { %1177 = vmatpush.bf16.msra.mxu3 %v2447_v29 }
  0xb0   : > { %1121 = vmatpush.bf16.msra.mxu0 %v2683_v62  ;;  %v325_v30 = vpop.f32.mrf.mxu0 }
  0xb1   : > { %1141 = vmatpush.bf16.msra.mxu1 %v2764_v18  ;;  %v386_v44 = vpop.f32.mrf.mxu1 }
  0xb2   : > { %1165 = vmatpush.bf16.msra.mxu2 %v2466_v34 }
  0xb3   : > { %1178 = vmatpush.bf16.msra.mxu3 %v2471_v35  ;;  %1122 = vmatmul.bf16.vlgmr.msra.gmra.mxu0 %v2847_v9  ;;  %v3231_v35 = vld [vmem:[#allocation15_spill] sm:$0xff] }
  0xb4   : > { %1184 = vmatpush.bf16.msrb.mxu0 %v2301_v2  ;;  %1142 = vmatmul.bf16.vlgmr.msra.gmra.mxu1 %v2849_v17 }
  0xb5   : > { %1198 = vmatpush.bf16.msrb.mxu1 %v2306_v3  ;;  %1166 = vmatmul.bf16.vlgmr.msra.gmra.mxu2 %v2699_v46  ;;  %v387_v46 = vadd.f32 %v386_v44, %v325_v30 }
  0xb6   : > { %1212 = vmatpush.bf16.msrb.mxu2 %v2488_v41  ;;  %1179 = vmatmul.bf16.vlgmr.msra.gmra.mxu3 %v2697_v27  ;;  %v3230_v27 = vld [vmem:[#allocation12_spill] sm:$0xff] }
  0xb7   : > { %1226 = vmatpush.bf16.msrb.mxu3 %v2493_v42 }
  0xb8   : > { %1185 = vmatpush.bf16.msrb.mxu0 %v3228_v16  ;;  %v470_v1 = vpop.f32.mrf.mxu2  ;;  %v327_v42 = vpop.f32.mrf.mxu0 }
  0xb9   : > { %1199 = vmatpush.bf16.msrb.mxu1 %v2330_v7  ;;  %v474_v55 = vadd.f32 %v470_v1, %v387_v46  ;;  %v388_v21 = vpop.f32.mrf.mxu1 }
  0xba   : > { %1213 = vmatpush.bf16.msrb.mxu2 %v2512_v47 }
  0xbb   : > { %1227 = vmatpush.bf16.msrb.mxu3 %v2519_v48  ;;  %v551_v48 = vpop.f32.mrf.mxu3 }
  0xbc   : > { %1186 = vmatpush.bf16.msrb.mxu0 %v3229_v40  ;;  %v555_v29 = vadd.f32 %v551_v48, %v474_v55  ;;  %v3232_v48 = vld [vmem:[#allocation25_spill] sm:$0xff]  ;;  %v2022_v55 = vld [vmem:[%s2409_s17 + $0x10] sm:$0x7] }
  0xbd   : > { %1200 = vmatpush.bf16.msrb.mxu1 %v2355_v11 }
  0xbe   : > { %1214 = vmatpush.bf16.msrb.mxu2 %v2543_v53 }
  0xbf   : > { %1228 = vmatpush.bf16.msrb.mxu3 %v2548_v54 }
  0xc0   : > { %1187 = vmatpush.bf16.msrb.mxu0 %v3230_v27  ;;  %v472_v30 = vpop.f32.mrf.mxu2 }
  0xc1   : > { %1201 = vmatpush.bf16.msrb.mxu1 %v2380_v15  ;;  %v3235_v30 = vld [vmem:[#allocation27_spill] sm:$0xff] }
  0xc2   : > { %1215 = vmatpush.bf16.msrb.mxu2 %v2567_v57 }
  0xc3   : > { %1229 = vmatpush.bf16.msrb.mxu3 %v2572_v58  ;;  %v553_v42 = vpop.f32.mrf.mxu3 }
  0xc4   : > { %1188 = vmatpush.bf16.msrb.mxu0 %v3231_v35  ;;  %v3236_v42 = vld [vmem:[#allocation41_spill] sm:$0xff] }
  0xc5   : > { %1202 = vmatpush.bf16.msrb.mxu1 %v2404_v19 }
  0xc6   : > { %1216 = vmatpush.bf16.msrb.mxu2 %v2593_v63 }
  0xc7   : > { %1230 = vmatpush.bf16.msrb.mxu3 %v2598_v22  ;;  %v3239_v22 = vld [vmem:[#allocation13_spill] sm:$0xff] }
  0xc8   : > { %1189 = vmatpush.bf16.msrb.mxu0 %v2429_v23 }
  0xc9   : > { %1203 = vmatpush.bf16.msrb.mxu1 %v2434_v24 }
  0xca   : > { %1217 = vmatpush.bf16.msrb.mxu2 %v2617_v33 }
  0xcb   : > { %1231 = vmatpush.bf16.msrb.mxu3 %v2622_v36  ;;  %v3237_v36 = vld [vmem:[#allocation30_spill] sm:$0xff] }
  0xcc   : > { %1190 = vmatpush.bf16.msrb.mxu0 %v2454_v31 }
  0xcd   : > { %1204 = vmatpush.bf16.msrb.mxu1 %v3217_v10 }
  0xce   : > { %1218 = vmatpush.bf16.msrb.mxu2 %v3218_v49 }
  0xcf   : > { %1232 = vmatpush.bf16.msrb.mxu3 %v3219_v25 }
  0xd0   : > { %1191 = vmatpush.bf16.msrb.mxu0 %v2478_v39  ;;  %v642_v21 = vpop.f32.mrf.mxu0 }
  0xd1   : > { %1205 = vmatpush.bf16.msrb.mxu1 %v3220_v56  ;;  %v646_v44 = vadd.f32 %v642_v21, %v555_v29  ;;  %v727_v46 = vpop.f32.mrf.mxu1 }
  0xd2   : > { %1219 = vmatpush.bf16.msrb.mxu2 %v2666_v45 }
  0xd3   : > { %1233 = vmatpush.bf16.msrb.mxu3 %v2671_v52  ;;  %1192 = vmatmul.bf16.vlgmr.msrb.gmra.mxu0 %v2770_v61  ;;  %v3234_v61 = vld [vmem:[#allocation8_spill] sm:$0xff]  ;;  %v731_v1 = vadd.f32 %v727_v46, %v646_v44  ;;  %v1258_v52 = vunpack.c.l.b16 %v2022_v55 }
  0xd4   : > { %1242 = vmatpush.bf16.msra.mxu0 %v2498_v43  ;;  %1206 = vmatmul.bf16.vlgmr.msrb.gmra.mxu1 %v2811_v6 }
  0xd5   : > { %1268 = vmatpush.bf16.msra.mxu1 %v3221_v26  ;;  %1220 = vmatmul.bf16.vlgmr.msrb.gmra.mxu2 %v2847_v9 }
  0xd6   : > { %1288 = vmatpush.bf16.msra.mxu2 %v2690_v37  ;;  %1234 = vmatmul.bf16.vlgmr.msrb.gmra.mxu3 %v2849_v17 }
  0xd7   : > { %1312 = vmatpush.bf16.msra.mxu3 %v2291_v0  ;;  %v3233_v0 = vld [vmem:[#allocation26_spill] sm:$0xff] }
  0xd8   : > { %1243 = vmatpush.bf16.msra.mxu0 %v2530_v51  ;;  %v644_v21 = vpop.f32.mrf.mxu0 }
  0xd9   : > { %1269 = vmatpush.bf16.msra.mxu1 %v3222_v50  ;;  %v899_v29 = vpop.f32.mrf.mxu3  ;;  %v729_v46 = vpop.f32.mrf.mxu1  ;;  %v2021_v21 = vld [vmem:[%s2409_s17 + $0x10] sm:$0x3] }
  0xda   : > { %1289 = vmatpush.bf16.msra.mxu2 %v2707_v60 }
  0xdb   : > { %1313 = vmatpush.bf16.msra.mxu3 %v2313_v4  ;;  %v808_v4 = vpop.f32.mrf.mxu2 }
  0xdc   : > { %1244 = vmatpush.bf16.msra.mxu0 %v3232_v48  ;;  %v812_v25 = vadd.f32 %v808_v4, %v731_v1  ;;  %v3241_v4 = vld [vmem:[#allocation37_spill] sm:$0xff] }
  0xdd   : > { %1270 = vmatpush.bf16.msra.mxu1 %v3233_v0 }
  0xde   : > { %1290 = vmatpush.bf16.msra.mxu2 %v2718_v32  ;;  %v903_v44 = vadd.f32 %v899_v29, %v812_v25  ;;  %v3242_v29 = vld [vmem:[#allocation40_spill] sm:$0xff] }
  0xdf   : > { %1314 = vmatpush.bf16.msra.mxu3 %v3234_v61  ;;  %v3238_v61 = vld [vmem:[#allocation42_spill] sm:$0xff] }
  0xe0   : > { %1245 = vmatpush.bf16.msra.mxu0 %v3235_v30  ;;  %v1259_v30 = vpack.c.b16 %v1258_v52, %v1258_v52 }
  0xe1   : > { %1271 = vmatpush.bf16.msra.mxu1 %v3224_v59  ;;  %v2023_v59 = vld [vmem:[%s2409_s17 + $0x10] sm:$0x6]  ;;  %v901_v25 = vpop.f32.mrf.mxu3 }
  0xe2   : > { %1291 = vmatpush.bf16.msra.mxu2 %v3236_v42  ;;  %v3240_v42 = vld [vmem:[#allocation33_spill] sm:$0xff]  ;;  %v1263_v1 = vshll.u32 %v1259_v30, 16  ;;  %v1261_v52 = vshrl.u32 %v1259_v30, 16  ;;  %v2024_v25 = vld [vmem:[%s2409_s17 + $0x14] sm:$0x3] }
  0xe3   : > { %1315 = vmatpush.bf16.msra.mxu3 %v2363_v12  ;;  %v1284_v12 = vunpack.c.l.b16 %v2023_v59  ;;  %v810_v55 = vpop.f32.mrf.mxu2 }
  0xe4   : > { %1246 = vmatpush.bf16.msra.mxu0 %v3237_v36  ;;  %v1265_v59 = vrot.slane %v1263_v1, 1 }
  0xe5   : > { %1272 = vmatpush.bf16.msra.mxu1 %v3225_v5 }
  0xe6   : > { %1292 = vmatpush.bf16.msra.mxu2 %v3238_v61  ;;  %v1266_v46 = vor.u32 %v1265_v59, %v1261_v52 }
  0xe7   : > { %1316 = vmatpush.bf16.msra.mxu3 %v3239_v22  ;;  %v2921_v22 = vpack.c.b16 %v1284_v12, %v1284_v12  ;;  %v3243_v12 = vld [vmem:[#allocation5_spill] sm:$0xff] }
  0xe8   : > { %1247 = vmatpush.bf16.msra.mxu0 %v3240_v42 }
  0xe9   : > { %1273 = vmatpush.bf16.msra.mxu1 %v3226_v8 }
  0xea   : > { %1293 = vmatpush.bf16.msra.mxu2 %v2745_v38 }
  0xeb   : > { %1317 = vmatpush.bf16.msra.mxu3 %v2414_v20  ;;  %v1286_v20 = vrot.slane %v2921_v22, 1 }
  0xec   : > { %1248 = vmatpush.bf16.msra.mxu0 %v3241_v4 }
  0xed   : > { %1274 = vmatpush.bf16.msra.mxu1 %v3227_v13 }
  0xee   : > { %1294 = vmatpush.bf16.msra.mxu2 %v2755_v14 }
  0xef   : > { %1318 = vmatpush.bf16.msra.mxu3 %v2442_v28  ;;  %v3244_v28 = vld [vmem:[#allocation6_spill] sm:$0xff] }
  0xf0   : > { %1249 = vmatpush.bf16.msra.mxu0 %v3242_v29 }
  0xf1   : > { %1275 = vmatpush.bf16.msra.mxu1 %v2683_v62 }
  0xf2   : > { %1295 = vmatpush.bf16.msra.mxu2 %v2764_v18 }
  0xf3   : > { %1319 = vmatpush.bf16.msra.mxu3 %v2466_v34  ;;  %1250 = vmatmul.bf16.vlgmr.msra.gmra.mxu0 %v2021_v21  ;;  %v3245_v34 = vld [vmem:[#allocation9_spill] sm:$0xff] }
  0xf4   : > { %1325 = vmatpush.bf16.msrb.mxu0 %v3243_v12  ;;  %1276 = vmatmul.bf16.vlgmr.msra.gmra.mxu1 %v1266_v46 }
  0xf5   : > { %1338 = vmatpush.bf16.msrb.mxu1 %v2301_v2  ;;  %1296 = vmatmul.bf16.vlgmr.msra.gmra.mxu2 %v1286_v20  ;;  %v984_v2 = vpop.f32.mrf.mxu0 }
  0xf6   : > { %1352 = vmatpush.bf16.msrb.mxu2 %v2306_v3  ;;  %1320 = vmatmul.bf16.vlgmr.msra.gmra.mxu3 %v2847_v9  ;;  %v2944_v3 = vadd.f32 %v984_v2, %v903_v44  ;;  %v3246_v9 = vld [vmem:[#allocation11_spill] sm:$0xff] }
  0xf7   : > { %1366 = vmatpush.bf16.msrb.mxu3 %v2488_v41  ;;  %v1013_v41 = vpop.f32.mrf.mxu1 }
  0xf8   : > { %1326 = vmatpush.bf16.msrb.mxu0 %v3244_v28 }
  0xf9   : > { %1339 = vmatpush.bf16.msrb.mxu1 %v3228_v16  ;;  %v1039_v16 = vpop.f32.mrf.mxu3 }
  0xfa   : > { %1353 = vmatpush.bf16.msrb.mxu2 %v2330_v7  ;;  %v1026_v7 = vpop.f32.mrf.mxu2 }
  0xfb   : > { %1367 = vmatpush.bf16.msrb.mxu3 %v2512_v47  ;;  %v1027_v47 = vadd.f32 %v1026_v7, %v1013_v41 }
  0xfc   : > { %1327 = vmatpush.bf16.msrb.mxu0 %v3245_v34 }
  0xfd   : > { %1340 = vmatpush.bf16.msrb.mxu1 %v3229_v40  ;;  %v986_v30 = vpop.f32.mrf.mxu0  ;;  %v3247_v40 = vld [vmem:[#allocation14_spill] sm:$0xff]  ;;  %v1043_v44 = vadd.f32 %v1039_v16, %v1027_v47 }
  0xfe   : > { %1354 = vmatpush.bf16.msrb.mxu2 %v2355_v11 }
  0xff   : > { %1368 = vmatpush.bf16.msrb.mxu3 %v2543_v53  ;;  %v1015_v11 = vpop.f32.mrf.mxu1  ;;  %v3248_v53 = vld [vmem:[#allocation16_spill] sm:$0xff] }
 0x100   : > { %1328 = vmatpush.bf16.msrb.mxu0 %v3246_v9 }
 0x101   : > { %1341 = vmatpush.bf16.msrb.mxu1 %v3230_v27  ;;  %v3249_v27 = vld [vmem:[#allocation17_spill] sm:$0xff] }
 0x102   : > { %1355 = vmatpush.bf16.msrb.mxu2 %v2380_v15  ;;  %v1028_v15 = vpop.f32.mrf.mxu2 }
 0x103   : > { %1369 = vmatpush.bf16.msrb.mxu3 %v2567_v57  ;;  %v1041_v57 = vpop.f32.mrf.mxu3 }
 0x104   : > { %1329 = vmatpush.bf16.msrb.mxu0 %v3247_v40 }
 0x105   : > { %1342 = vmatpush.bf16.msrb.mxu1 %v3231_v35 }
 0x106   : > { %1356 = vmatpush.bf16.msrb.mxu2 %v2404_v19  ;;  %v3250_v19 = vld [vmem:[#allocation19_spill] sm:$0xff] }
 0x107   : > { %1370 = vmatpush.bf16.msrb.mxu3 %v2593_v63 }
 0x108   : > { %1330 = vmatpush.bf16.msrb.mxu0 %v3248_v53 }
 0x109   : > { %1343 = vmatpush.bf16.msrb.mxu1 %v2429_v23  ;;  %v3251_v23 = vld [vmem:[#allocation21_spill] sm:$0xff] }
 0x10a   : > { %1357 = vmatpush.bf16.msrb.mxu2 %v2434_v24  ;;  %v3252_v24 = vld [vmem:[#allocation23_spill] sm:$0xff] }
 0x10b   : > { %1371 = vmatpush.bf16.msrb.mxu3 %v2617_v33  ;;  %v3255_v33 = vld [vmem:[#allocation41_spill] sm:$0xff] }
 0x10c   : > { %1331 = vmatpush.bf16.msrb.mxu0 %v3249_v27 }
 0x10d   : > { %1344 = vmatpush.bf16.msrb.mxu1 %v2454_v31 }
 0x10e   : > { %1358 = vmatpush.bf16.msrb.mxu2 %v3217_v10 }
 0x10f   : > { %1372 = vmatpush.bf16.msrb.mxu3 %v3218_v49  ;;  %v3257_v49 = vld [vmem:[#allocation32_spill] sm:$0xff] }
 0x110   : > { %1332 = vmatpush.bf16.msrb.mxu0 %v3250_v19  ;;  %v1053_v31 = vpop.f32.mrf.mxu0 }
 0x111   : > { %1345 = vmatpush.bf16.msrb.mxu1 %v2478_v39  ;;  %v1057_v35 = vadd.f32 %v1053_v31, %v1043_v44  ;;  %v1067_v39 = vpop.f32.mrf.mxu1 }
 0x112   : > { %1359 = vmatpush.bf16.msrb.mxu2 %v3220_v56 }
 0x113   : > { %1373 = vmatpush.bf16.msrb.mxu3 %v2666_v45  ;;  %1333 = vmatmul.bf16.vlgmr.msrb.gmra.mxu0 %v2811_v6 }
 0x114   : > { %1380 = vmatpush.bf16.msra.mxu0 %v3251_v23  ;;  %1346 = vmatmul.bf16.vlgmr.msrb.gmra.mxu1 %v2849_v17  ;;  %v2025_v17 = vld [vmem:[%s2409_s17 + $0x14] sm:$0x7] }
 0x115   : > { %1396 = vmatpush.bf16.msra.mxu1 %v2498_v43  ;;  %1360 = vmatmul.bf16.vlgmr.msrb.gmra.mxu2 %v2021_v21  ;;  %v1071_v43 = vadd.f32 %v1067_v39, %v1057_v35  ;;  %v1412_v63 = vunpack.c.l.b16 %v2025_v17 }
 0x116   : > { %1422 = vmatpush.bf16.msra.mxu2 %v3221_v26  ;;  %1374 = vmatmul.bf16.vlgmr.msrb.gmra.mxu3 %v1266_v46  ;;  %v3254_v26 = vld [vmem:[#allocation28_spill] sm:$0xff] }
 0x117   : > { %1442 = vmatpush.bf16.msra.mxu3 %v2690_v37  ;;  %v1413_v6 = vpack.c.b16 %v1412_v63, %v1412_v63 }
 0x118   : > { %1381 = vmatpush.bf16.msra.mxu0 %v3252_v24  ;;  %v1055_v37 = vpop.f32.mrf.mxu0 }
 0x119   : > { %1397 = vmatpush.bf16.msra.mxu1 %v2530_v51  ;;  %v3253_v51 = vld [vmem:[#allocation27_spill] sm:$0xff]  ;;  %v1069_v10 = vpop.f32.mrf.mxu1  ;;  %v1417_v56 = vshll.u32 %v1413_v6, 16  ;;  %v1415_v1 = vshrl.u32 %v1413_v6, 16 }
 0x11a   : > { %1423 = vmatpush.bf16.msra.mxu2 %v3222_v50  ;;  %v1097_v50 = vpop.f32.mrf.mxu3 }
 0x11b   : > { %1443 = vmatpush.bf16.msra.mxu3 %v2707_v60  ;;  %v3256_v60 = vld [vmem:[#allocation29_spill] sm:$0xff] }
 0x11c   : > { %1382 = vmatpush.bf16.msra.mxu0 %v2548_v54  ;;  %v1081_v54 = vpop.f32.mrf.mxu2 }
 0x11d   : > { %1398 = vmatpush.bf16.msra.mxu1 %v3232_v48  ;;  %v1085_v45 = vadd.f32 %v1081_v54, %v1071_v43 }
 0x11e   : > { %1424 = vmatpush.bf16.msra.mxu2 %v3233_v0  ;;  %v2999_v0 = vld [vmem:[%s3109_s2] ss:$0 sm:$0xff] }
 0x11f   : > { %1444 = vmatpush.bf16.msra.mxu3 %v2718_v32  ;;  %v1101_v32 = vadd.f32 %v1097_v50, %v1085_v45 }
 0x120   : > { %1383 = vmatpush.bf16.msra.mxu0 %v2572_v58  ;;  %v2026_v58 = vld [vmem:[%s2409_s17 + $0x14] sm:$0x6] }
 0x121   : > { %1399 = vmatpush.bf16.msra.mxu1 %v3253_v51  ;;  %v1438_v48 = vunpack.c.l.b16 %v2026_v58 }
 0x122   : > { %1425 = vmatpush.bf16.msra.mxu2 %v3254_v26 }
 0x123   : > { %1445 = vmatpush.bf16.msra.mxu3 %v3255_v33  ;;  %v1439_v55 = vpack.c.b16 %v1438_v48, %v1438_v48 }
 0x124   : > { %1384 = vmatpush.bf16.msra.mxu0 %v3256_v60 }
 0x125   : > { %1400 = vmatpush.bf16.msra.mxu1 %v3237_v36  ;;  %v1083_v36 = vpop.f32.mrf.mxu2  ;;  %v1440_v59 = vrot.slane %v1439_v55, 1 }
 0x126   : > { %1426 = vmatpush.bf16.msra.mxu2 %v3225_v5  ;;  %v1099_v5 = vpop.f32.mrf.mxu3 }
 0x127   : > { %1446 = vmatpush.bf16.msra.mxu3 %v3238_v61  ;;  %v3258_v61 = vld [vmem:[#allocation36_spill] sm:$0xff] }
 0x128   : > { %1385 = vmatpush.bf16.msra.mxu0 %v3257_v49 }
 0x129   : > { %1401 = vmatpush.bf16.msra.mxu1 %v3240_v42  ;;  %v1419_v42 = vrot.slane %v1417_v56, 1 }
 0x12a   : > { %1427 = vmatpush.bf16.msra.mxu2 %v3226_v8  ;;  %v993_v8 = vadd.f32 %v2999_v0, %v2944_v3 }
 0x12b   : > { %1447 = vmatpush.bf16.msra.mxu3 %v2745_v38  ;;  %v3259_v38 = vld [vmem:[#allocation39_spill] sm:$0xff]  ;;  %v1420_v52 = vor.u32 %v1419_v42, %v1415_v1 }
 0x12c   : > { %1386 = vmatpush.bf16.msra.mxu0 %v3258_v61 }
 0x12d   : > { %1402 = vmatpush.bf16.msra.mxu1 %v3241_v4  ;;  %v994_v4 = vmax.f32 %v993_v8, 0.0 }
 0x12e   : > { %1428 = vmatpush.bf16.msra.mxu2 %v3227_v13 }
 0x12f   : > { %1448 = vmatpush.bf16.msra.mxu3 %v2755_v14  ;;  %v996_v13 = vsel %vm995_vm0, %v994_v4, 0.0 }
 0x130   : > { %1387 = vmatpush.bf16.msra.mxu0 %v3259_v38  ;;  %v997_v14 = vrot.slane %v996_v13, 4  ;;  %v1123_v21 = vpop.f32.mrf.mxu0 }
 0x131   : > { %1403 = vmatpush.bf16.msra.mxu1 %v3242_v29  ;;  %v1143_v29 = vpop.f32.mrf.mxu1  ;;  %v1127_v46 = vadd.f32 %v1123_v21, %v1101_v32 }
 0x132   : > { %1429 = vmatpush.bf16.msra.mxu2 %v2683_v62  ;;  %v998_v28 = vadd.f32 %v997_v14, %v996_v13  ;;  %v1481_v13 = vld [vmem:[%s3110_s3 + $0x70] sm:$0xff]  ;;  %v1480_v14 = vld [vmem:[%s3110_s3 + $0x68] sm:$0xff] }
 0x133   : > { %1449 = vmatpush.bf16.msra.mxu3 %v2764_v18  ;;  %1388 = vmatmul.bf16.vlgmr.msra.gmra.mxu0 %v1286_v20  ;;  %v1147_v12 = vadd.f32 %v1143_v29, %v1127_v46  ;;  %v1479_v29 = vld [vmem:[%s3110_s3 + $0x60] sm:$0xff] }
 0x134   : > { %1404 = vmatmul.bf16.vlgmr.msra.gmra.mxu1 %v2024_v25  ;;  %v999_v3 = vrot.slane %v998_v28, 2 }
 0x135   : > { %1430 = vmatmul.bf16.vlgmr.msra.gmra.mxu2 %v1420_v52  ;;  %v1148_v62 = vadd.f32 %v2999_v0, %v1147_v12  ;;  %v1478_v12 = vld [vmem:[%s3110_s3 + $0x58] sm:$0xff] }
 0x136   : > { %1450 = vmatmul.bf16.vlgmr.msra.gmra.mxu3 %v1440_v59  ;;  %v1000_v47 = vadd.f32 %v999_v3, %v998_v28  ;;  %v1482_v59 = vld [vmem:[%s3110_s3 + $0x78] sm:$0xff]  ;;  %v1475_v3 = vld [vmem:[%s3110_s3 + $0x40] sm:$0xff] }
 0x137   : > { %v1149_v2 = vmax.f32 %v1148_v62, 0.0  ;;  %1484 = vmatpush.msrb.mxu0 %v1482_v59 }
 0x138   : > { %v1167_v18 = vpop.f32.mrf.mxu2  ;;  %v1125_v22 = vpop.f32.mrf.mxu0  ;;  %v1001_v11 = vrot.slane %v1000_v47, 1 }
 0x139   : > { %v1180_v34 = vpop.f32.mrf.mxu3  ;;  %v1145_v20 = vpop.f32.mrf.mxu1  ;;  %v1150_v9 = vsel %vm995_vm0, %v1149_v2, 0.0  ;;  %1485 = vmatpush.msrb.mxu0 %v1481_v13  ;;  %v1477_v2 = vld [vmem:[%s3110_s3 + $0x50] sm:$0xff]  ;;  %v1474_v22 = vld [vmem:[%s3110_s3 + $0x38] sm:$0xff] }
 0x13a   : > { %v1181_v41 = vadd.f32 %v1180_v34, %v1167_v18  ;;  %v1151_v7 = vrot.slane %v1150_v9, 4  ;;  %v1002_v57 = vadd.f32 %v1001_v11, %v1000_v47  ;;  %v1476_v34 = vld [vmem:[%s3110_s3 + $0x48] sm:$0xff] }
 0x13b   : > { %1486 = vmatpush.msrb.mxu0 %v1480_v14  ;;  %v1472_v47 = vld [vmem:[%s3110_s3 + $0x28] sm:$0xff] }
 0x13c   : > { %v1152_v16 = vadd.f32 %v1151_v7, %v1150_v9  ;;  %v1473_v9 = vld [vmem:[%s3110_s3 + $0x30] sm:$0xff]  ;;  %v1468_v11 = vld [vmem:[%s3110_s3 + $0x8] sm:$0xff] }
 0x13d   : > { %1487 = vmatpush.msrb.mxu0 %v1479_v29 }
 0x13e   : > { %v1153_v30 = vrot.slane %v1152_v16, 2 }
 0x13f   : > { %1488 = vmatpush.msrb.mxu0 %v1478_v12 }
 0x140   : > { %v1169_v40 = vpop.f32.mrf.mxu2  ;;  %v1154_v53 = vadd.f32 %v1153_v30, %v1152_v16  ;;  %v1471_v16 = vld [vmem:[%s3110_s3 + $0x20] sm:$0xff] }
 0x141   : > { %v1182_v44 = vpop.f32.mrf.mxu3  ;;  %1489 = vmatpush.msrb.mxu0 %v1477_v2  ;;  %v1470_v40 = vld [vmem:[%s3110_s3 + $0x18] sm:$0xff] }
 0x142   : > { %v1155_v15 = vrot.slane %v1154_v53, 1  ;;  %v1469_v44 = vld [vmem:[%s3110_s3 + $0x10] sm:$0xff] }
 0x143   : > { %1490 = vmatpush.msrb.mxu0 %v1476_v34 }
 0x144   : > { %v1156_v27 = vadd.f32 %v1155_v15, %v1154_v53  ;;  %v1467_v15 = vld [vmem:[%s3110_s3] sm:$0xff] }
 0x145   : > { %1491 = vmatpush.msrb.mxu0 %v1475_v3 }
 0x146   : > { %v1157_v19 = vadd.f32 %v1156_v27, %v1002_v57 }
 0x147   : > { %1492 = vmatpush.msrb.mxu0 %v1474_v22 }
 0x149   : > { %1493 = vmatpush.msrb.mxu0 %v1473_v9 }
 0x14b   : > { %1494 = vmatpush.msrb.mxu0 %v1472_v47 }
 0x14d   : > { %1495 = vmatpush.msrb.mxu0 %v1471_v16 }
 0x14f   : > { %1496 = vmatpush.msrb.mxu0 %v1470_v40 }
 0x150   : > { %v1193_v23 = vpop.f32.mrf.mxu0 }
 0x151   : > { %v1197_v24 = vadd.f32 %v1193_v23, %v1181_v41  ;;  %v1207_v31 = vpop.f32.mrf.mxu1  ;;  %1497 = vmatpush.msrb.mxu0 %v1469_v44 }
 0x153   : > { %v1211_v35 = vadd.f32 %v1207_v31, %v1197_v24  ;;  %1498 = vmatpush.msrb.mxu0 %v1468_v11 }
 0x155   : > { %1499 = vmatpush.msrb.mxu0 %v1467_v15 }
 0x158   : > { %v1221_v39 = vpop.f32.mrf.mxu2  ;;  %v1195_v51 = vpop.f32.mrf.mxu0 }
 0x159   : > { %v1225_v17 = vadd.f32 %v1221_v39, %v1211_v35  ;;  %v1235_v43 = vpop.f32.mrf.mxu3  ;;  %v1209_v26 = vpop.f32.mrf.mxu1 }
 0x15b   : > { %v1239_v63 = vadd.f32 %v1235_v43, %v1225_v17 }
 0x160   : > { %v1223_v33 = vpop.f32.mrf.mxu2 }
 0x161   : > { %v1237_v54 = vpop.f32.mrf.mxu3 }
 0x170   : > { %v1251_v45 = vpop.f32.mrf.mxu0 }
 0x171   : > { %v1255_v50 = vadd.f32 %v1251_v45, %v1239_v63  ;;  %v1277_v37 = vpop.f32.mrf.mxu1 }
 0x173   : > { %v1281_v60 = vadd.f32 %v1277_v37, %v1255_v50 }
 0x178   : > { %v1297_v32 = vpop.f32.mrf.mxu2  ;;  %v1253_v58 = vpop.f32.mrf.mxu0 }
 0x179   : > { %v1301_v6 = vadd.f32 %v1297_v32, %v1281_v60  ;;  %v1321_v10 = vpop.f32.mrf.mxu3  ;;  %v1279_v56 = vpop.f32.mrf.mxu1 }
 0x17a   : > { %v1504_v56 = vlaneseq }
 0x17b   : > { %v1302_v49 = vadd.f32 %v2999_v0, %v1301_v6 }
 0x17d   : > { %v1303_v48 = vmax.f32 %v1302_v49, 0.0 }
 0x17f   : > { %v1304_v36 = vsel %vm995_vm0, %v1303_v48, 0.0  ;;  %v1505_v48 = vand.u32 127, %v1504_v56 }
 0x180   : > { %v1305_v5 = vrot.slane %v1304_v36, 4  ;;  %v1299_v61 = vpop.f32.mrf.mxu2 }
 0x181   : > { %v1323_v1 = vpop.f32.mrf.mxu3  ;;  %vm1506_vm1 = vcmp.lt.s32.totalorder %v1505_v48, 10 }
 0x182   : > { %v1306_v42 = vadd.f32 %v1305_v5, %v1304_v36 }
 0x184   : > { %v1307_v55 = vrot.slane %v1306_v42, 2 }
 0x186   : > { %v1308_v8 = vadd.f32 %v1307_v55, %v1306_v42 }
 0x188   : > { %v1309_v38 = vrot.slane %v1308_v8, 1 }
 0x18a   : > { %v1310_v25 = vadd.f32 %v1309_v38, %v1308_v8 }
 0x18c   : > { %v3019_v52 = vadd.f32 %v1310_v25, %v1157_v19 }
 0x190   : > { %v1334_v4 = vpop.f32.mrf.mxu0 }
 0x191   : > { %v1347_v21 = vpop.f32.mrf.mxu1  ;;  %v1335_v7 = vadd.f32 %v1334_v4, %v1321_v10 }
 0x193   : > { %v1351_v30 = vadd.f32 %v1347_v21, %v1335_v7 }
 0x198   : > { %v1361_v46 = vpop.f32.mrf.mxu2  ;;  %v1336_v62 = vpop.f32.mrf.mxu0 }
 0x199   : > { %v1375_v28 = vpop.f32.mrf.mxu3  ;;  %v1349_v18 = vpop.f32.mrf.mxu1  ;;  %v1365_v53 = vadd.f32 %v1361_v46, %v1351_v30 }
 0x19b   : > { %v1379_v57 = vadd.f32 %v1375_v28, %v1365_v53 }
 0x1a0   : > { %v1363_v41 = vpop.f32.mrf.mxu2 }
 0x1a1   : > { %v1377_v20 = vpop.f32.mrf.mxu3 }
 0x1b0   : > { %v1389_v27 = vpop.f32.mrf.mxu0 }
 0x1b1   : > { %v1405_v19 = vpop.f32.mrf.mxu1  ;;  %v1393_v23 = vadd.f32 %v1389_v27, %v1379_v57 }
 0x1b3   : > { %v1409_v24 = vadd.f32 %v1405_v19, %v1393_v23 }
 0x1b8   : > { %v1431_v31 = vpop.f32.mrf.mxu2  ;;  %v1391_v17 = vpop.f32.mrf.mxu0 }
 0x1b9   : > { %v1451_v35 = vpop.f32.mrf.mxu3  ;;  %v1435_v39 = vadd.f32 %v1431_v31, %v1409_v24  ;;  %v1407_v43 = vpop.f32.mrf.mxu1 }
 0x1bb   : > { %v1455_v51 = vadd.f32 %v1451_v35, %v1435_v39 }
 0x1bd   : > { %v1456_v63 = vadd.f32 %v2999_v0, %v1455_v51  ;;  %v1483_v0 = vld [vmem:[%s3111_s4] sm:$0x1] }
 0x1bf   : > { %v1457_v26 = vmax.f32 %v1456_v63, 0.0 }
 0x1c0   : > { %v1433_v33 = vpop.f32.mrf.mxu2 }
 0x1c1   : > { %v1453_v54 = vpop.f32.mrf.mxu3  ;;  %v1458_v45 = vsel %vm995_vm0, %v1457_v26, 0.0 }
 0x1c2   : > { %v1459_v50 = vrot.slane %v1458_v45, 4 }
 0x1c4   : > { %v1460_v37 = vadd.f32 %v1459_v50, %v1458_v45 }
 0x1c6   : > { %v1461_v60 = vrot.slane %v1460_v37, 2 }
 0x1c8   : > { %v1462_v32 = vadd.f32 %v1461_v60, %v1460_v37 }
 0x1ca   : > { %v1463_v6 = vrot.slane %v1462_v32, 1 }
 0x1cc   : > { %v1464_v10 = vadd.f32 %v1463_v6, %v1462_v32 }
 0x1ce   : > { %v1465_v58 = vadd.f32 %v1464_v10, %v3019_v52 }
 0x1d0   : > { %v1466_v49 = vmul.f32 0.0625, %v1465_v58 }
 0x1d2   : > { %1500 = vmatmul.f32.vlgmr.msrb.gmra.mxu0 %v1466_v49 }
 0x24f   : > { %v1501_v36 = vpop.f32.mrf.mxu0 }
 0x250   : > { %v1502_v5 = vadd.f32 %v1501_v36, %v1483_v0 }
 0x252   : > { %v1507_v61 = vsel %vm1506_vm1, %v1502_v5, -1e+30 }
 0x253   : > { %v1509_v1 = vsel %vm1508_vm2, %v1507_v61, -inf }
 0x254   : > { %1510 = vmax.xlane.f32.xlu0 %v1509_v1 }
 0x2c7   : > { %v1511_v42 = vpop.xlane.xlu0 %1510 }
 0x2c8   : > { %v1512_v55 = vsub.f32 %v1507_v61, %v1511_v42 }
 0x2ca   : > { %v1513_v8 = vmul.f32 1.442695, %v1512_v55 }
 0x2cc   : > { %2142 = vpow2.f32 %v1513_v8 }
 0x2d2   : > { %v2143_v38 = vpop.eup %2142 }
 0x2d3   : > { %v1515_v25 = vsel %vm1506_vm1, %v2143_v38, 0.0 }
 0x2d4   : > { %v1516_v52 = vsel %vm1508_vm2, %v1515_v25, 0.0 }
 0x2d5   : > { %1517 = vadd.xlane.f32.xlu0 %v1516_v52 }
 0x348   : > { %v1518_v59 = vpop.xlane.xlu0 %1517 }
 0x349   : > { %2144 = vlog2.f32 %v1518_v59 }
 0x34f   : > { %v2145_v4 = vpop.eup %2144 }
 0x350   : > { %v1520_v13 = vmul.f32 0.6931472, %v2145_v4 }
 0x352   : > { %v1521_v14 = vsub.f32 %v1512_v55, %v1520_v13 }
 0x354   : > { %1522 = vst [vmem:[%s216_s8] sm:$0x1] %v1521_v14 }
 0x355   : > { %2173 = shalt.err (!%p2170_p3)
}
 0x356   : > { %2102 = dma.vmem_to_hbm [thread:$0]  (%p2278_p5), %s1535_s9, 16, %s1537_s10, %s1524_s11  }
 0x357 PF: > { %p2108_p4 = scmp.ge.s32.totalorder %s2208_s21, 2  ;;  %s1548_s17 = sand.u32 1, %s2196_s18  }
 0x358   : > { %s1549_s25 = scalar_lea.sflag [#allocation3], %s1548_s17 }
 0x359   : > { %p2105_p7 = pnand %p2108_p4, %p2282_p6 }
 0x35b   : > { %p2106_p8 = pneg %p2105_p7 }
 0x35d   : > { %2191 = dma.done.wait (%p2106_p8), %s1549_s25, 16  }
 0x35e   : > { %2193 = vsyncadd (%p2106_p8), %s1549_s25, 4294967280  ;;  %p15_p9 = scmp.ge.s32.totalorder %s2265_s24, 4   ;;  %s3260_s18 = smov %s2200_s19 }
 0x35f   : > { %s3261_s19 = smov %s2204_s20  ;;  %s3262_s20 = smov %s2276_s27 }
 0x360   : > { %s3263_s21 = smov %s2265_s24  ;;  %17 = sbr.rel (!%p15_p9) target bundleno = 3 (0x3), region = 88 }
 0x365   :  { %1554 = vsyncpa [#allocation3], 1 }
 0x366   :  { %1556 = vsyncpa [#allocation3 + $0x1], 1 }

</bundles_post_ra>
